<compile_context>
chip_gen: v6e
topology: v6e:2x2x1
jax: 0.10.0
libtpu: 0.0.40
codegen_flags: <defaults>
</compile_context>

<pallas_src>
import jax
import jax.numpy as jnp
from jax import lax
from jax.experimental import pallas as pl
from jax.experimental.pallas import tpu as pltpu

C1P = 16           # conv1 out-channels padded 10 -> 16 (one lane group)
C2P = 32           # conv2 out-channels padded 20 -> 32 (one lane group)
L1 = 12 * C1P      # conv1 pooled lane width (12 pooled cols x 16) = 192
L2 = 4 * C2P       # conv2 pooled lane width (4  pooled cols x 32) = 128
H1P = 64           # fc1 hidden padded 50 -> 64
NCLS = 128         # fc2 logits padded 10 -> 128 (lane-dense output store)
NEG = -1e9         # "minus infinity" bias for padded logit lanes
MAX_BT = 128       # max batch tile (v5e-safe; review: 64-128 sweet spot)


def _pick_bt(batch):
    """Batch tile: multiple of 8, <= 128, and (when possible) grid >= 2 for v7x."""
    if batch <= 8:
        return 8
    return min(MAX_BT, (((batch + 1) // 2) + 7) // 8 * 8)


# --------------------------- Pallas kernel -----------------------------------

def _make_kernel(BT):
    def kernel(x_ref, w1e_ref, w1o_ref, b1_ref, w2e_ref, w2o_ref, b2_ref,
               f1_ref, g1_ref, f2_ref, g2_ref, o_ref, y1_ref):
        # ---- conv1: one K=140 dot per output-column parity ----------------------
        # rows = (h1, b)  [b minor, BT sublanes];  lanes = wp*C1P + oc
        xb = x_ref[...]                                            # (24*BT, 140)
        ae = jnp.dot(xb, w1e_ref[...], preferred_element_type=jnp.float32)
        ao = jnp.dot(xb, w1o_ref[...], preferred_element_type=jnp.float32)
        wm = jnp.maximum(ae, ao)                                   # W-pool (24*BT, 192)

        # H-pool + bias + ReLU, written block-by-block into the VMEM scratch y1.
        for i1 in range(12):
            blk = jnp.maximum(wm[(2 * i1) * BT:(2 * i1 + 1) * BT, :],
                              wm[(2 * i1 + 1) * BT:(2 * i1 + 2) * BT, :])
            y1_ref[i1 * BT:(i1 + 1) * BT, :] = jnp.maximum(blk + b1_ref[...], 0.0)

        # ---- conv2 (Dropout2d == identity in eval): 5 accumulating dots / parity -
        a2e = None
        a2o = None
        for di in range(5):
            lhs = y1_ref[di * BT:(di + 8) * BT, :]                 # (8*BT, 192)
            pe = jnp.dot(lhs, w2e_ref[di * L1:(di + 1) * L1, :],
                         preferred_element_type=jnp.float32)
            po = jnp.dot(lhs, w2o_ref[di * L1:(di + 1) * L1, :],
                         preferred_element_type=jnp.float32)
            a2e = pe if a2e is None else a2e + pe
            a2o = po if a2o is None else a2o + po
        wm2 = jnp.maximum(a2e, a2o)                                # W-pool (8*BT, 128)

        # ---- conv2 H-pool + bias + ReLU fused with fc1 (4 accumulating dots) ----
        h = None
        for i2 in range(4):
            blk = jnp.maximum(wm2[(2 * i2) * BT:(2 * i2 + 1) * BT, :],
                              wm2[(2 * i2 + 1) * BT:(2 * i2 + 2) * BT, :])
            blk = jnp.maximum(blk + b2_ref[...], 0.0)              # (BT, 128)
            p = jnp.dot(blk, f1_ref[i2 * L2:(i2 + 1) * L2, :],
                        preferred_element_type=jnp.float32)
            h = p if h is None else h + p
        h = jnp.maximum(h + g1_ref[...], 0.0)                      # (BT, 64)

        # TODO(synk): training-mode F.dropout / nn.Dropout2d not implemented (eval identity).
        logits = jnp.dot(h, f2_ref[...],
                         preferred_element_type=jnp.float32) + g2_ref[...]
        m = jnp.max(logits, axis=-1, keepdims=True)
        z = logits - m
        lse = jnp.log(jnp.sum(jnp.exp(z), axis=-1, keepdims=True))
        o_ref[...] = (z - lse).astype(o_ref.dtype)

    return kernel


# --------------------------- parameter preparation ---------------------------

def prepare_params(params):
    """Fold PyTorch weights into the padded, pool-parity-split matmul tensors."""
    w1, b1, w2, b2, fw1, fb1, fw2, fb2 = params
    f32 = jnp.float32

    # conv1 folded, split by output-column parity (2x2 W-pool becomes a max of
    # two dot results):  w1e[di*28 + (2*wp + dj), wp*C1P + oc] = w1[oc, 0, di, dj]
    wp = jnp.arange(12)
    oc = jnp.arange(10)
    cols1 = wp[:, None] * C1P + oc[None, :]                        # (12, 10)
    w1e = jnp.zeros((5 * 28, L1), f32)
    w1o = jnp.zeros((5 * 28, L1), f32)
    for di in range(5):
        for dj in range(5):
            vals = jnp.broadcast_to(w1[:, 0, di, dj], (12, 10))
            rows_e = (di * 28 + 2 * wp + dj)[:, None]
            rows_o = (di * 28 + 2 * wp + 1 + dj)[:, None]
            w1e = w1e.at[rows_e, cols1].set(vals)
            w1o = w1o.at[rows_o, cols1].set(vals)
    b1v = jnp.tile(jnp.zeros((C1P,), f32).at[:10].set(b1), 12)[None, :]     # (1, 192)

    # conv2 folded, same parity split over its own output columns:
    # w2e[di*192 + (2*wp2 + dj)*C1P + c, wp2*C2P + oc2] = w2[oc2, c, di, dj]
    wp2 = jnp.arange(4)
    c_in = jnp.arange(10)
    oc2 = jnp.arange(20)
    cols2 = wp2[:, None] * C2P + oc2[None, :]                      # (4, 20)
    w2e = jnp.zeros((5 * L1, L2), f32)
    w2o = jnp.zeros((5 * L1, L2), f32)
    for di in range(5):
        for dj in range(5):
            vals = jnp.broadcast_to(w2[:, :, di, dj].T[None], (4, 10, 20))  # (wp2, c, oc2)
            rows_e = di * L1 + (2 * wp2 + dj)[:, None] * C1P + c_in[None, :]
            rows_o = di * L1 + (2 * wp2 + 1 + dj)[:, None] * C1P + c_in[None, :]
            w2e = w2e.at[rows_e[:, :, None], cols2[:, None, :]].set(vals)
            w2o = w2o.at[rows_o[:, :, None], cols2[:, None, :]].set(vals)
    b2v = jnp.tile(jnp.zeros((C2P,), f32).at[:20].set(b2), 4)[None, :]      # (1, 128)

    # fc1: 4 row-stacked slabs, one per pooled conv2 row block (flatten folded in):
    # f1[i2*L2 + wp2*C2P + c, hid] = fw1[hid, c*16 + i2*4 + wp2]
    i2g, cg, wg = jnp.meshgrid(jnp.arange(4), jnp.arange(20), jnp.arange(4),
                               indexing="ij")
    rows = (i2g * L2 + wg * C2P + cg).ravel()
    torch_cols = (cg * 16 + i2g * 4 + wg).ravel()
    f1 = jnp.zeros((4 * L2, H1P), f32).at[rows, :50].set(fw1[:, torch_cols].T)
    g1 = jnp.zeros((1, H1P), f32).at[0, :50].set(fb1)

    # fc2: classes padded to 128 lanes; padded logits get a huge negative bias.
    f2 = jnp.zeros((H1P, NCLS), f32).at[:50, :10].set(fw2.T)
    g2 = jnp.full((1, NCLS), NEG, f32).at[0, :10].set(fb2)
    return (w1e, w1o, b1v, w2e, w2o, b2v, f1, g1, f2, g2)


# --------------------------- pallas_call wrapper ------------------------------

@jax.jit
def net_forward(x, prepared):
    """Eval-mode forward of the PyTorch Net. x: (B, 1, 28, 28) NCHW float32."""
    (w1e, w1o, b1v, w2e, w2o, b2v, f1, g1, f2, g2) = prepared
    B = x.shape[0]
    BT = _pick_bt(B)
    b_pad = ((B + BT - 1) // BT) * BT
    nt = b_pad // BT

    # im2col over kernel rows only: lanes = di*28 + w (K = 140); rows = (tile, h1, b).
    x2 = x[:, 0, :, :]
    if b_pad != B:
        x2 = jnp.pad(x2, ((0, b_pad - B), (0, 0), (0, 0)))
    hidx = jnp.arange(24)[:, None] + jnp.arange(5)[None, :]        # (24, 5)
    xw = x2[:, hidx, :].reshape(b_pad, 24, 140)
    x_rows = (xw.reshape(nt, BT, 24, 140)
                .transpose(0, 2, 1, 3)
                .reshape(nt * 24 * BT, 140))

    cp = dict(dimension_semantics=("parallel",))
    if BT >= 64:
        # intermediates scale with BT; v5e's scoped-VMEM default is only 16 MiB.
        cp["vmem_limit_bytes"] = 48 * 1024 * 1024

    out = pl.pallas_call(
        _make_kernel(BT),
        out_shape=jax.ShapeDtypeStruct((b_pad, NCLS), jnp.float32),
        grid=(nt,),
        in_specs=[
            pl.BlockSpec((24 * BT, 140), lambda i: (i, 0)),   # im2col'd input tile
            pl.BlockSpec((140, L1), lambda i: (0, 0)),        # conv1 W, even output cols
            pl.BlockSpec((140, L1), lambda i: (0, 0)),        # conv1 W, odd output cols
            pl.BlockSpec((1, L1), lambda i: (0, 0)),          # conv1 bias (lane-tiled)
            pl.BlockSpec((5 * L1, L2), lambda i: (0, 0)),     # conv2 W, even output cols
            pl.BlockSpec((5 * L1, L2), lambda i: (0, 0)),     # conv2 W, odd output cols
            pl.BlockSpec((1, L2), lambda i: (0, 0)),          # conv2 bias (lane-tiled)
            pl.BlockSpec((4 * L2, H1P), lambda i: (0, 0)),    # fc1 W (4 stacked slabs)
            pl.BlockSpec((1, H1P), lambda i: (0, 0)),         # fc1 bias
            pl.BlockSpec((H1P, NCLS), lambda i: (0, 0)),      # fc2 W (padded)
            pl.BlockSpec((1, NCLS), lambda i: (0, 0)),        # fc2 bias (padded)
        ],
        out_specs=pl.BlockSpec((BT, NCLS), lambda i: (i, 0)),
        scratch_shapes=[pltpu.VMEM((12 * BT, L1), jnp.float32)],   # pooled conv1 acts
        compiler_params=pltpu.CompilerParams(**cp),
    )(x_rows, w1e, w1o, b1v, w2e, w2o, b2v, f1, g1, f2, g2)
    return out[:B, :10]


# --------------------------- pure-JAX reference -------------------------------

def reference_forward(x, params):
    """Independent reference mirroring the PyTorch forward (eval mode)."""
    (w1, b1, w2, b2, fw1, fb1, fw2, fb2) = params
    B = x.shape[0]
    dn = ('NCHW', 'OIHW', 'NCHW')
    y = lax.conv_general_dilated(x, w1, (1, 1), 'VALID', dimension_numbers=dn)
    y = y + b1[None, :, None, None]
    y = lax.reduce_window(y, -jnp.inf, lax.max, (1, 1, 2, 2), (1, 1, 2, 2), 'VALID')
    y = jnp.maximum(y, 0.0)
    y = lax.conv_general_dilated(y, w2, (1, 1), 'VALID', dimension_numbers=dn)
    y = y + b2[None, :, None, None]
    y = lax.reduce_window(y, -jnp.inf, lax.max, (1, 1, 2, 2), (1, 1, 2, 2), 'VALID')
    y = jnp.maximum(y, 0.0)
    y = y.reshape(B, 320)
    y = jnp.maximum(y @ fw1.T + fb1, 0.0)
    y = y @ fw2.T + fb2
    return jax.nn.log_softmax(y, axis=1)


def init_params(key):
    ks = jax.random.split(key, 8)
    w1 = 0.20 * jax.random.normal(ks[0], (10, 1, 5, 5), jnp.float32)
    b1 = 0.10 * jax.random.normal(ks[1], (10,), jnp.float32)
    w2 = 0.10 * jax.random.normal(ks[2], (20, 10, 5, 5), jnp.float32)
    b2 = 0.10 * jax.random.normal(ks[3], (20,), jnp.float32)
    fw1 = 0.05 * jax.random.normal(ks[4], (50, 320), jnp.float32)
    fb1 = 0.10 * jax.random.normal(ks[5], (50,), jnp.float32)
    fw2 = 0.10 * jax.random.normal(ks[6], (10, 50), jnp.float32)
    fb2 = 0.10 * jax.random.normal(ks[7], (10,), jnp.float32)
    return (w1, b1, w2, b2, fw1, fb1, fw2, fb2)


if __name__ == "__main__":
    key = jax.random.PRNGKey(0)
    k_x, k_p, k_x2 = jax.random.split(key, 3)
    params = init_params(k_p)
    prepared = prepare_params(params)                          # done once at init

    # Small check (batch=2) at the MNIST-sized input the module implies.
    x = jax.random.normal(k_x, (2, 1, 28, 28), jnp.float32)
    out = jax.block_until_ready(net_forward(x, prepared))
    ref = jax.block_until_ready(reference_forward(x, params))
    assert out.shape == (2, 10), out.shape
    assert jnp.allclose(out, ref, atol=1e-4, rtol=1e-4), float(jnp.max(jnp.abs(out - ref)))

    # Second check exercising a multi-tile grid + batch padding (B=19 -> BT=16, grid=2).
    xb = jax.random.normal(k_x2, (19, 1, 28, 28), jnp.float32)
    outb = jax.block_until_ready(net_forward(xb, prepared))
    refb = jax.block_until_ready(reference_forward(xb, params))
    assert outb.shape == (19, 10), outb.shape
    assert jnp.allclose(outb, refb, atol=1e-4, rtol=1e-4), float(jnp.max(jnp.abs(outb - refb)))

    print("KERNEL_OK")
</pallas_src>

<mosaic_0001>
module attributes {stable_mosaic.version = 11 : i64} {
  func.func @kernel(%arg0: i32, %arg1: memref<192x140xf32, #tpu.memory_space<vmem>>, %arg2: memref<140x192xf32, #tpu.memory_space<vmem>>, %arg3: memref<140x192xf32, #tpu.memory_space<vmem>>, %arg4: memref<1x192xf32, #tpu.memory_space<vmem>>, %arg5: memref<960x128xf32, #tpu.memory_space<vmem>>, %arg6: memref<960x128xf32, #tpu.memory_space<vmem>>, %arg7: memref<1x128xf32, #tpu.memory_space<vmem>>, %arg8: memref<512x64xf32, #tpu.memory_space<vmem>>, %arg9: memref<1x64xf32, #tpu.memory_space<vmem>>, %arg10: memref<64x128xf32, #tpu.memory_space<vmem>>, %arg11: memref<1x128xf32, #tpu.memory_space<vmem>>, %arg12: memref<8x128xf32, #tpu.memory_space<vmem>>, %arg13: memref<96x192xf32, #tpu.memory_space<vmem>>) attributes {dimension_semantics = [#tpu.dimension_semantics<parallel>], iteration_bounds = array<i64: 1>, scalar_prefetch = 0 : i64, scratch_operands = 1 : i64, tpu.core_type = #tpu.core_type<tc>, window_params = [{transform_indices = @transform_0, window_bounds = array<i64: 192, 140>}, {pipeline_mode = #tpu.pipeline_mode<synchronous>, transform_indices = @transform_1, window_bounds = array<i64: 140, 192>}, {pipeline_mode = #tpu.pipeline_mode<synchronous>, transform_indices = @transform_2, window_bounds = array<i64: 140, 192>}, {pipeline_mode = #tpu.pipeline_mode<synchronous>, transform_indices = @transform_3, window_bounds = array<i64: 1, 192>}, {pipeline_mode = #tpu.pipeline_mode<synchronous>, transform_indices = @transform_4, window_bounds = array<i64: 960, 128>}, {pipeline_mode = #tpu.pipeline_mode<synchronous>, transform_indices = @transform_5, window_bounds = array<i64: 960, 128>}, {pipeline_mode = #tpu.pipeline_mode<synchronous>, transform_indices = @transform_6, window_bounds = array<i64: 1, 128>}, {pipeline_mode = #tpu.pipeline_mode<synchronous>, transform_indices = @transform_7, window_bounds = array<i64: 512, 64>}, {pipeline_mode = #tpu.pipeline_mode<synchronous>, transform_indices = @transform_8, window_bounds = array<i64: 1, 64>}, {pipeline_mode = #tpu.pipeline_mode<synchronous>, transform_indices = @transform_9, window_bounds = array<i64: 64, 128>}, {pipeline_mode = #tpu.pipeline_mode<synchronous>, transform_indices = @transform_10, window_bounds = array<i64: 1, 128>}, {transform_indices = @transform_11, window_bounds = array<i64: 8, 128>}]} {
    %c0 = arith.constant 0 : index
    %c0_0 = arith.constant 0 : index
    %0 = vector.load %arg1[%c0, %c0_0] : memref<192x140xf32, #tpu.memory_space<vmem>>, vector<192x140xf32>
    %c0_1 = arith.constant 0 : index
    %c0_2 = arith.constant 0 : index
    %1 = vector.load %arg2[%c0_1, %c0_2] : memref<140x192xf32, #tpu.memory_space<vmem>>, vector<140x192xf32>
    %cst = arith.constant dense<0.000000e+00> : vector<192x192xf32>
    %2 = tpu.matmul %0, %1, %cst {dimension_numbers = #tpu.dot_dimension_numbers<[1], [0], [0], [1], [0, 0, 1, 1], [], []>} : vector<192x140xf32>, vector<140x192xf32>, vector<192x192xf32> -> vector<192x192xf32>
    %c0_3 = arith.constant 0 : index
    %c0_4 = arith.constant 0 : index
    %3 = vector.load %arg3[%c0_3, %c0_4] : memref<140x192xf32, #tpu.memory_space<vmem>>, vector<140x192xf32>
    %cst_5 = arith.constant dense<0.000000e+00> : vector<192x192xf32>
    %4 = tpu.matmul %0, %3, %cst_5 {dimension_numbers = #tpu.dot_dimension_numbers<[1], [0], [0], [1], [0, 0, 1, 1], [], []>} : vector<192x140xf32>, vector<140x192xf32>, vector<192x192xf32> -> vector<192x192xf32>
    %5 = arith.maximumf %2, %4 : vector<192x192xf32>
    %6 = vector.extract_strided_slice %5 {offsets = [0, 0], sizes = [8, 192], strides = [1, 1]} : vector<192x192xf32> to vector<8x192xf32>
    %7 = vector.extract_strided_slice %5 {offsets = [8, 0], sizes = [8, 192], strides = [1, 1]} : vector<192x192xf32> to vector<8x192xf32>
    %8 = arith.maximumf %6, %7 : vector<8x192xf32>
    %c0_6 = arith.constant 0 : index
    %c0_7 = arith.constant 0 : index
    %9 = vector.load %arg4[%c0_6, %c0_7] : memref<1x192xf32, #tpu.memory_space<vmem>>, vector<1x192xf32>
    %10 = vector.broadcast %9 : vector<1x192xf32> to vector<8x192xf32>
    %11 = arith.addf %8, %10 : vector<8x192xf32>
    %cst_8 = arith.constant 0.000000e+00 : f32
    %12 = vector.broadcast %cst_8 : f32 to vector<8x192xf32>
    %13 = arith.maximumf %11, %12 : vector<8x192xf32>
    %c0_9 = arith.constant 0 : index
    %c0_10 = arith.constant 0 : index
    %14 = vector.load %arg13[%c0_9, %c0_10] : memref<96x192xf32, #tpu.memory_space<vmem>>, vector<8x192xf32>
    tpu.vector_store %arg13[%c0_9, %c0_10], %13 {strides = array<i32>} : memref<96x192xf32, #tpu.memory_space<vmem>>, vector<8x192xf32>,
    %15 = vector.extract_strided_slice %5 {offsets = [16, 0], sizes = [8, 192], strides = [1, 1]} : vector<192x192xf32> to vector<8x192xf32>
    %16 = vector.extract_strided_slice %5 {offsets = [24, 0], sizes = [8, 192], strides = [1, 1]} : vector<192x192xf32> to vector<8x192xf32>
    %17 = arith.maximumf %15, %16 : vector<8x192xf32>
    %c0_11 = arith.constant 0 : index
    %c0_12 = arith.constant 0 : index
    %18 = vector.load %arg4[%c0_11, %c0_12] : memref<1x192xf32, #tpu.memory_space<vmem>>, vector<1x192xf32>
    %19 = vector.broadcast %18 : vector<1x192xf32> to vector<8x192xf32>
    %20 = arith.addf %17, %19 : vector<8x192xf32>
    %cst_13 = arith.constant 0.000000e+00 : f32
    %21 = vector.broadcast %cst_13 : f32 to vector<8x192xf32>
    %22 = arith.maximumf %20, %21 : vector<8x192xf32>
    %c8 = arith.constant 8 : index
    %c0_14 = arith.constant 0 : index
    %23 = vector.load %arg13[%c8, %c0_14] : memref<96x192xf32, #tpu.memory_space<vmem>>, vector<8x192xf32>
    tpu.vector_store %arg13[%c8, %c0_14], %22 {strides = array<i32>} : memref<96x192xf32, #tpu.memory_space<vmem>>, vector<8x192xf32>,
    %24 = vector.extract_strided_slice %5 {offsets = [32, 0], sizes = [8, 192], strides = [1, 1]} : vector<192x192xf32> to vector<8x192xf32>
    %25 = vector.extract_strided_slice %5 {offsets = [40, 0], sizes = [8, 192], strides = [1, 1]} : vector<192x192xf32> to vector<8x192xf32>
    %26 = arith.maximumf %24, %25 : vector<8x192xf32>
    %c0_15 = arith.constant 0 : index
    %c0_16 = arith.constant 0 : index
    %27 = vector.load %arg4[%c0_15, %c0_16] : memref<1x192xf32, #tpu.memory_space<vmem>>, vector<1x192xf32>
    %28 = vector.broadcast %27 : vector<1x192xf32> to vector<8x192xf32>
    %29 = arith.addf %26, %28 : vector<8x192xf32>
    %cst_17 = arith.constant 0.000000e+00 : f32
    %30 = vector.broadcast %cst_17 : f32 to vector<8x192xf32>
    %31 = arith.maximumf %29, %30 : vector<8x192xf32>
    %c16 = arith.constant 16 : index
    %c0_18 = arith.constant 0 : index
    %32 = vector.load %arg13[%c16, %c0_18] : memref<96x192xf32, #tpu.memory_space<vmem>>, vector<8x192xf32>
    tpu.vector_store %arg13[%c16, %c0_18], %31 {strides = array<i32>} : memref<96x192xf32, #tpu.memory_space<vmem>>, vector<8x192xf32>,
    %33 = vector.extract_strided_slice %5 {offsets = [48, 0], sizes = [8, 192], strides = [1, 1]} : vector<192x192xf32> to vector<8x192xf32>
    %34 = vector.extract_strided_slice %5 {offsets = [56, 0], sizes = [8, 192], strides = [1, 1]} : vector<192x192xf32> to vector<8x192xf32>
    %35 = arith.maximumf %33, %34 : vector<8x192xf32>
    %c0_19 = arith.constant 0 : index
    %c0_20 = arith.constant 0 : index
    %36 = vector.load %arg4[%c0_19, %c0_20] : memref<1x192xf32, #tpu.memory_space<vmem>>, vector<1x192xf32>
    %37 = vector.broadcast %36 : vector<1x192xf32> to vector<8x192xf32>
    %38 = arith.addf %35, %37 : vector<8x192xf32>
    %cst_21 = arith.constant 0.000000e+00 : f32
    %39 = vector.broadcast %cst_21 : f32 to vector<8x192xf32>
    %40 = arith.maximumf %38, %39 : vector<8x192xf32>
    %c24 = arith.constant 24 : index
    %c0_22 = arith.constant 0 : index
    %41 = vector.load %arg13[%c24, %c0_22] : memref<96x192xf32, #tpu.memory_space<vmem>>, vector<8x192xf32>
    tpu.vector_store %arg13[%c24, %c0_22], %40 {strides = array<i32>} : memref<96x192xf32, #tpu.memory_space<vmem>>, vector<8x192xf32>,
    %42 = vector.extract_strided_slice %5 {offsets = [64, 0], sizes = [8, 192], strides = [1, 1]} : vector<192x192xf32> to vector<8x192xf32>
    %43 = vector.extract_strided_slice %5 {offsets = [72, 0], sizes = [8, 192], strides = [1, 1]} : vector<192x192xf32> to vector<8x192xf32>
    %44 = arith.maximumf %42, %43 : vector<8x192xf32>
    %c0_23 = arith.constant 0 : index
    %c0_24 = arith.constant 0 : index
    %45 = vector.load %arg4[%c0_23, %c0_24] : memref<1x192xf32, #tpu.memory_space<vmem>>, vector<1x192xf32>
    %46 = vector.broadcast %45 : vector<1x192xf32> to vector<8x192xf32>
    %47 = arith.addf %44, %46 : vector<8x192xf32>
    %cst_25 = arith.constant 0.000000e+00 : f32
    %48 = vector.broadcast %cst_25 : f32 to vector<8x192xf32>
    %49 = arith.maximumf %47, %48 : vector<8x192xf32>
    %c32 = arith.constant 32 : index
    %c0_26 = arith.constant 0 : index
    %50 = vector.load %arg13[%c32, %c0_26] : memref<96x192xf32, #tpu.memory_space<vmem>>, vector<8x192xf32>
    tpu.vector_store %arg13[%c32, %c0_26], %49 {strides = array<i32>} : memref<96x192xf32, #tpu.memory_space<vmem>>, vector<8x192xf32>,
    %51 = vector.extract_strided_slice %5 {offsets = [80, 0], sizes = [8, 192], strides = [1, 1]} : vector<192x192xf32> to vector<8x192xf32>
    %52 = vector.extract_strided_slice %5 {offsets = [88, 0], sizes = [8, 192], strides = [1, 1]} : vector<192x192xf32> to vector<8x192xf32>
    %53 = arith.maximumf %51, %52 : vector<8x192xf32>
    %c0_27 = arith.constant 0 : index
    %c0_28 = arith.constant 0 : index
    %54 = vector.load %arg4[%c0_27, %c0_28] : memref<1x192xf32, #tpu.memory_space<vmem>>, vector<1x192xf32>
    %55 = vector.broadcast %54 : vector<1x192xf32> to vector<8x192xf32>
    %56 = arith.addf %53, %55 : vector<8x192xf32>
    %cst_29 = arith.constant 0.000000e+00 : f32
    %57 = vector.broadcast %cst_29 : f32 to vector<8x192xf32>
    %58 = arith.maximumf %56, %57 : vector<8x192xf32>
    %c40 = arith.constant 40 : index
    %c0_30 = arith.constant 0 : index
    %59 = vector.load %arg13[%c40, %c0_30] : memref<96x192xf32, #tpu.memory_space<vmem>>, vector<8x192xf32>
    tpu.vector_store %arg13[%c40, %c0_30], %58 {strides = array<i32>} : memref<96x192xf32, #tpu.memory_space<vmem>>, vector<8x192xf32>,
    %60 = vector.extract_strided_slice %5 {offsets = [96, 0], sizes = [8, 192], strides = [1, 1]} : vector<192x192xf32> to vector<8x192xf32>
    %61 = vector.extract_strided_slice %5 {offsets = [104, 0], sizes = [8, 192], strides = [1, 1]} : vector<192x192xf32> to vector<8x192xf32>
    %62 = arith.maximumf %60, %61 : vector<8x192xf32>
    %c0_31 = arith.constant 0 : index
    %c0_32 = arith.constant 0 : index
    %63 = vector.load %arg4[%c0_31, %c0_32] : memref<1x192xf32, #tpu.memory_space<vmem>>, vector<1x192xf32>
    %64 = vector.broadcast %63 : vector<1x192xf32> to vector<8x192xf32>
    %65 = arith.addf %62, %64 : vector<8x192xf32>
    %cst_33 = arith.constant 0.000000e+00 : f32
    %66 = vector.broadcast %cst_33 : f32 to vector<8x192xf32>
    %67 = arith.maximumf %65, %66 : vector<8x192xf32>
    %c48 = arith.constant 48 : index
    %c0_34 = arith.constant 0 : index
    %68 = vector.load %arg13[%c48, %c0_34] : memref<96x192xf32, #tpu.memory_space<vmem>>, vector<8x192xf32>
    tpu.vector_store %arg13[%c48, %c0_34], %67 {strides = array<i32>} : memref<96x192xf32, #tpu.memory_space<vmem>>, vector<8x192xf32>,
    %69 = vector.extract_strided_slice %5 {offsets = [112, 0], sizes = [8, 192], strides = [1, 1]} : vector<192x192xf32> to vector<8x192xf32>
    %70 = vector.extract_strided_slice %5 {offsets = [120, 0], sizes = [8, 192], strides = [1, 1]} : vector<192x192xf32> to vector<8x192xf32>
    %71 = arith.maximumf %69, %70 : vector<8x192xf32>
    %c0_35 = arith.constant 0 : index
    %c0_36 = arith.constant 0 : index
    %72 = vector.load %arg4[%c0_35, %c0_36] : memref<1x192xf32, #tpu.memory_space<vmem>>, vector<1x192xf32>
    %73 = vector.broadcast %72 : vector<1x192xf32> to vector<8x192xf32>
    %74 = arith.addf %71, %73 : vector<8x192xf32>
    %cst_37 = arith.constant 0.000000e+00 : f32
    %75 = vector.broadcast %cst_37 : f32 to vector<8x192xf32>
    %76 = arith.maximumf %74, %75 : vector<8x192xf32>
    %c56 = arith.constant 56 : index
    %c0_38 = arith.constant 0 : index
    %77 = vector.load %arg13[%c56, %c0_38] : memref<96x192xf32, #tpu.memory_space<vmem>>, vector<8x192xf32>
    tpu.vector_store %arg13[%c56, %c0_38], %76 {strides = array<i32>} : memref<96x192xf32, #tpu.memory_space<vmem>>, vector<8x192xf32>,
    %78 = vector.extract_strided_slice %5 {offsets = [128, 0], sizes = [8, 192], strides = [1, 1]} : vector<192x192xf32> to vector<8x192xf32>
    %79 = vector.extract_strided_slice %5 {offsets = [136, 0], sizes = [8, 192], strides = [1, 1]} : vector<192x192xf32> to vector<8x192xf32>
    %80 = arith.maximumf %78, %79 : vector<8x192xf32>
    %c0_39 = arith.constant 0 : index
    %c0_40 = arith.constant 0 : index
    %81 = vector.load %arg4[%c0_39, %c0_40] : memref<1x192xf32, #tpu.memory_space<vmem>>, vector<1x192xf32>
    %82 = vector.broadcast %81 : vector<1x192xf32> to vector<8x192xf32>
    %83 = arith.addf %80, %82 : vector<8x192xf32>
    %cst_41 = arith.constant 0.000000e+00 : f32
    %84 = vector.broadcast %cst_41 : f32 to vector<8x192xf32>
    %85 = arith.maximumf %83, %84 : vector<8x192xf32>
    %c64 = arith.constant 64 : index
    %c0_42 = arith.constant 0 : index
    %86 = vector.load %arg13[%c64, %c0_42] : memref<96x192xf32, #tpu.memory_space<vmem>>, vector<8x192xf32>
    tpu.vector_store %arg13[%c64, %c0_42], %85 {strides = array<i32>} : memref<96x192xf32, #tpu.memory_space<vmem>>, vector<8x192xf32>,
    %87 = vector.extract_strided_slice %5 {offsets = [144, 0], sizes = [8, 192], strides = [1, 1]} : vector<192x192xf32> to vector<8x192xf32>
    %88 = vector.extract_strided_slice %5 {offsets = [152, 0], sizes = [8, 192], strides = [1, 1]} : vector<192x192xf32> to vector<8x192xf32>
    %89 = arith.maximumf %87, %88 : vector<8x192xf32>
    %c0_43 = arith.constant 0 : index
    %c0_44 = arith.constant 0 : index
    %90 = vector.load %arg4[%c0_43, %c0_44] : memref<1x192xf32, #tpu.memory_space<vmem>>, vector<1x192xf32>
    %91 = vector.broadcast %90 : vector<1x192xf32> to vector<8x192xf32>
    %92 = arith.addf %89, %91 : vector<8x192xf32>
    %cst_45 = arith.constant 0.000000e+00 : f32
    %93 = vector.broadcast %cst_45 : f32 to vector<8x192xf32>
    %94 = arith.maximumf %92, %93 : vector<8x192xf32>
    %c72 = arith.constant 72 : index
    %c0_46 = arith.constant 0 : index
    %95 = vector.load %arg13[%c72, %c0_46] : memref<96x192xf32, #tpu.memory_space<vmem>>, vector<8x192xf32>
    tpu.vector_store %arg13[%c72, %c0_46], %94 {strides = array<i32>} : memref<96x192xf32, #tpu.memory_space<vmem>>, vector<8x192xf32>,
    %96 = vector.extract_strided_slice %5 {offsets = [160, 0], sizes = [8, 192], strides = [1, 1]} : vector<192x192xf32> to vector<8x192xf32>
    %97 = vector.extract_strided_slice %5 {offsets = [168, 0], sizes = [8, 192], strides = [1, 1]} : vector<192x192xf32> to vector<8x192xf32>
    %98 = arith.maximumf %96, %97 : vector<8x192xf32>
    %c0_47 = arith.constant 0 : index
    %c0_48 = arith.constant 0 : index
    %99 = vector.load %arg4[%c0_47, %c0_48] : memref<1x192xf32, #tpu.memory_space<vmem>>, vector<1x192xf32>
    %100 = vector.broadcast %99 : vector<1x192xf32> to vector<8x192xf32>
    %101 = arith.addf %98, %100 : vector<8x192xf32>
    %cst_49 = arith.constant 0.000000e+00 : f32
    %102 = vector.broadcast %cst_49 : f32 to vector<8x192xf32>
    %103 = arith.maximumf %101, %102 : vector<8x192xf32>
    %c80 = arith.constant 80 : index
    %c0_50 = arith.constant 0 : index
    %104 = vector.load %arg13[%c80, %c0_50] : memref<96x192xf32, #tpu.memory_space<vmem>>, vector<8x192xf32>
    tpu.vector_store %arg13[%c80, %c0_50], %103 {strides = array<i32>} : memref<96x192xf32, #tpu.memory_space<vmem>>, vector<8x192xf32>,
    %105 = vector.extract_strided_slice %5 {offsets = [176, 0], sizes = [8, 192], strides = [1, 1]} : vector<192x192xf32> to vector<8x192xf32>
    %106 = vector.extract_strided_slice %5 {offsets = [184, 0], sizes = [8, 192], strides = [1, 1]} : vector<192x192xf32> to vector<8x192xf32>
    %107 = arith.maximumf %105, %106 : vector<8x192xf32>
    %c0_51 = arith.constant 0 : index
    %c0_52 = arith.constant 0 : index
    %108 = vector.load %arg4[%c0_51, %c0_52] : memref<1x192xf32, #tpu.memory_space<vmem>>, vector<1x192xf32>
    %109 = vector.broadcast %108 : vector<1x192xf32> to vector<8x192xf32>
    %110 = arith.addf %107, %109 : vector<8x192xf32>
    %cst_53 = arith.constant 0.000000e+00 : f32
    %111 = vector.broadcast %cst_53 : f32 to vector<8x192xf32>
    %112 = arith.maximumf %110, %111 : vector<8x192xf32>
    %c88 = arith.constant 88 : index
    %c0_54 = arith.constant 0 : index
    %113 = vector.load %arg13[%c88, %c0_54] : memref<96x192xf32, #tpu.memory_space<vmem>>, vector<8x192xf32>
    tpu.vector_store %arg13[%c88, %c0_54], %112 {strides = array<i32>} : memref<96x192xf32, #tpu.memory_space<vmem>>, vector<8x192xf32>,
    %c0_55 = arith.constant 0 : index
    %c0_56 = arith.constant 0 : index
    %114 = vector.load %arg13[%c0_55, %c0_56] : memref<96x192xf32, #tpu.memory_space<vmem>>, vector<64x192xf32>
    %c0_57 = arith.constant 0 : index
    %c0_58 = arith.constant 0 : index
    %115 = vector.load %arg5[%c0_57, %c0_58] : memref<960x128xf32, #tpu.memory_space<vmem>>, vector<192x128xf32>
    %cst_59 = arith.constant dense<0.000000e+00> : vector<64x128xf32>
    %116 = tpu.matmul %114, %115, %cst_59 {dimension_numbers = #tpu.dot_dimension_numbers<[1], [0], [0], [1], [0, 0, 1, 1], [], []>} : vector<64x192xf32>, vector<192x128xf32>, vector<64x128xf32> -> vector<64x128xf32>
    %c0_60 = arith.constant 0 : index
    %c0_61 = arith.constant 0 : index
    %117 = vector.load %arg6[%c0_60, %c0_61] : memref<960x128xf32, #tpu.memory_space<vmem>>, vector<192x128xf32>
    %cst_62 = arith.constant dense<0.000000e+00> : vector<64x128xf32>
    %118 = tpu.matmul %114, %117, %cst_62 {dimension_numbers = #tpu.dot_dimension_numbers<[1], [0], [0], [1], [0, 0, 1, 1], [], []>} : vector<64x192xf32>, vector<192x128xf32>, vector<64x128xf32> -> vector<64x128xf32>
    %c8_63 = arith.constant 8 : index
    %c0_64 = arith.constant 0 : index
    %119 = vector.load %arg13[%c8_63, %c0_64] : memref<96x192xf32, #tpu.memory_space<vmem>>, vector<64x192xf32>
    %c192 = arith.constant 192 : index
    %c0_65 = arith.constant 0 : index
    %120 = vector.load %arg5[%c192, %c0_65] : memref<960x128xf32, #tpu.memory_space<vmem>>, vector<192x128xf32>
    %cst_66 = arith.constant dense<0.000000e+00> : vector<64x128xf32>
    %121 = tpu.matmul %119, %120, %cst_66 {dimension_numbers = #tpu.dot_dimension_numbers<[1], [0], [0], [1], [0, 0, 1, 1], [], []>} : vector<64x192xf32>, vector<192x128xf32>, vector<64x128xf32> -> vector<64x128xf32>
    %c192_67 = arith.constant 192 : index
    %c0_68 = arith.constant 0 : index
    %122 = vector.load %arg6[%c192_67, %c0_68] : memref<960x128xf32, #tpu.memory_space<vmem>>, vector<192x128xf32>
    %cst_69 = arith.constant dense<0.000000e+00> : vector<64x128xf32>
    %123 = tpu.matmul %119, %122, %cst_69 {dimension_numbers = #tpu.dot_dimension_numbers<[1], [0], [0], [1], [0, 0, 1, 1], [], []>} : vector<64x192xf32>, vector<192x128xf32>, vector<64x128xf32> -> vector<64x128xf32>
    %124 = arith.addf %116, %121 : vector<64x128xf32>
    %125 = arith.addf %118, %123 : vector<64x128xf32>
    %c16_70 = arith.constant 16 : index
    %c0_71 = arith.constant 0 : index
    %126 = vector.load %arg13[%c16_70, %c0_71] : memref<96x192xf32, #tpu.memory_space<vmem>>, vector<64x192xf32>
    %c384 = arith.constant 384 : index
    %c0_72 = arith.constant 0 : index
    %127 = vector.load %arg5[%c384, %c0_72] : memref<960x128xf32, #tpu.memory_space<vmem>>, vector<192x128xf32>
    %cst_73 = arith.constant dense<0.000000e+00> : vector<64x128xf32>
    %128 = tpu.matmul %126, %127, %cst_73 {dimension_numbers = #tpu.dot_dimension_numbers<[1], [0], [0], [1], [0, 0, 1, 1], [], []>} : vector<64x192xf32>, vector<192x128xf32>, vector<64x128xf32> -> vector<64x128xf32>
    %c384_74 = arith.constant 384 : index
    %c0_75 = arith.constant 0 : index
    %129 = vector.load %arg6[%c384_74, %c0_75] : memref<960x128xf32, #tpu.memory_space<vmem>>, vector<192x128xf32>
    %cst_76 = arith.constant dense<0.000000e+00> : vector<64x128xf32>
    %130 = tpu.matmul %126, %129, %cst_76 {dimension_numbers = #tpu.dot_dimension_numbers<[1], [0], [0], [1], [0, 0, 1, 1], [], []>} : vector<64x192xf32>, vector<192x128xf32>, vector<64x128xf32> -> vector<64x128xf32>
    %131 = arith.addf %124, %128 : vector<64x128xf32>
    %132 = arith.addf %125, %130 : vector<64x128xf32>
    %c24_77 = arith.constant 24 : index
    %c0_78 = arith.constant 0 : index
    %133 = vector.load %arg13[%c24_77, %c0_78] : memref<96x192xf32, #tpu.memory_space<vmem>>, vector<64x192xf32>
    %c576 = arith.constant 576 : index
    %c0_79 = arith.constant 0 : index
    %134 = vector.load %arg5[%c576, %c0_79] : memref<960x128xf32, #tpu.memory_space<vmem>>, vector<192x128xf32>
    %cst_80 = arith.constant dense<0.000000e+00> : vector<64x128xf32>
    %135 = tpu.matmul %133, %134, %cst_80 {dimension_numbers = #tpu.dot_dimension_numbers<[1], [0], [0], [1], [0, 0, 1, 1], [], []>} : vector<64x192xf32>, vector<192x128xf32>, vector<64x128xf32> -> vector<64x128xf32>
    %c576_81 = arith.constant 576 : index
    %c0_82 = arith.constant 0 : index
    %136 = vector.load %arg6[%c576_81, %c0_82] : memref<960x128xf32, #tpu.memory_space<vmem>>, vector<192x128xf32>
    %cst_83 = arith.constant dense<0.000000e+00> : vector<64x128xf32>
    %137 = tpu.matmul %133, %136, %cst_83 {dimension_numbers = #tpu.dot_dimension_numbers<[1], [0], [0], [1], [0, 0, 1, 1], [], []>} : vector<64x192xf32>, vector<192x128xf32>, vector<64x128xf32> -> vector<64x128xf32>
    %138 = arith.addf %131, %135 : vector<64x128xf32>
    %139 = arith.addf %132, %137 : vector<64x128xf32>
    %c32_84 = arith.constant 32 : index
    %c0_85 = arith.constant 0 : index
    %140 = vector.load %arg13[%c32_84, %c0_85] : memref<96x192xf32, #tpu.memory_space<vmem>>, vector<64x192xf32>
    %c768 = arith.constant 768 : index
    %c0_86 = arith.constant 0 : index
    %141 = vector.load %arg5[%c768, %c0_86] : memref<960x128xf32, #tpu.memory_space<vmem>>, vector<192x128xf32>
    %cst_87 = arith.constant dense<0.000000e+00> : vector<64x128xf32>
    %142 = tpu.matmul %140, %141, %cst_87 {dimension_numbers = #tpu.dot_dimension_numbers<[1], [0], [0], [1], [0, 0, 1, 1], [], []>} : vector<64x192xf32>, vector<192x128xf32>, vector<64x128xf32> -> vector<64x128xf32>
    %c768_88 = arith.constant 768 : index
    %c0_89 = arith.constant 0 : index
    %143 = vector.load %arg6[%c768_88, %c0_89] : memref<960x128xf32, #tpu.memory_space<vmem>>, vector<192x128xf32>
    %cst_90 = arith.constant dense<0.000000e+00> : vector<64x128xf32>
    %144 = tpu.matmul %140, %143, %cst_90 {dimension_numbers = #tpu.dot_dimension_numbers<[1], [0], [0], [1], [0, 0, 1, 1], [], []>} : vector<64x192xf32>, vector<192x128xf32>, vector<64x128xf32> -> vector<64x128xf32>
    %145 = arith.addf %138, %142 : vector<64x128xf32>
    %146 = arith.addf %139, %144 : vector<64x128xf32>
    %147 = arith.maximumf %145, %146 : vector<64x128xf32>
    %148 = vector.extract_strided_slice %147 {offsets = [0, 0], sizes = [8, 128], strides = [1, 1]} : vector<64x128xf32> to vector<8x128xf32>
    %149 = vector.extract_strided_slice %147 {offsets = [8, 0], sizes = [8, 128], strides = [1, 1]} : vector<64x128xf32> to vector<8x128xf32>
    %150 = arith.maximumf %148, %149 : vector<8x128xf32>
    %c0_91 = arith.constant 0 : index
    %c0_92 = arith.constant 0 : index
    %151 = vector.load %arg7[%c0_91, %c0_92] : memref<1x128xf32, #tpu.memory_space<vmem>>, vector<1x128xf32>
    %152 = vector.broadcast %151 : vector<1x128xf32> to vector<8x128xf32>
    %153 = arith.addf %150, %152 : vector<8x128xf32>
    %cst_93 = arith.constant 0.000000e+00 : f32
    %154 = vector.broadcast %cst_93 : f32 to vector<8x128xf32>
    %155 = arith.maximumf %153, %154 : vector<8x128xf32>
    %c0_94 = arith.constant 0 : index
    %c0_95 = arith.constant 0 : index
    %156 = vector.load %arg8[%c0_94, %c0_95] : memref<512x64xf32, #tpu.memory_space<vmem>>, vector<128x64xf32>
    %cst_96 = arith.constant dense<0.000000e+00> : vector<8x64xf32>
    %157 = tpu.matmul %155, %156, %cst_96 {dimension_numbers = #tpu.dot_dimension_numbers<[1], [0], [0], [1], [0, 0, 1, 1], [], []>} : vector<8x128xf32>, vector<128x64xf32>, vector<8x64xf32> -> vector<8x64xf32>
    %158 = vector.extract_strided_slice %147 {offsets = [16, 0], sizes = [8, 128], strides = [1, 1]} : vector<64x128xf32> to vector<8x128xf32>
    %159 = vector.extract_strided_slice %147 {offsets = [24, 0], sizes = [8, 128], strides = [1, 1]} : vector<64x128xf32> to vector<8x128xf32>
    %160 = arith.maximumf %158, %159 : vector<8x128xf32>
    %c0_97 = arith.constant 0 : index
    %c0_98 = arith.constant 0 : index
    %161 = vector.load %arg7[%c0_97, %c0_98] : memref<1x128xf32, #tpu.memory_space<vmem>>, vector<1x128xf32>
    %162 = vector.broadcast %161 : vector<1x128xf32> to vector<8x128xf32>
    %163 = arith.addf %160, %162 : vector<8x128xf32>
    %cst_99 = arith.constant 0.000000e+00 : f32
    %164 = vector.broadcast %cst_99 : f32 to vector<8x128xf32>
    %165 = arith.maximumf %163, %164 : vector<8x128xf32>
    %c128 = arith.constant 128 : index
    %c0_100 = arith.constant 0 : index
    %166 = vector.load %arg8[%c128, %c0_100] : memref<512x64xf32, #tpu.memory_space<vmem>>, vector<128x64xf32>
    %cst_101 = arith.constant dense<0.000000e+00> : vector<8x64xf32>
    %167 = tpu.matmul %165, %166, %cst_101 {dimension_numbers = #tpu.dot_dimension_numbers<[1], [0], [0], [1], [0, 0, 1, 1], [], []>} : vector<8x128xf32>, vector<128x64xf32>, vector<8x64xf32> -> vector<8x64xf32>
    %168 = arith.addf %157, %167 : vector<8x64xf32>
    %169 = vector.extract_strided_slice %147 {offsets = [32, 0], sizes = [8, 128], strides = [1, 1]} : vector<64x128xf32> to vector<8x128xf32>
    %170 = vector.extract_strided_slice %147 {offsets = [40, 0], sizes = [8, 128], strides = [1, 1]} : vector<64x128xf32> to vector<8x128xf32>
    %171 = arith.maximumf %169, %170 : vector<8x128xf32>
    %c0_102 = arith.constant 0 : index
    %c0_103 = arith.constant 0 : index
    %172 = vector.load %arg7[%c0_102, %c0_103] : memref<1x128xf32, #tpu.memory_space<vmem>>, vector<1x128xf32>
    %173 = vector.broadcast %172 : vector<1x128xf32> to vector<8x128xf32>
    %174 = arith.addf %171, %173 : vector<8x128xf32>
    %cst_104 = arith.constant 0.000000e+00 : f32
    %175 = vector.broadcast %cst_104 : f32 to vector<8x128xf32>
    %176 = arith.maximumf %174, %175 : vector<8x128xf32>
    %c256 = arith.constant 256 : index
    %c0_105 = arith.constant 0 : index
    %177 = vector.load %arg8[%c256, %c0_105] : memref<512x64xf32, #tpu.memory_space<vmem>>, vector<128x64xf32>
    %cst_106 = arith.constant dense<0.000000e+00> : vector<8x64xf32>
    %178 = tpu.matmul %176, %177, %cst_106 {dimension_numbers = #tpu.dot_dimension_numbers<[1], [0], [0], [1], [0, 0, 1, 1], [], []>} : vector<8x128xf32>, vector<128x64xf32>, vector<8x64xf32> -> vector<8x64xf32>
    %179 = arith.addf %168, %178 : vector<8x64xf32>
    %180 = vector.extract_strided_slice %147 {offsets = [48, 0], sizes = [8, 128], strides = [1, 1]} : vector<64x128xf32> to vector<8x128xf32>
    %181 = vector.extract_strided_slice %147 {offsets = [56, 0], sizes = [8, 128], strides = [1, 1]} : vector<64x128xf32> to vector<8x128xf32>
    %182 = arith.maximumf %180, %181 : vector<8x128xf32>
    %c0_107 = arith.constant 0 : index
    %c0_108 = arith.constant 0 : index
    %183 = vector.load %arg7[%c0_107, %c0_108] : memref<1x128xf32, #tpu.memory_space<vmem>>, vector<1x128xf32>
    %184 = vector.broadcast %183 : vector<1x128xf32> to vector<8x128xf32>
    %185 = arith.addf %182, %184 : vector<8x128xf32>
    %cst_109 = arith.constant 0.000000e+00 : f32
    %186 = vector.broadcast %cst_109 : f32 to vector<8x128xf32>
    %187 = arith.maximumf %185, %186 : vector<8x128xf32>
    %c384_110 = arith.constant 384 : index
    %c0_111 = arith.constant 0 : index
    %188 = vector.load %arg8[%c384_110, %c0_111] : memref<512x64xf32, #tpu.memory_space<vmem>>, vector<128x64xf32>
    %cst_112 = arith.constant dense<0.000000e+00> : vector<8x64xf32>
    %189 = tpu.matmul %187, %188, %cst_112 {dimension_numbers = #tpu.dot_dimension_numbers<[1], [0], [0], [1], [0, 0, 1, 1], [], []>} : vector<8x128xf32>, vector<128x64xf32>, vector<8x64xf32> -> vector<8x64xf32>
    %190 = arith.addf %179, %189 : vector<8x64xf32>
    %c0_113 = arith.constant 0 : index
    %c0_114 = arith.constant 0 : index
    %191 = vector.load %arg9[%c0_113, %c0_114] : memref<1x64xf32, #tpu.memory_space<vmem>>, vector<1x64xf32>
    %192 = vector.broadcast %191 : vector<1x64xf32> to vector<8x64xf32>
    %193 = arith.addf %190, %192 : vector<8x64xf32>
    %cst_115 = arith.constant 0.000000e+00 : f32
    %194 = vector.broadcast %cst_115 : f32 to vector<8x64xf32>
    %195 = arith.maximumf %193, %194 : vector<8x64xf32>
    %c0_116 = arith.constant 0 : index
    %c0_117 = arith.constant 0 : index
    %196 = vector.load %arg10[%c0_116, %c0_117] : memref<64x128xf32, #tpu.memory_space<vmem>>, vector<64x128xf32>
    %cst_118 = arith.constant dense<0.000000e+00> : vector<8x128xf32>
    %197 = tpu.matmul %195, %196, %cst_118 {dimension_numbers = #tpu.dot_dimension_numbers<[1], [0], [0], [1], [0, 0, 1, 1], [], []>} : vector<8x64xf32>, vector<64x128xf32>, vector<8x128xf32> -> vector<8x128xf32>
    %c0_119 = arith.constant 0 : index
    %c0_120 = arith.constant 0 : index
    %198 = vector.load %arg11[%c0_119, %c0_120] : memref<1x128xf32, #tpu.memory_space<vmem>>, vector<1x128xf32>
    %199 = vector.broadcast %198 : vector<1x128xf32> to vector<8x128xf32>
    %200 = arith.addf %197, %199 : vector<8x128xf32>
    %cst_121 = arith.constant dense<0xFF800000> : vector<8xf32>
    %201 = vector.multi_reduction <maximumf>, %200, %cst_121 [1] : vector<8x128xf32> to vector<8xf32>
    %202 = vector.shape_cast %201 : vector<8xf32> to vector<8x1xf32>
    %203 = vector.broadcast %202 : vector<8x1xf32> to vector<8x128xf32>
    %204 = arith.subf %200, %203 : vector<8x128xf32>
    %205 = math.exp %204 : vector<8x128xf32>
    %cst_122 = arith.constant dense<0.000000e+00> : vector<8xf32>
    %206 = vector.multi_reduction <add>, %205, %cst_122 [1] : vector<8x128xf32> to vector<8xf32>
    %207 = vector.shape_cast %206 : vector<8xf32> to vector<8x1xf32>
    %208 = math.log %207 : vector<8x1xf32>
    %209 = vector.broadcast %208 : vector<8x1xf32> to vector<8x128xf32>
    %210 = arith.subf %204, %209 : vector<8x128xf32>
    %c0_123 = arith.constant 0 : index
    %c0_124 = arith.constant 0 : index
    %211 = vector.load %arg12[%c0_123, %c0_124] : memref<8x128xf32, #tpu.memory_space<vmem>>, vector<8x128xf32>
    tpu.vector_store %arg12[%c0_123, %c0_124], %210 {strides = array<i32>} : memref<8x128xf32, #tpu.memory_space<vmem>>, vector<8x128xf32>,
    return
  }
  func.func @transform_0(%arg0: i32) -> (i32, i32) {
    %c0_i32 = arith.constant 0 : i32
    %c0_i32_0 = arith.constant 0 : i32
    return %arg0, %c0_i32 : i32, i32
  }
  func.func @transform_1(%arg0: i32) -> (i32, i32) {
    %c0_i32 = arith.constant 0 : i32
    %c0_i32_0 = arith.constant 0 : i32
    %c0_i32_1 = arith.constant 0 : i32
    return %c0_i32, %c0_i32_0 : i32, i32
  }
  func.func @transform_2(%arg0: i32) -> (i32, i32) {
    %c0_i32 = arith.constant 0 : i32
    %c0_i32_0 = arith.constant 0 : i32
    %c0_i32_1 = arith.constant 0 : i32
    return %c0_i32, %c0_i32_0 : i32, i32
  }
  func.func @transform_3(%arg0: i32) -> (i32, i32) {
    %c0_i32 = arith.constant 0 : i32
    %c0_i32_0 = arith.constant 0 : i32
    %c0_i32_1 = arith.constant 0 : i32
    return %c0_i32, %c0_i32_0 : i32, i32
  }
  func.func @transform_4(%arg0: i32) -> (i32, i32) {
    %c0_i32 = arith.constant 0 : i32
    %c0_i32_0 = arith.constant 0 : i32
    %c0_i32_1 = arith.constant 0 : i32
    return %c0_i32, %c0_i32_0 : i32, i32
  }
  func.func @transform_5(%arg0: i32) -> (i32, i32) {
    %c0_i32 = arith.constant 0 : i32
    %c0_i32_0 = arith.constant 0 : i32
    %c0_i32_1 = arith.constant 0 : i32
    return %c0_i32, %c0_i32_0 : i32, i32
  }
  func.func @transform_6(%arg0: i32) -> (i32, i32) {
    %c0_i32 = arith.constant 0 : i32
    %c0_i32_0 = arith.constant 0 : i32
    %c0_i32_1 = arith.constant 0 : i32
    return %c0_i32, %c0_i32_0 : i32, i32
  }
  func.func @transform_7(%arg0: i32) -> (i32, i32) {
    %c0_i32 = arith.constant 0 : i32
    %c0_i32_0 = arith.constant 0 : i32
    %c0_i32_1 = arith.constant 0 : i32
    return %c0_i32, %c0_i32_0 : i32, i32
  }
  func.func @transform_8(%arg0: i32) -> (i32, i32) {
    %c0_i32 = arith.constant 0 : i32
    %c0_i32_0 = arith.constant 0 : i32
    %c0_i32_1 = arith.constant 0 : i32
    return %c0_i32, %c0_i32_0 : i32, i32
  }
  func.func @transform_9(%arg0: i32) -> (i32, i32) {
    %c0_i32 = arith.constant 0 : i32
    %c0_i32_0 = arith.constant 0 : i32
    %c0_i32_1 = arith.constant 0 : i32
    return %c0_i32, %c0_i32_0 : i32, i32
  }
  func.func @transform_10(%arg0: i32) -> (i32, i32) {
    %c0_i32 = arith.constant 0 : i32
    %c0_i32_0 = arith.constant 0 : i32
    %c0_i32_1 = arith.constant 0 : i32
    return %c0_i32, %c0_i32_0 : i32, i32
  }
  func.func @transform_11(%arg0: i32) -> (i32, i32) {
    %c0_i32 = arith.constant 0 : i32
    %c0_i32_0 = arith.constant 0 : i32
    return %arg0, %c0_i32 : i32, i32
  }
}

</mosaic_0001>

<bundles_post_ra>
// kernel: net_forward.1
= control target key start
LH: loop header
LB: loop body
LE: loop exit
PB: predicated region body
PF: predicated region fallthrough
CT: control target
= control target key end

     0   :  { %vm195_vm0 = vcmask 1043456   ;;  %vm122_vm1 = vcmask 97280   ;;  %vm729_vm2 = vcmask 523264   ;;  %vm3320_vm3 = vmmov 0   ;;  %s5618_s1 = inlined_call_operand.vmem [shape: f32[140,192], index: 1, kind: input, shape index: {}]   ;;  %s5619_s2 = inlined_call_operand.vmem [shape: f32[140,192], index: 2, kind: input, shape index: {}]   ;;  %s5620_s0 = inlined_call_operand.vmem [shape: f32[192,140], index: 0, kind: input, shape index: {}]   ;;  %s5621_s4 = inlined_call_operand.vmem [shape: f32[960,128], index: 4, kind: input, shape index: {}]   ;;  %s5622_s5 = inlined_call_operand.vmem [shape: f32[960,128], index: 5, kind: input, shape index: {}]   ;;  %s5623_s3 = inlined_call_operand.vmem [shape: f32[1,192], index: 3, kind: input, shape index: {}]   ;;  %s5624_s7 = inlined_call_operand.vmem [shape: f32[512,64], index: 7, kind: input, shape index: {}]   ;;  %s5625_s6 = inlined_call_operand.vmem [shape: f32[1,128], index: 6, kind: input, shape index: {}]   ;;  %s5626_s9 = inlined_call_operand.vmem [shape: f32[64,128], index: 9, kind: input, shape index: {}]   ;;  %s5627_s8 = inlined_call_operand.vmem [shape: f32[1,64], index: 8, kind: input, shape index: {}]   ;;  %s5628_s10 = inlined_call_operand.vmem [shape: f32[1,128], index: 10, kind: input, shape index: {}]   ;;  %s5629_s11 = inlined_call_operand.vmem [shape: f32[8,128], index: 11, kind: output, shape index: {}]  }
   0x1   :  { %v117_v0 = vld [vmem:[%s5618_s1 + $0xf8] sm:$0xff]  ;;  %v116_v2 = vld [vmem:[%s5618_s1 + $0xf0] sm:$0xff]  ;;  %v115_v4 = vld [vmem:[%s5618_s1 + $0xe8] sm:$0xff] }
   0x2   :  { %v442_v1 = vld [vmem:[%s5619_s2 + $0xf8] sm:$0xff]  ;;  %202 = vmatprep.subr.mxu0 %v117_v0  ;;  %v441_v3 = vld [vmem:[%s5619_s2 + $0xf0] sm:$0xff]  ;;  %v440_v5 = vld [vmem:[%s5619_s2 + $0xe8] sm:$0xff] }
   0x3   :  { %453 = vmatprep.subr.mxu1 %v442_v1  ;;  %203 = vmatpush1.msra.mxu0 %v116_v2  ;;  %v114_v6 = vld [vmem:[%s5618_s1 + $0xe0] sm:$0xff]  ;;  %v113_v8 = vld [vmem:[%s5618_s1 + $0xd8] sm:$0xff]  ;;  %v112_v10 = vld [vmem:[%s5618_s1 + $0xd0] sm:$0xff] }
   0x4   :  { %454 = vmatpush1.msra.mxu1 %v441_v3  ;;  %v439_v7 = vld [vmem:[%s5619_s2 + $0xe0] sm:$0xff]  ;;  %204 = vmatprep.subr.mxu0 %v115_v4  ;;  %v438_v9 = vld [vmem:[%s5619_s2 + $0xd8] sm:$0xff]  ;;  %v437_v11 = vld [vmem:[%s5619_s2 + $0xd0] sm:$0xff] }
   0x5   :  { %455 = vmatprep.subr.mxu1 %v440_v5  ;;  %205 = vmatpush1.msra.mxu0 %v114_v6  ;;  %v111_v12 = vld [vmem:[%s5618_s1 + $0xc8] sm:$0xff]  ;;  %v110_v14 = vld [vmem:[%s5618_s1 + $0xc0] sm:$0xff]  ;;  %v109_v16 = vld [vmem:[%s5618_s1 + $0xb8] sm:$0xff] }
   0x6   :  { %456 = vmatpush1.msra.mxu1 %v439_v7  ;;  %v436_v13 = vld [vmem:[%s5619_s2 + $0xc8] sm:$0xff]  ;;  %206 = vmatprep.subr.mxu0 %v113_v8  ;;  %v435_v15 = vld [vmem:[%s5619_s2 + $0xc0] sm:$0xff]  ;;  %v434_v17 = vld [vmem:[%s5619_s2 + $0xb8] sm:$0xff] }
   0x7   :  { %457 = vmatprep.subr.mxu1 %v438_v9  ;;  %207 = vmatpush1.msra.mxu0 %v112_v10  ;;  %v108_v18 = vld [vmem:[%s5618_s1 + $0xb0] sm:$0xff]  ;;  %v107_v20 = vld [vmem:[%s5618_s1 + $0xa8] sm:$0xff]  ;;  %v106_v22 = vld [vmem:[%s5618_s1 + $0xa0] sm:$0xff] }
   0x8   :  { %458 = vmatpush1.msra.mxu1 %v437_v11  ;;  %208 = vmatprep.subr.mxu0 %v111_v12  ;;  %v433_v19 = vld [vmem:[%s5619_s2 + $0xb0] sm:$0xff]  ;;  %v432_v21 = vld [vmem:[%s5619_s2 + $0xa8] sm:$0xff]  ;;  %v431_v23 = vld [vmem:[%s5619_s2 + $0xa0] sm:$0xff] }
   0x9   :  { %459 = vmatprep.subr.mxu1 %v436_v13  ;;  %209 = vmatpush1.msra.mxu0 %v110_v14  ;;  %v105_v24 = vld [vmem:[%s5618_s1 + $0x98] sm:$0xff]  ;;  %v104_v26 = vld [vmem:[%s5618_s1 + $0x90] sm:$0xff]  ;;  %v103_v28 = vld [vmem:[%s5618_s1 + $0x88] sm:$0xff] }
   0xa   :  { %460 = vmatpush1.msra.mxu1 %v435_v15  ;;  %210 = vmatprep.subr.mxu0 %v109_v16  ;;  %v430_v25 = vld [vmem:[%s5619_s2 + $0x98] sm:$0xff]  ;;  %v429_v27 = vld [vmem:[%s5619_s2 + $0x90] sm:$0xff]  ;;  %v428_v29 = vld [vmem:[%s5619_s2 + $0x88] sm:$0xff]  ;;  %v3319_v15 = vmov 0.0  }
   0xb   :  { %461 = vmatprep.subr.mxu1 %v434_v17  ;;  %211 = vmatpush1.msra.mxu0 %v108_v18  ;;  %v102_v30 = vld [vmem:[%s5618_s1 + $0x80] sm:$0xff]  ;;  %v101_v32 = vld [vmem:[%s5618_s1 + $0x78] sm:$0xff]  ;;  %v100_v34 = vld [vmem:[%s5618_s1 + $0x70] sm:$0xff] }
   0xc   :  { %462 = vmatpush1.msra.mxu1 %v433_v19  ;;  %212 = vmatprep.subr.mxu0 %v107_v20  ;;  %v427_v31 = vld [vmem:[%s5619_s2 + $0x80] sm:$0xff]  ;;  %v426_v33 = vld [vmem:[%s5619_s2 + $0x78] sm:$0xff]  ;;  %v425_v35 = vld [vmem:[%s5619_s2 + $0x70] sm:$0xff] }
   0xd   :  { %463 = vmatprep.subr.mxu1 %v432_v21  ;;  %213 = vmatpush1.msra.mxu0 %v106_v22  ;;  %v99_v36 = vld [vmem:[%s5618_s1 + $0x68] sm:$0xff]  ;;  %v98_v38 = vld [vmem:[%s5618_s1 + $0x60] sm:$0xff]  ;;  %v97_v40 = vld [vmem:[%s5618_s1 + $0x58] sm:$0xff] }
   0xe   :  { %464 = vmatpush1.msra.mxu1 %v431_v23  ;;  %214 = vmatprep.subr.mxu0 %v105_v24  ;;  %v424_v37 = vld [vmem:[%s5619_s2 + $0x68] sm:$0xff]  ;;  %v423_v39 = vld [vmem:[%s5619_s2 + $0x60] sm:$0xff]  ;;  %v422_v41 = vld [vmem:[%s5619_s2 + $0x58] sm:$0xff] }
   0xf   :  { %465 = vmatprep.subr.mxu1 %v430_v25  ;;  %215 = vmatpush1.msra.mxu0 %v104_v26  ;;  %v96_v42 = vld [vmem:[%s5618_s1 + $0x50] sm:$0xff]  ;;  %v95_v44 = vld [vmem:[%s5618_s1 + $0x48] sm:$0xff]  ;;  %v94_v46 = vld [vmem:[%s5618_s1 + $0x40] sm:$0xff] }
  0x10   :  { %466 = vmatpush1.msra.mxu1 %v429_v27  ;;  %216 = vmatprep.subr.mxu0 %v103_v28  ;;  %v421_v43 = vld [vmem:[%s5619_s2 + $0x50] sm:$0xff]  ;;  %v420_v45 = vld [vmem:[%s5619_s2 + $0x48] sm:$0xff]  ;;  %v419_v47 = vld [vmem:[%s5619_s2 + $0x40] sm:$0xff] }
  0x11   :  { %467 = vmatprep.subr.mxu1 %v428_v29  ;;  %217 = vmatpush1.msra.mxu0 %v102_v30  ;;  %v93_v48 = vld [vmem:[%s5618_s1 + $0x38] sm:$0xff]  ;;  %v92_v50 = vld [vmem:[%s5618_s1 + $0x30] sm:$0xff]  ;;  %v91_v52 = vld [vmem:[%s5618_s1 + $0x28] sm:$0xff] }
  0x12   :  { %468 = vmatpush1.msra.mxu1 %v427_v31  ;;  %218 = vmatprep.subr.mxu0 %v101_v32  ;;  %v418_v49 = vld [vmem:[%s5619_s2 + $0x38] sm:$0xff]  ;;  %v417_v51 = vld [vmem:[%s5619_s2 + $0x30] sm:$0xff]  ;;  %v416_v53 = vld [vmem:[%s5619_s2 + $0x28] sm:$0xff] }
  0x13   :  { %469 = vmatprep.subr.mxu1 %v426_v33  ;;  %219 = vmatpush1.msra.mxu0 %v100_v34  ;;  %v90_v54 = vld [vmem:[%s5618_s1 + $0x20] sm:$0xff]  ;;  %v89_v56 = vld [vmem:[%s5618_s1 + $0x18] sm:$0xff]  ;;  %v88_v58 = vld [vmem:[%s5618_s1 + $0x10] sm:$0xff] }
  0x14   :  { %470 = vmatpush1.msra.mxu1 %v425_v35  ;;  %220 = vmatprep.subr.mxu0 %v99_v36  ;;  %v415_v55 = vld [vmem:[%s5619_s2 + $0x20] sm:$0xff]  ;;  %v414_v57 = vld [vmem:[%s5619_s2 + $0x18] sm:$0xff]  ;;  %v413_v59 = vld [vmem:[%s5619_s2 + $0x10] sm:$0xff] }
  0x15   :  { %471 = vmatprep.subr.mxu1 %v424_v37  ;;  %221 = vmatpush1.msra.mxu0 %v98_v38  ;;  %v87_v60 = vld [vmem:[%s5618_s1 + $0x8] sm:$0xff]  ;;  %v86_v62 = vld [vmem:[%s5618_s1] sm:$0xff]  ;;  %v121_v0 = vld [vmem:[%s5618_s1 + $0x118] sm:$0xf] }
  0x16   :  { %472 = vmatpush1.msra.mxu1 %v423_v39  ;;  %222 = vmatprep.subr.mxu0 %v97_v40  ;;  %v412_v61 = vld [vmem:[%s5619_s2 + $0x8] sm:$0xff]  ;;  %v411_v63 = vld [vmem:[%s5619_s2] sm:$0xff]  ;;  %v446_v1 = vld [vmem:[%s5619_s2 + $0x118] sm:$0xf] }
  0x17   :  { %473 = vmatprep.subr.mxu1 %v422_v41  ;;  %223 = vmatpush1.msra.mxu0 %v96_v42  ;;  %v120_v2 = vld [vmem:[%s5618_s1 + $0x110] sm:$0xf]  ;;  %v119_v4 = vld [vmem:[%s5618_s1 + $0x108] sm:$0xff]  ;;  %v118_v6 = vld [vmem:[%s5618_s1 + $0x100] sm:$0xff] }
  0x18   :  { %474 = vmatpush1.msra.mxu1 %v421_v43  ;;  %224 = vmatprep.subr.mxu0 %v95_v44  ;;  %v445_v3 = vld [vmem:[%s5619_s2 + $0x110] sm:$0xf]  ;;  %v444_v5 = vld [vmem:[%s5619_s2 + $0x108] sm:$0xff]  ;;  %v443_v8 = vld [vmem:[%s5619_s2 + $0x100] sm:$0xff] }
  0x19   :  { %475 = vmatprep.subr.mxu1 %v420_v45  ;;  %225 = vmatpush1.msra.mxu0 %v94_v46  ;;  %v39_v7 = vld [vmem:[%s5620_s0 + $0x8] sm:$0xff]  ;;  %v38_v9 = vld [vmem:[%s5620_s0] sm:$0xff]  ;;  %v41_v10 = vld [vmem:[%s5620_s0 + $0x18] sm:$0xff] }
  0x1a   :  { %476 = vmatpush1.msra.mxu1 %v419_v47  ;;  %226 = vmatprep.subr.mxu0 %v93_v48  ;;  %v1032_v11 = vld [vmem:[%s5621_s4 + $0x138] sm:$0xff]  ;;  %v40_v13 = vld [vmem:[%s5620_s0 + $0x10] sm:$0xff]  ;;  %v43_v14 = vld [vmem:[%s5620_s0 + $0x28] sm:$0xff] }
  0x1b   :  { %477 = vmatprep.subr.mxu1 %v418_v49  ;;  %227 = vmatpush1.msra.mxu0 %v92_v50  ;;  %v1185_v12 = vld [vmem:[%s5622_s5 + $0x138] sm:$0xff]  ;;  %v1031_v16 = vld [vmem:[%s5621_s4 + $0x130] sm:$0xff]  ;;  %v42_v18 = vld [vmem:[%s5620_s0 + $0x20] sm:$0xff] }
  0x1c   :  { %478 = vmatpush1.msra.mxu1 %v417_v51  ;;  %228 = vmatprep.subr.mxu0 %v91_v52  ;;  %v1184_v17 = vld [vmem:[%s5622_s5 + $0x130] sm:$0xff]  ;;  %v45_v19 = vld [vmem:[%s5620_s0 + $0x38] sm:$0xff]  ;;  %v1030_v20 = vld [vmem:[%s5621_s4 + $0x128] sm:$0xff] }
  0x1d   :  { %479 = vmatprep.subr.mxu1 %v416_v53  ;;  %229 = vmatpush1.msra.mxu0 %v90_v54  ;;  %v1183_v21 = vld [vmem:[%s5622_s5 + $0x128] sm:$0xff]  ;;  %v44_v22 = vld [vmem:[%s5620_s0 + $0x30] sm:$0xff]  ;;  %v1029_v24 = vld [vmem:[%s5621_s4 + $0x120] sm:$0xff] }
  0x1e   :  { %480 = vmatpush1.msra.mxu1 %v415_v55  ;;  %230 = vmatprep.subr.mxu0 %v89_v56  ;;  %v47_v23 = vld [vmem:[%s5620_s0 + $0x48] sm:$0xff]  ;;  %v1182_v25 = vld [vmem:[%s5622_s5 + $0x120] sm:$0xff]  ;;  %v49_v27 = vld [vmem:[%s5620_s0 + $0x58] sm:$0xff] }
  0x1f   :  { %481 = vmatprep.subr.mxu1 %v414_v57  ;;  %231 = vmatpush1.msra.mxu0 %v88_v58  ;;  %v46_v26 = vld [vmem:[%s5620_s0 + $0x40] sm:$0xff]  ;;  %v1028_v28 = vld [vmem:[%s5621_s4 + $0x118] sm:$0xff]  ;;  %v48_v30 = vld [vmem:[%s5620_s0 + $0x50] sm:$0xff] }
  0x20   :  { %482 = vmatpush1.msra.mxu1 %v413_v59  ;;  %232 = vmatprep.subr.mxu0 %v87_v60  ;;  %v1181_v29 = vld [vmem:[%s5622_s5 + $0x118] sm:$0xff]  ;;  %v51_v31 = vld [vmem:[%s5620_s0 + $0x68] sm:$0xff]  ;;  %v1027_v32 = vld [vmem:[%s5621_s4 + $0x110] sm:$0xff] }
  0x21   :  { %483 = vmatprep.subr.mxu1 %v412_v61  ;;  %233 = vmatpush1.msra.mxu0 %v86_v62  ;;  %v1180_v33 = vld [vmem:[%s5622_s5 + $0x110] sm:$0xff]  ;;  %v50_v34 = vld [vmem:[%s5620_s0 + $0x60] sm:$0xff]  ;;  %v53_v35 = vld [vmem:[%s5620_s0 + $0x78] sm:$0xff] }
  0x22   :  { %484 = vmatpush1.msra.mxu1 %v411_v63  ;;  %2939 = vmatprep.subr.msk.mxu0 %vm195_vm0, %v121_v0  ;;  %v1026_v36 = vld [vmem:[%s5621_s4 + $0x108] sm:$0xff]  ;;  %v52_v38 = vld [vmem:[%s5620_s0 + $0x70] sm:$0xff]  ;;  %v1025_v40 = vld [vmem:[%s5621_s4 + $0x100] sm:$0xff] }
  0x23   :  { %2965 = vmatprep.subr.msk.mxu1 %vm195_vm0, %v446_v1  ;;  %2940 = vmatpush2.msk.msra.mxu0 %vm195_vm0, %v120_v2  ;;  %v1179_v37 = vld [vmem:[%s5622_s5 + $0x108] sm:$0xff]  ;;  %v1178_v41 = vld [vmem:[%s5622_s5 + $0x100] sm:$0xff]  ;;  %v57_v43 = vld [vmem:[%s5620_s0 + $0x98] sm:$0xff] }
  0x24   :  { %2966 = vmatpush2.msk.msra.mxu1 %vm195_vm0, %v445_v3  ;;  %264 = vmatprep.subr.mxu0 %v119_v4  ;;  %v55_v39 = vld [vmem:[%s5620_s0 + $0x88] sm:$0xff]  ;;  %v54_v42 = vld [vmem:[%s5620_s0 + $0x80] sm:$0xff]  ;;  %v1024_v44 = vld [vmem:[%s5621_s4 + $0xf8] sm:$0xff] }
  0x25   :  { %515 = vmatprep.subr.mxu1 %v444_v5  ;;  %265 = vmatpush2.msra.mxu0 %v118_v6  ;;  %v1177_v45 = vld [vmem:[%s5622_s5 + $0xf8] sm:$0xff]  ;;  %v56_v46 = vld [vmem:[%s5620_s0 + $0x90] sm:$0xff]  ;;  %v59_v47 = vld [vmem:[%s5620_s0 + $0xa8] sm:$0xff] }
  0x26   :  { %2941 = vmatprep.mubr.msk.f32.mxu0 %vm122_vm1, %v39_v7  ;;  %516 = vmatpush2.msra.mxu1 %v443_v8  ;;  %v1023_v48 = vld [vmem:[%s5621_s4 + $0xf0] sm:$0xff]  ;;  %v58_v50 = vld [vmem:[%s5620_s0 + $0xa0] sm:$0xff]  ;;  %v61_v51 = vld [vmem:[%s5620_s0 + $0xb8] sm:$0xff] }
  0x27   :  { %2967 = vmatprep.mubr.msk.f32.mxu1 %vm122_vm1, %v39_v7  ;;  %267 = vmatmul.mubr.f32.vlgmr.msra.gmra.mxu0 %v38_v9  ;;  %v1176_v49 = vld [vmem:[%s5622_s5 + $0xf0] sm:$0xff]  ;;  %v1022_v52 = vld [vmem:[%s5621_s4 + $0xe8] sm:$0xff]  ;;  %v1021_v56 = vld [vmem:[%s5621_s4 + $0xe0] sm:$0xff] }
  0x28   :  { %518 = vmatmul.mubr.f32.vlgmr.msra.gmra.mxu1 %v38_v9  ;;  %2942 = vmatprep.mubr.msk.f32.mxu0 %vm122_vm1, %v41_v10  ;;  %v1175_v53 = vld [vmem:[%s5622_s5 + $0xe8] sm:$0xff]  ;;  %v60_v54 = vld [vmem:[%s5620_s0 + $0xb0] sm:$0xff]  ;;  %v1174_v57 = vld [vmem:[%s5622_s5 + $0xe0] sm:$0xff] }
  0x29   :  { %2968 = vmatprep.mubr.msk.f32.mxu1 %vm122_vm1, %v41_v10  ;;  %1065 = vmatprep.subr.mxu0 %v3319_v15  ;;  %v63_v55 = vld [vmem:[%s5620_s0 + $0xc8] sm:$0xff]  ;;  %v62_v58 = vld [vmem:[%s5620_s0 + $0xc0] sm:$0xff]  ;;  %v65_v59 = vld [vmem:[%s5620_s0 + $0xd8] sm:$0xff] }
  0x2a   :  { %1194 = vmatprep.subr.mxu1 %v3319_v15  ;;  %1066 = vmatpush1.msra.mxu0 %v1032_v11  ;;  %v1020_v60 = vld [vmem:[%s5621_s4 + $0xd8] sm:$0xff]  ;;  %v64_v62 = vld [vmem:[%s5620_s0 + $0xd0] sm:$0xff]  ;;  %v67_v63 = vld [vmem:[%s5620_s0 + $0xe8] sm:$0xff] }
  0x2b   :  { %1195 = vmatpush1.msra.mxu1 %v1185_v12  ;;  %273 = vmatmul.mubr.f32.gmra.mxu0 %v40_v13  ;;  %v1173_v61 = vld [vmem:[%s5622_s5 + $0xd8] sm:$0xff]  ;;  %v66_v0 = vld [vmem:[%s5620_s0 + $0xe0] sm:$0xff]  ;;  %v68_v2 = vld [vmem:[%s5620_s0 + $0xf0] sm:$0xff] }
  0x2c   :  { %524 = vmatmul.mubr.f32.gmra.mxu1 %v40_v13  ;;  %2943 = vmatprep.mubr.msk.f32.mxu0 %vm122_vm1, %v43_v14  ;;  %v69_v1 = vld [vmem:[%s5620_s0 + $0xf8] sm:$0xff]  ;;  %v71_v3 = vld [vmem:[%s5620_s0 + $0x108] sm:$0xff]  ;;  %v70_v4 = vld [vmem:[%s5620_s0 + $0x100] sm:$0xff] }
  0x2d   :  { %2969 = vmatprep.mubr.msk.f32.mxu1 %vm122_vm1, %v43_v14  ;;  %1067 = vmatprep.subr.mxu0 %v3319_v15  ;;  %v73_v5 = vld [vmem:[%s5620_s0 + $0x118] sm:$0xff]  ;;  %v72_v6 = vld [vmem:[%s5620_s0 + $0x110] sm:$0xff]  ;;  %v75_v9 = vld [vmem:[%s5620_s0 + $0x128] sm:$0xff] }
  0x2e   :  { %1196 = vmatprep.subr.mxu1 %v3319_v15  ;;  %1068 = vmatpush1.msra.mxu0 %v1031_v16  ;;  %v1019_v7 = vld [vmem:[%s5621_s4 + $0xd0] sm:$0xff]  ;;  %v74_v10 = vld [vmem:[%s5620_s0 + $0x120] sm:$0xff]  ;;  %v77_v11 = vld [vmem:[%s5620_s0 + $0x138] sm:$0xff] }
  0x2f   :  { %1197 = vmatpush1.msra.mxu1 %v1184_v17  ;;  %279 = vmatmul.mubr.f32.gmra.mxu0 %v42_v18  ;;  %v1172_v8 = vld [vmem:[%s5622_s5 + $0xd0] sm:$0xff]  ;;  %v79_v13 = vld [vmem:[%s5620_s0 + $0x148] sm:$0xff]  ;;  %v78_v17 = vld [vmem:[%s5620_s0 + $0x140] sm:$0xff] }
  0x30   :  { %530 = vmatmul.mubr.f32.gmra.mxu1 %v42_v18  ;;  %2944 = vmatprep.mubr.msk.f32.mxu0 %vm122_vm1, %v45_v19  ;;  %v76_v12 = vld [vmem:[%s5620_s0 + $0x130] sm:$0xff]  ;;  %v1018_v14 = vld [vmem:[%s5621_s4 + $0xc8] sm:$0xff]  ;;  %v81_v18 = vld [vmem:[%s5620_s0 + $0x158] sm:$0xff] }
  0x31   :  { %2970 = vmatprep.mubr.msk.f32.mxu1 %vm122_vm1, %v45_v19  ;;  %1069 = vmatprep.subr.mxu0 %v3319_v15  ;;  %v1171_v16 = vld [vmem:[%s5622_s5 + $0xc8] sm:$0xff]  ;;  %v1017_v19 = vld [vmem:[%s5621_s4 + $0xc0] sm:$0xff] }
  0x32   :  { %1198 = vmatprep.subr.mxu1 %v3319_v15  ;;  %1070 = vmatpush1.msra.mxu0 %v1030_v20  ;;  %v1170_v20 = vld [vmem:[%s5622_s5 + $0xc0] sm:$0xff] }
  0x33   :  { %1199 = vmatpush1.msra.mxu1 %v1183_v21  ;;  %285 = vmatmul.mubr.f32.gmra.mxu0 %v44_v22  ;;  %v80_v21 = vld [vmem:[%s5620_s0 + $0x150] sm:$0xff] }
  0x34   :  { %536 = vmatmul.mubr.f32.gmra.mxu1 %v44_v22  ;;  %2945 = vmatprep.mubr.msk.f32.mxu0 %vm122_vm1, %v47_v23  ;;  %v1040_v22 = vld [vmem:[%s5621_s4 + $0x178] sm:$0xff] }
  0x35   :  { %2971 = vmatprep.mubr.msk.f32.mxu1 %vm122_vm1, %v47_v23  ;;  %1071 = vmatprep.subr.mxu0 %v3319_v15  ;;  %v1193_v23 = vld [vmem:[%s5622_s5 + $0x178] sm:$0xff] }
  0x36   :  { %1200 = vmatprep.subr.mxu1 %v3319_v15  ;;  %1072 = vmatpush1.msra.mxu0 %v1029_v24  ;;  %v1039_v24 = vld [vmem:[%s5621_s4 + $0x170] sm:$0xff] }
  0x37   :  { %1201 = vmatpush1.msra.mxu1 %v1182_v25  ;;  %291 = vmatmul.mubr.f32.gmra.mxu0 %v46_v26  ;;  %v1192_v25 = vld [vmem:[%s5622_s5 + $0x170] sm:$0xff] }
  0x38   :  { %542 = vmatmul.mubr.f32.gmra.mxu1 %v46_v26  ;;  %2946 = vmatprep.mubr.msk.f32.mxu0 %vm122_vm1, %v49_v27  ;;  %v1038_v26 = vld [vmem:[%s5621_s4 + $0x168] sm:$0xff] }
  0x39   :  { %2972 = vmatprep.mubr.msk.f32.mxu1 %vm122_vm1, %v49_v27  ;;  %1073 = vmatprep.subr.mxu0 %v3319_v15  ;;  %v1191_v27 = vld [vmem:[%s5622_s5 + $0x168] sm:$0xff] }
  0x3a   :  { %1202 = vmatprep.subr.mxu1 %v3319_v15  ;;  %1074 = vmatpush1.msra.mxu0 %v1028_v28  ;;  %v83_v28 = vld [vmem:[%s5620_s0 + $0x168] sm:$0xff] }
  0x3b   :  { %1203 = vmatpush1.msra.mxu1 %v1181_v29  ;;  %297 = vmatmul.mubr.f32.gmra.mxu0 %v48_v30  ;;  %v1037_v29 = vld [vmem:[%s5621_s4 + $0x160] sm:$0xff] }
  0x3c   :  { %548 = vmatmul.mubr.f32.gmra.mxu1 %v48_v30  ;;  %2947 = vmatprep.mubr.msk.f32.mxu0 %vm122_vm1, %v51_v31  ;;  %v1190_v30 = vld [vmem:[%s5622_s5 + $0x160] sm:$0xff] }
  0x3d   :  { %2973 = vmatprep.mubr.msk.f32.mxu1 %vm122_vm1, %v51_v31  ;;  %1075 = vmatprep.subr.mxu0 %v3319_v15  ;;  %v82_v31 = vld [vmem:[%s5620_s0 + $0x160] sm:$0xff] }
  0x3e   :  { %1204 = vmatprep.subr.mxu1 %v3319_v15  ;;  %1076 = vmatpush1.msra.mxu0 %v1027_v32  ;;  %v1036_v32 = vld [vmem:[%s5621_s4 + $0x158] sm:$0xff] }
  0x3f   :  { %1205 = vmatpush1.msra.mxu1 %v1180_v33  ;;  %303 = vmatmul.mubr.f32.gmra.mxu0 %v50_v34  ;;  %v1189_v33 = vld [vmem:[%s5622_s5 + $0x158] sm:$0xff] }
  0x40   :  { %554 = vmatmul.mubr.f32.gmra.mxu1 %v50_v34  ;;  %2948 = vmatprep.mubr.msk.f32.mxu0 %vm122_vm1, %v53_v35  ;;  %v85_v34 = vld [vmem:[%s5620_s0 + $0x178] sm:$0xff] }
  0x41   :  { %2974 = vmatprep.mubr.msk.f32.mxu1 %vm122_vm1, %v53_v35  ;;  %1077 = vmatprep.subr.mxu0 %v3319_v15  ;;  %v1035_v35 = vld [vmem:[%s5621_s4 + $0x150] sm:$0xff] }
  0x42   :  { %1206 = vmatprep.subr.mxu1 %v3319_v15  ;;  %1078 = vmatpush1.msra.mxu0 %v1026_v36  ;;  %v1188_v36 = vld [vmem:[%s5622_s5 + $0x150] sm:$0xff] }
  0x43   :  { %1207 = vmatpush1.msra.mxu1 %v1179_v37  ;;  %309 = vmatmul.mubr.f32.gmra.mxu0 %v52_v38  ;;  %v84_v37 = vld [vmem:[%s5620_s0 + $0x170] sm:$0xff] }
  0x44   :  { %560 = vmatmul.mubr.f32.gmra.mxu1 %v52_v38  ;;  %2949 = vmatprep.mubr.msk.f32.mxu0 %vm122_vm1, %v55_v39  ;;  %v1034_v38 = vld [vmem:[%s5621_s4 + $0x148] sm:$0xff] }
  0x45   :  { %2975 = vmatprep.mubr.msk.f32.mxu1 %vm122_vm1, %v55_v39  ;;  %1079 = vmatprep.subr.mxu0 %v3319_v15  ;;  %v1187_v39 = vld [vmem:[%s5622_s5 + $0x148] sm:$0xff] }
  0x46   :  { %1208 = vmatprep.subr.mxu1 %v3319_v15  ;;  %1080 = vmatpush1.msra.mxu0 %v1025_v40  ;;  %v1033_v40 = vld [vmem:[%s5621_s4 + $0x140] sm:$0xff] }
  0x47   :  { %1209 = vmatpush1.msra.mxu1 %v1178_v41  ;;  %315 = vmatmul.mubr.f32.gmra.mxu0 %v54_v42  ;;  %v1186_v41 = vld [vmem:[%s5622_s5 + $0x140] sm:$0xff] }
  0x48   :  { %566 = vmatmul.mubr.f32.gmra.mxu1 %v54_v42  ;;  %2950 = vmatprep.mubr.msk.f32.mxu0 %vm122_vm1, %v57_v43  ;;  %v714_v42 = vlaneseq }
  0x49   :  { %2976 = vmatprep.mubr.msk.f32.mxu1 %vm122_vm1, %v57_v43  ;;  %1081 = vmatprep.subr.mxu0 %v3319_v15 }
  0x4a   :  { %1210 = vmatprep.subr.mxu1 %v3319_v15  ;;  %1082 = vmatpush1.msra.mxu0 %v1024_v44  ;;  %v715_v43 = vshrl.u32 %v714_v42, 7 }
  0x4b   :  { %1211 = vmatpush1.msra.mxu1 %v1177_v45  ;;  %321 = vmatmul.mubr.f32.gmra.mxu0 %v56_v46 }
  0x4c   :  { %572 = vmatmul.mubr.f32.gmra.mxu1 %v56_v46  ;;  %2951 = vmatprep.mubr.msk.f32.mxu0 %vm122_vm1, %v59_v47  ;;  %v3987_v46 = vsub.s32 0, %v715_v43 }
  0x4d   :  { %2977 = vmatprep.mubr.msk.f32.mxu1 %vm122_vm1, %v59_v47  ;;  %1083 = vmatprep.subr.mxu0 %v3319_v15 }
  0x4e   :  { %1212 = vmatprep.subr.mxu1 %v3319_v15  ;;  %1084 = vmatpush1.msra.mxu0 %v1023_v48 }
  0x4f   :  { %1213 = vmatpush1.msra.mxu1 %v1176_v49  ;;  %327 = vmatmul.mubr.f32.gmra.mxu0 %v58_v50  ;;  %v712_v49 = vld [vmem:[%s5623_s3] sm:$0x3] }
  0x50   :  { %578 = vmatmul.mubr.f32.gmra.mxu1 %v58_v50  ;;  %2952 = vmatprep.mubr.msk.f32.mxu0 %vm122_vm1, %v61_v51  ;;  %v3992_v50 = vsub.s32 1, %v715_v43 }
  0x51   :  { %2978 = vmatprep.mubr.msk.f32.mxu1 %vm122_vm1, %v61_v51  ;;  %1085 = vmatprep.subr.mxu0 %v3319_v15 }
  0x52   :  { %1214 = vmatprep.subr.mxu1 %v3319_v15  ;;  %1086 = vmatpush1.msra.mxu0 %v1022_v52 }
  0x53   :  { %1215 = vmatpush1.msra.mxu1 %v1175_v53  ;;  %333 = vmatmul.mubr.f32.gmra.mxu0 %v60_v54 }
  0x54   :  { %584 = vmatmul.mubr.f32.gmra.mxu1 %v60_v54  ;;  %2953 = vmatprep.mubr.msk.f32.mxu0 %vm122_vm1, %v63_v55 }
  0x55   :  { %2979 = vmatprep.mubr.msk.f32.mxu1 %vm122_vm1, %v63_v55  ;;  %1087 = vmatprep.subr.mxu0 %v3319_v15  ;;  %v717_v55 = vrot.slane %v712_v49, %v3987_v46 }
  0x56   :  { %1216 = vmatprep.subr.mxu1 %v3319_v15  ;;  %1088 = vmatpush1.msra.mxu0 %v1021_v56 }
  0x57   :  { %1217 = vmatpush1.msra.mxu1 %v1174_v57  ;;  %339 = vmatmul.mubr.f32.gmra.mxu0 %v62_v58 }
  0x58   :  { %590 = vmatmul.mubr.f32.gmra.mxu1 %v62_v58  ;;  %2954 = vmatprep.mubr.msk.f32.mxu0 %vm122_vm1, %v65_v59 }
  0x59   :  { %2980 = vmatprep.mubr.msk.f32.mxu1 %vm122_vm1, %v65_v59  ;;  %1089 = vmatprep.subr.mxu0 %v3319_v15 }
  0x5a   :  { %1218 = vmatprep.subr.mxu1 %v3319_v15  ;;  %1090 = vmatpush1.msra.mxu0 %v1020_v60 }
  0x5b   :  { %1219 = vmatpush1.msra.mxu1 %v1173_v61  ;;  %345 = vmatmul.mubr.f32.gmra.mxu0 %v64_v62  ;;  %v721_v61 = vrot.slane %v712_v49, %v3992_v50 }
  0x5c   :  { %596 = vmatmul.mubr.f32.gmra.mxu1 %v64_v62  ;;  %2955 = vmatprep.mubr.msk.f32.mxu0 %vm122_vm1, %v67_v63 }
  0x5d   :  { %2981 = vmatprep.mubr.msk.f32.mxu1 %vm122_vm1, %v67_v63  ;;  %1091 = vmatprep.subr.mxu0 %v3319_v15 }
  0x5e   :  { %1220 = vmatprep.subr.mxu1 %v3319_v15  ;;  %1092 = vmatpush1.msra.mxu0 %v1019_v7 }
  0x5f   :  { %351 = vmatmul.mubr.f32.gmra.mxu0 %v66_v0  ;;  %1221 = vmatpush1.msra.mxu1 %v1172_v8 }
  0x60   :  { %602 = vmatmul.mubr.f32.gmra.mxu1 %v66_v0  ;;  %2956 = vmatprep.mubr.msk.f32.mxu0 %vm122_vm1, %v69_v1 }
  0x61   :  { %2982 = vmatprep.mubr.msk.f32.mxu1 %vm122_vm1, %v69_v1  ;;  %1093 = vmatprep.subr.mxu0 %v3319_v15 }
  0x62   :  { %1222 = vmatprep.subr.mxu1 %v3319_v15  ;;  %1094 = vmatpush1.msra.mxu0 %v1018_v14 }
  0x63   :  { %357 = vmatmul.mubr.f32.gmra.mxu0 %v68_v2  ;;  %1223 = vmatpush1.msra.mxu1 %v1171_v16 }
  0x64   :  { %608 = vmatmul.mubr.f32.gmra.mxu1 %v68_v2  ;;  %2957 = vmatprep.mubr.msk.f32.mxu0 %vm122_vm1, %v71_v3 }
  0x65   :  { %2983 = vmatprep.mubr.msk.f32.mxu1 %vm122_vm1, %v71_v3  ;;  %1095 = vmatprep.subr.mxu0 %v3319_v15 }
  0x66   :  { %1224 = vmatprep.subr.mxu1 %v3319_v15  ;;  %1096 = vmatpush1.msra.mxu0 %v1017_v19 }
  0x67   :  { %363 = vmatmul.mubr.f32.gmra.mxu0 %v70_v4  ;;  %1225 = vmatpush1.msra.mxu1 %v1170_v20 }
  0x68   :  { %614 = vmatmul.mubr.f32.gmra.mxu1 %v70_v4  ;;  %2958 = vmatprep.mubr.msk.f32.mxu0 %vm122_vm1, %v73_v5  ;;  %v733_v4 = vld [vmem:[%s5623_s3] sm:$0x3] }
  0x69   :  { %2984 = vmatprep.mubr.msk.f32.mxu1 %vm122_vm1, %v73_v5  ;;  %1113 = vmatprep.subr.mxu0 %v3319_v15  ;;  %v742_v19 = vrot.slane %v733_v4, %v3992_v50 }
  0x6a   :  { %1242 = vmatprep.subr.mxu1 %v3319_v15  ;;  %1114 = vmatpush2.msra.mxu0 %v1040_v22 }
  0x6b   :  { %369 = vmatmul.mubr.f32.gmra.mxu0 %v72_v6  ;;  %1243 = vmatpush2.msra.mxu1 %v1193_v23 }
  0x6c   :  { %620 = vmatmul.mubr.f32.gmra.mxu1 %v72_v6  ;;  %2959 = vmatprep.mubr.msk.f32.mxu0 %vm122_vm1, %v75_v9 }
  0x6d   :  { %2985 = vmatprep.mubr.msk.f32.mxu1 %vm122_vm1, %v75_v9  ;;  %1115 = vmatprep.subr.mxu0 %v3319_v15 }
  0x6e   :  { %1244 = vmatprep.subr.mxu1 %v3319_v15  ;;  %1116 = vmatpush2.msra.mxu0 %v1039_v24 }
  0x6f   :  { %375 = vmatmul.mubr.f32.gmra.mxu0 %v74_v10  ;;  %1245 = vmatpush2.msra.mxu1 %v1192_v25 }
  0x70   :  { %626 = vmatmul.mubr.f32.gmra.mxu1 %v74_v10  ;;  %2960 = vmatprep.mubr.msk.f32.mxu0 %vm122_vm1, %v77_v11 }
  0x71   :  { %2986 = vmatprep.mubr.msk.f32.mxu1 %vm122_vm1, %v77_v11  ;;  %1117 = vmatprep.subr.mxu0 %v3319_v15 }
  0x72   :  { %1246 = vmatprep.subr.mxu1 %v3319_v15  ;;  %1118 = vmatpush2.msra.mxu0 %v1038_v26  ;;  %v753_v26 = vld [vmem:[%s5623_s3] sm:$0x3] }
  0x73   :  { %381 = vmatmul.mubr.f32.gmra.mxu0 %v76_v12  ;;  %1247 = vmatpush2.msra.mxu1 %v1191_v27 }
  0x74   :  { %632 = vmatmul.mubr.f32.gmra.mxu1 %v76_v12  ;;  %2961 = vmatprep.mubr.msk.f32.mxu0 %vm122_vm1, %v79_v13  ;;  %v738_v12 = vrot.slane %v733_v4, %v3987_v46 }
  0x75   :  { %2987 = vmatprep.mubr.msk.f32.mxu1 %vm122_vm1, %v79_v13  ;;  %1119 = vmatprep.subr.mxu0 %v3319_v15 }
  0x76   :  { %1248 = vmatprep.subr.mxu1 %v3319_v15  ;;  %1120 = vmatpush2.msra.mxu0 %v1037_v29 }
  0x77   :  { %387 = vmatmul.mubr.f32.gmra.mxu0 %v78_v17  ;;  %1249 = vmatpush2.msra.mxu1 %v1190_v30 }
  0x78   :  { %638 = vmatmul.mubr.f32.gmra.mxu1 %v78_v17  ;;  %2962 = vmatprep.mubr.msk.f32.mxu0 %vm122_vm1, %v81_v18 }
  0x79   :  { %2988 = vmatprep.mubr.msk.f32.mxu1 %vm122_vm1, %v81_v18  ;;  %1121 = vmatprep.subr.mxu0 %v3319_v15 }
  0x7a   :  { %1250 = vmatprep.subr.mxu1 %v3319_v15  ;;  %1122 = vmatpush2.msra.mxu0 %v1036_v32 }
  0x7b   :  { %393 = vmatmul.mubr.f32.gmra.mxu0 %v80_v21  ;;  %1251 = vmatpush2.msra.mxu1 %v1189_v33 }
  0x7c   :  { %644 = vmatmul.mubr.f32.gmra.mxu1 %v80_v21  ;;  %2963 = vmatprep.mubr.msk.f32.mxu0 %vm122_vm1, %v83_v28 }
  0x7d   :  { %2989 = vmatprep.mubr.msk.f32.mxu1 %vm122_vm1, %v83_v28  ;;  %1123 = vmatprep.subr.mxu0 %v3319_v15 }
  0x7e   :  { %1252 = vmatprep.subr.mxu1 %v3319_v15  ;;  %1124 = vmatpush2.msra.mxu0 %v1035_v35 }
  0x7f   :  { %399 = vmatmul.mubr.f32.gmra.mxu0 %v82_v31  ;;  %1253 = vmatpush2.msra.mxu1 %v1188_v36 }
  0x80   :  { %650 = vmatmul.mubr.f32.gmra.mxu1 %v82_v31  ;;  %2964 = vmatprep.mubr.msk.f32.mxu0 %vm122_vm1, %v85_v34 }
  0x81   :  { %2990 = vmatprep.mubr.msk.f32.mxu1 %vm122_vm1, %v85_v34  ;;  %1125 = vmatprep.subr.mxu0 %v3319_v15  ;;  %v758_v34 = vrot.slane %v753_v26, %v3987_v46 }
  0x82   :  { %1254 = vmatprep.subr.mxu1 %v3319_v15  ;;  %1126 = vmatpush2.msra.mxu0 %v1034_v38 }
  0x83   :  { %405 = vmatmul.mubr.f32.gmra.mxu0 %v84_v37  ;;  %1255 = vmatpush2.msra.mxu1 %v1187_v39 }
  0x84   :  { %656 = vmatmul.mubr.f32.gmra.mxu1 %v84_v37  ;;  %1127 = vmatprep.subr.mxu0 %v3319_v15 }
  0x85   :  { %1256 = vmatprep.subr.mxu1 %v3319_v15  ;;  %1128 = vmatpush2.msra.mxu0 %v1033_v40  ;;  %v762_v40 = vrot.slane %v753_v26, %v3992_v50 }
  0x86   :  { %1257 = vmatpush2.msra.mxu1 %v1186_v41  ;;  %1302 = vmatprep.subr.mxu0 %v3319_v15 }
  0x87   :  { %1407 = vmatprep.subr.mxu1 %v3319_v15 }
  0xe7   :  { %v268_v44 = vpop.f32.mrf.mxu0 }
  0xe8   :  { %v519_v45 = vpop.f32.mrf.mxu1 }
  0xe9   :  { %v270_v47 = vpop.f32.mrf.mxu0  ;;  %v662_v53 = vmax.f32 %v268_v44, %v519_v45 }
  0xea   :  { %v521_v48 = vpop.f32.mrf.mxu1 }
  0xeb   :  { %v274_v51 = vpop.f32.mrf.mxu0  ;;  %v663_v58 = vmax.f32 %v270_v47, %v521_v48  ;;  %v773_v48 = vld [vmem:[%s5623_s3] sm:$0x3] }
  0xec   :  { %v525_v52 = vpop.f32.mrf.mxu1 }
  0xed   :  { %v664_v54 = vmax.f32 %v274_v51, %v525_v52  ;;  %v276_v56 = vpop.f32.mrf.mxu0 }
  0xee   :  { %v527_v57 = vpop.f32.mrf.mxu1 }
  0xef   :  { %v710_v59 = vmax.f32 %v662_v53, %v664_v54  ;;  %v665_v60 = vmax.f32 %v276_v56, %v527_v57  ;;  %v280_v62 = vpop.f32.mrf.mxu0  ;;  %v778_v57 = vrot.slane %v773_v48, %v3987_v46 }
  0xf0   :  { %v531_v63 = vpop.f32.mrf.mxu1 }
  0xf1   :  { %v3996_v0 = vadd.f32 %v717_v55, %v710_v59  ;;  %v711_v1 = vmax.f32 %v663_v58, %v665_v60  ;;  %v282_v2 = vpop.f32.mrf.mxu0  ;;  %v666_v10 = vmax.f32 %v280_v62, %v531_v63  ;;  %v782_v60 = vrot.slane %v773_v48, %v3992_v50  ;;  %v982_v62 = vld [vmem:[%s5621_s4 + $0x78] sm:$0xff] }
  0xf2   :  { %v533_v3 = vpop.f32.mrf.mxu1  ;;  %v1006_v63 = vld [vmem:[%s5622_s5 + $0x78] sm:$0xff] }
  0xf3   :  { %v726_v5 = vmax.f32 %v3996_v0, 0.0  ;;  %v725_v6 = vadd.f32 %v721_v61, %v711_v1  ;;  %v286_v7 = vpop.f32.mrf.mxu0  ;;  %v667_v16 = vmax.f32 %v282_v2, %v533_v3  ;;  %v1541_v0 = vld [vmem:[%s5621_s4 + $0x1e8] sm:$0xff] }
  0xf4   :  { %v537_v8 = vpop.f32.mrf.mxu1 }
  0xf5   :  { %v727_v9 = vmax.f32 %v725_v6, 0.0  ;;  %v668_v11 = vmax.f32 %v286_v7, %v537_v8  ;;  %v288_v13 = vpop.f32.mrf.mxu0  ;;  %v981_v7 = vld [vmem:[%s5621_s4 + $0x70] sm:$0xff] }
  0xf6   :  { %v539_v14 = vpop.f32.mrf.mxu1  ;;  %v1005_v8 = vld [vmem:[%s5622_s5 + $0x70] sm:$0xff] }
  0xf7   :  { %730 = vst.msk [vmem:[#allocation2 + $0x8] sm:$0xff] %vm729_vm2, %v727_v9  ;;  %v731_v17 = vmax.f32 %v666_v10, %v668_v11  ;;  %v669_v18 = vmax.f32 %v288_v13, %v539_v14  ;;  %v292_v20 = vpop.f32.mrf.mxu0  ;;  %v793_v13 = vld [vmem:[%s5623_s3] sm:$0x3]  ;;  %v980_v14 = vld [vmem:[%s5621_s4 + $0x68] sm:$0xff] }
  0xf8   :  { %v543_v21 = vpop.f32.mrf.mxu1 }
  0xf9   :  { %v745_v22 = vadd.f32 %v738_v12, %v731_v17  ;;  %v732_v23 = vmax.f32 %v667_v16, %v669_v18  ;;  %v294_v24 = vpop.f32.mrf.mxu0  ;;  %v670_v32 = vmax.f32 %v292_v20, %v543_v21  ;;  %v1004_v16 = vld [vmem:[%s5622_s5 + $0x68] sm:$0xff] }
  0xfa   :  { %v545_v25 = vpop.f32.mrf.mxu1 }
  0xfb   :  { %v4008_v27 = vmax.f32 %v745_v22, 0.0  ;;  %v746_v28 = vadd.f32 %v742_v19, %v732_v23  ;;  %v298_v29 = vpop.f32.mrf.mxu0  ;;  %v671_v37 = vmax.f32 %v294_v24, %v545_v25  ;;  %v798_v24 = vrot.slane %v793_v13, %v3987_v46 }
  0xfc   :  { %v549_v30 = vpop.f32.mrf.mxu1 }
  0xfd   :  { %v748_v31 = vmax.f32 %v746_v28, 0.0  ;;  %v672_v33 = vmax.f32 %v298_v29, %v549_v30  ;;  %v300_v35 = vpop.f32.mrf.mxu0  ;;  %v802_v28 = vrot.slane %v793_v13, %v3992_v50  ;;  %v979_v30 = vld [vmem:[%s5621_s4 + $0x60] sm:$0xff] }
  0xfe   :  { %v551_v36 = vpop.f32.mrf.mxu1  ;;  %v833_v13 = vld [vmem:[%s5623_s3] sm:$0x3] }
  0xff   :  { %750 = vst.msk [vmem:[#allocation2 + $0x18] sm:$0xff] %vm729_vm2, %v748_v31  ;;  %v751_v38 = vmax.f32 %v670_v32, %v672_v33  ;;  %v673_v39 = vmax.f32 %v300_v35, %v551_v36  ;;  %v304_v41 = vpop.f32.mrf.mxu0  ;;  %v1003_v31 = vld [vmem:[%s5622_s5 + $0x60] sm:$0xff] }
 0x100   :  { %v555_v42 = vpop.f32.mrf.mxu1 }
 0x101   :  { %v765_v43 = vadd.f32 %v758_v34, %v751_v38  ;;  %v752_v44 = vmax.f32 %v671_v37, %v673_v39  ;;  %v306_v45 = vpop.f32.mrf.mxu0  ;;  %v674_v55 = vmax.f32 %v304_v41, %v555_v42  ;;  %v978_v37 = vld [vmem:[%s5621_s4 + $0x58] sm:$0xff] }
 0x102   :  { %v557_v47 = vpop.f32.mrf.mxu1  ;;  %v1002_v38 = vld [vmem:[%s5622_s5 + $0x58] sm:$0xff] }
 0x103   :  { %v4016_v49 = vmax.f32 %v765_v43, 0.0  ;;  %v766_v51 = vadd.f32 %v762_v40, %v752_v44  ;;  %v310_v52 = vpop.f32.mrf.mxu0  ;;  %v675_v1 = vmax.f32 %v306_v45, %v557_v47  ;;  %v813_v43 = vld [vmem:[%s5623_s3] sm:$0x3]  ;;  %v977_v44 = vld [vmem:[%s5621_s4 + $0x50] sm:$0xff] }
 0x104   :  { %v561_v53 = vpop.f32.mrf.mxu1  ;;  %v1001_v45 = vld [vmem:[%s5622_s5 + $0x50] sm:$0xff] }
 0x105   :  { %769 = vst [vmem:[#allocation2 + $0x20] sm:$0xff] %v4016_v49  ;;  %v768_v54 = vmax.f32 %v766_v51, 0.0  ;;  %v676_v56 = vmax.f32 %v310_v52, %v561_v53  ;;  %v312_v58 = vpop.f32.mrf.mxu0 }
 0x106   :  { %v563_v59 = vpop.f32.mrf.mxu1  ;;  %v4021_v61 = vld [vmem:[#allocation2 + $0x18] sm:$0xff] }
 0x107   :  { %770 = vst.msk [vmem:[#allocation2 + $0x28] sm:$0xff] %vm729_vm2, %v768_v54  ;;  %v771_v2 = vmax.f32 %v674_v55, %v676_v56  ;;  %v677_v3 = vmax.f32 %v312_v58, %v563_v59  ;;  %2991 = vmatprep.mubr.msk.f32.mxu0 %vm729_vm2, %v4021_v61  ;;  %2999 = vmatprep.mubr.msk.f32.mxu1 %vm729_vm2, %v4021_v61  ;;  %v316_v4 = vpop.f32.mrf.mxu0 }
 0x108   :  { %v567_v6 = vpop.f32.mrf.mxu1  ;;  %1130 = vmatmul.mubr.f32.vlgmr.msra.gmra.mxu0 %v4008_v27  ;;  %1259 = vmatmul.mubr.f32.vlgmr.msra.gmra.mxu1 %v4008_v27  ;;  %v818_v56 = vrot.slane %v813_v43, %v3987_v46  ;;  %v822_v59 = vrot.slane %v813_v43, %v3992_v50 }
 0x109   :  { %v785_v9 = vadd.f32 %v778_v57, %v771_v2  ;;  %v772_v10 = vmax.f32 %v675_v1, %v677_v3  ;;  %1303 = vmatpush1.msra.mxu0 %v982_v62  ;;  %1408 = vmatpush1.msra.mxu1 %v1006_v63  ;;  %v318_v11 = vpop.f32.mrf.mxu0  ;;  %v678_v22 = vmax.f32 %v316_v4, %v567_v6  ;;  %v976_v62 = vld [vmem:[%s5621_s4 + $0x48] sm:$0xff] }
 0x10a   :  { %v569_v12 = vpop.f32.mrf.mxu1  ;;  %1304 = vmatprep.subr.mxu0 %v3319_v15  ;;  %1409 = vmatprep.subr.mxu1 %v3319_v15  ;;  %v1000_v63 = vld [vmem:[%s5622_s5 + $0x48] sm:$0xff] }
 0x10b   :  { %v4053_v17 = vmax.f32 %v785_v9, 0.0  ;;  %v786_v18 = vadd.f32 %v782_v60, %v772_v10  ;;  %1305 = vmatpush1.msra.mxu0 %v981_v7  ;;  %1410 = vmatpush1.msra.mxu1 %v1005_v8  ;;  %v322_v19 = vpop.f32.mrf.mxu0  ;;  %v679_v32 = vmax.f32 %v318_v11, %v569_v12  ;;  %v975_v7 = vld [vmem:[%s5621_s4 + $0x40] sm:$0xff] }
 0x10c   :  { %v573_v20 = vpop.f32.mrf.mxu1  ;;  %1306 = vmatprep.subr.mxu0 %v3319_v15  ;;  %1411 = vmatprep.subr.mxu1 %v3319_v15  ;;  %v999_v8 = vld [vmem:[%s5622_s5 + $0x40] sm:$0xff] }
 0x10d   :  { %789 = vst [vmem:[#allocation2 + $0x30] sm:$0xff] %v4053_v17  ;;  %v788_v21 = vmax.f32 %v786_v18, 0.0  ;;  %v680_v23 = vmax.f32 %v322_v19, %v573_v20  ;;  %1307 = vmatpush1.msra.mxu0 %v980_v14  ;;  %1412 = vmatpush1.msra.mxu1 %v1004_v16  ;;  %v324_v25 = vpop.f32.mrf.mxu0  ;;  %v974_v14 = vld [vmem:[%s5621_s4 + $0x38] sm:$0xff] }
 0x10e   :  { %v575_v26 = vpop.f32.mrf.mxu1  ;;  %v4060_v29 = vld [vmem:[#allocation2 + $0x28] sm:$0xff]  ;;  %1308 = vmatprep.subr.mxu0 %v3319_v15  ;;  %1413 = vmatprep.subr.mxu1 %v3319_v15  ;;  %v998_v16 = vld [vmem:[%s5622_s5 + $0x38] sm:$0xff] }
 0x10f   :  { %790 = vst.msk [vmem:[#allocation2 + $0x38] sm:$0xff] %vm729_vm2, %v788_v21  ;;  %v791_v33 = vmax.f32 %v678_v22, %v680_v23  ;;  %v681_v34 = vmax.f32 %v324_v25, %v575_v26  ;;  %2992 = vmatprep.mubr.msk.f32.mxu0 %vm729_vm2, %v4060_v29  ;;  %3000 = vmatprep.mubr.msk.f32.mxu1 %vm729_vm2, %v4060_v29  ;;  %v328_v35 = vpop.f32.mrf.mxu0 }
 0x110   :  { %v579_v36 = vpop.f32.mrf.mxu1  ;;  %1135 = vmatmul.mubr.f32.gmra.mxu0 %v4016_v49  ;;  %1264 = vmatmul.mubr.f32.gmra.mxu1 %v4016_v49  ;;  %v838_v25 = vrot.slane %v833_v13, %v3987_v46 }
 0x111   :  { %v805_v39 = vadd.f32 %v798_v24, %v791_v33  ;;  %v792_v40 = vmax.f32 %v679_v32, %v681_v34  ;;  %1309 = vmatpush1.msra.mxu0 %v979_v30  ;;  %1414 = vmatpush1.msra.mxu1 %v1003_v31  ;;  %v330_v41 = vpop.f32.mrf.mxu0  ;;  %v682_v54 = vmax.f32 %v328_v35, %v579_v36  ;;  %v973_v32 = vld [vmem:[%s5621_s4 + $0x30] sm:$0xff] }
 0x112   :  { %v581_v42 = vpop.f32.mrf.mxu1  ;;  %1310 = vmatprep.subr.mxu0 %v3319_v15  ;;  %1415 = vmatprep.subr.mxu1 %v3319_v15  ;;  %v842_v30 = vrot.slane %v833_v13, %v3992_v50  ;;  %v997_v33 = vld [vmem:[%s5622_s5 + $0x30] sm:$0xff] }
 0x113   :  { %v4094_v47 = vmax.f32 %v805_v39, 0.0  ;;  %v806_v48 = vadd.f32 %v802_v28, %v792_v40  ;;  %1311 = vmatpush1.msra.mxu0 %v978_v37  ;;  %1416 = vmatpush1.msra.mxu1 %v1002_v38  ;;  %v334_v51 = vpop.f32.mrf.mxu0  ;;  %v683_v1 = vmax.f32 %v330_v41, %v581_v42  ;;  %v972_v39 = vld [vmem:[%s5621_s4 + $0x28] sm:$0xff] }
 0x114   :  { %v585_v52 = vpop.f32.mrf.mxu1  ;;  %1312 = vmatprep.subr.mxu0 %v3319_v15  ;;  %1417 = vmatprep.subr.mxu1 %v3319_v15  ;;  %v996_v40 = vld [vmem:[%s5622_s5 + $0x28] sm:$0xff] }
 0x115   :  { %809 = vst [vmem:[#allocation2 + $0x40] sm:$0xff] %v4094_v47  ;;  %v808_v53 = vmax.f32 %v806_v48, 0.0  ;;  %v684_v55 = vmax.f32 %v334_v51, %v585_v52  ;;  %1313 = vmatpush1.msra.mxu0 %v977_v44  ;;  %1418 = vmatpush1.msra.mxu1 %v1001_v45  ;;  %v336_v57 = vpop.f32.mrf.mxu0  ;;  %v853_v45 = vld [vmem:[%s5623_s3] sm:$0x3] }
 0x116   :  { %v587_v58 = vpop.f32.mrf.mxu1  ;;  %v4101_v60 = vld [vmem:[#allocation2 + $0x38] sm:$0xff]  ;;  %1314 = vmatprep.subr.mxu0 %v3319_v15  ;;  %1419 = vmatprep.subr.mxu1 %v3319_v15  ;;  %v971_v48 = vld [vmem:[%s5621_s4 + $0x20] sm:$0xff] }
 0x117   :  { %810 = vst.msk [vmem:[#allocation2 + $0x48] sm:$0xff] %vm729_vm2, %v808_v53  ;;  %v811_v2 = vmax.f32 %v682_v54, %v684_v55  ;;  %v685_v3 = vmax.f32 %v336_v57, %v587_v58  ;;  %2993 = vmatprep.mubr.msk.f32.mxu0 %vm729_vm2, %v4101_v60  ;;  %3001 = vmatprep.mubr.msk.f32.mxu1 %vm729_vm2, %v4101_v60  ;;  %v340_v4 = vpop.f32.mrf.mxu0  ;;  %v995_v51 = vld [vmem:[%s5622_s5 + $0x20] sm:$0xff] }
 0x118   :  { %v591_v6 = vpop.f32.mrf.mxu1  ;;  %1140 = vmatmul.mubr.f32.gmra.mxu0 %v4053_v17  ;;  %1269 = vmatmul.mubr.f32.gmra.mxu1 %v4053_v17 }
 0x119   :  { %v825_v9 = vadd.f32 %v818_v56, %v811_v2  ;;  %v812_v10 = vmax.f32 %v683_v1, %v685_v3  ;;  %1315 = vmatpush1.msra.mxu0 %v976_v62  ;;  %1420 = vmatpush1.msra.mxu1 %v1000_v63  ;;  %v342_v11 = vpop.f32.mrf.mxu0  ;;  %v686_v23 = vmax.f32 %v340_v4, %v591_v6  ;;  %v970_v3 = vld [vmem:[%s5621_s4 + $0x18] sm:$0xff] }
 0x11a   :  { %v593_v12 = vpop.f32.mrf.mxu1  ;;  %1316 = vmatprep.subr.mxu0 %v3319_v15  ;;  %1421 = vmatprep.subr.mxu1 %v3319_v15  ;;  %v862_v1 = vrot.slane %v853_v45, %v3992_v50  ;;  %v994_v4 = vld [vmem:[%s5622_s5 + $0x18] sm:$0xff] }
 0x11b   :  { %v4135_v18 = vmax.f32 %v825_v9, 0.0  ;;  %v826_v19 = vadd.f32 %v822_v59, %v812_v10  ;;  %1317 = vmatpush1.msra.mxu0 %v975_v7  ;;  %1422 = vmatpush1.msra.mxu1 %v999_v8  ;;  %v346_v20 = vpop.f32.mrf.mxu0  ;;  %v687_v34 = vmax.f32 %v342_v11, %v593_v12  ;;  %v858_v59 = vrot.slane %v853_v45, %v3987_v46  ;;  %v969_v11 = vld [vmem:[%s5621_s4 + $0x10] sm:$0xff] }
 0x11c   :  { %v597_v21 = vpop.f32.mrf.mxu1  ;;  %1318 = vmatprep.subr.mxu0 %v3319_v15  ;;  %1423 = vmatprep.subr.mxu1 %v3319_v15  ;;  %v993_v12 = vld [vmem:[%s5622_s5 + $0x10] sm:$0xff] }
 0x11d   :  { %829 = vst [vmem:[#allocation2 + $0x50] sm:$0xff] %v4135_v18  ;;  %v828_v22 = vmax.f32 %v826_v19, 0.0  ;;  %v688_v24 = vmax.f32 %v346_v20, %v597_v21  ;;  %1319 = vmatpush1.msra.mxu0 %v974_v14  ;;  %1424 = vmatpush1.msra.mxu1 %v998_v16  ;;  %v348_v26 = vpop.f32.mrf.mxu0  ;;  %v873_v20 = vld [vmem:[%s5623_s3] sm:$0x3]  ;;  %v968_v21 = vld [vmem:[%s5621_s4 + $0x8] sm:$0xff] }
 0x11e   :  { %v599_v28 = vpop.f32.mrf.mxu1  ;;  %v4142_v31 = vld [vmem:[#allocation2 + $0x48] sm:$0xff]  ;;  %1320 = vmatprep.subr.mxu0 %v3319_v15  ;;  %1425 = vmatprep.subr.mxu1 %v3319_v15 }
 0x11f   :  { %830 = vst.msk [vmem:[#allocation2 + $0x58] sm:$0xff] %vm729_vm2, %v828_v22  ;;  %v831_v35 = vmax.f32 %v686_v23, %v688_v24  ;;  %v689_v36 = vmax.f32 %v348_v26, %v599_v28  ;;  %2994 = vmatprep.mubr.msk.f32.mxu0 %vm729_vm2, %v4142_v31  ;;  %3002 = vmatprep.mubr.msk.f32.mxu1 %vm729_vm2, %v4142_v31  ;;  %v352_v37 = vpop.f32.mrf.mxu0  ;;  %v992_v22 = vld [vmem:[%s5622_s5 + $0x8] sm:$0xff] }
 0x120   :  { %v603_v38 = vpop.f32.mrf.mxu1  ;;  %1145 = vmatmul.mubr.f32.gmra.mxu0 %v4094_v47  ;;  %1274 = vmatmul.mubr.f32.gmra.mxu1 %v4094_v47 }
 0x121   :  { %v845_v41 = vadd.f32 %v838_v25, %v831_v35  ;;  %v832_v42 = vmax.f32 %v687_v34, %v689_v36  ;;  %1321 = vmatpush1.msra.mxu0 %v973_v32  ;;  %1426 = vmatpush1.msra.mxu1 %v997_v33  ;;  %v354_v43 = vpop.f32.mrf.mxu0  ;;  %v690_v57 = vmax.f32 %v352_v37, %v603_v38  ;;  %v967_v38 = vld [vmem:[%s5621_s4] sm:$0xff] }
 0x122   :  { %v605_v44 = vpop.f32.mrf.mxu1  ;;  %1322 = vmatprep.subr.mxu0 %v3319_v15  ;;  %1427 = vmatprep.subr.mxu1 %v3319_v15  ;;  %v878_v33 = vrot.slane %v873_v20, %v3987_v46  ;;  %v882_v36 = vrot.slane %v873_v20, %v3992_v50  ;;  %v987_v20 = vld [vmem:[%s5621_s4 + $0xa0] sm:$0xff] }
 0x123   :  { %v4176_v52 = vmax.f32 %v845_v41, 0.0  ;;  %v846_v53 = vadd.f32 %v842_v30, %v832_v42  ;;  %1323 = vmatpush1.msra.mxu0 %v972_v39  ;;  %1428 = vmatpush1.msra.mxu1 %v996_v40  ;;  %v358_v54 = vpop.f32.mrf.mxu0  ;;  %v691_v6 = vmax.f32 %v354_v43, %v605_v44  ;;  %v991_v39 = vld [vmem:[%s5622_s5] sm:$0xff]  ;;  %v990_v43 = vld [vmem:[%s5621_s4 + $0xb8] sm:$0xff] }
 0x124   :  { %v609_v55 = vpop.f32.mrf.mxu1  ;;  %1324 = vmatprep.subr.mxu0 %v3319_v15  ;;  %1429 = vmatprep.subr.mxu1 %v3319_v15  ;;  %v1014_v44 = vld [vmem:[%s5622_s5 + $0xb8] sm:$0xff] }
 0x125   :  { %849 = vst [vmem:[#allocation2 + $0x60] sm:$0xff] %v4176_v52  ;;  %v848_v56 = vmax.f32 %v846_v53, 0.0  ;;  %v692_v58 = vmax.f32 %v358_v54, %v609_v55  ;;  %1325 = vmatpush1.msra.mxu0 %v971_v48  ;;  %1430 = vmatpush1.msra.mxu1 %v995_v51  ;;  %v360_v62 = vpop.f32.mrf.mxu0  ;;  %v989_v54 = vld [vmem:[%s5621_s4 + $0xb0] sm:$0xff] }
 0x126   :  { %v611_v63 = vpop.f32.mrf.mxu1  ;;  %v4183_v2 = vld [vmem:[#allocation2 + $0x58] sm:$0xff]  ;;  %1326 = vmatprep.subr.mxu0 %v3319_v15  ;;  %1431 = vmatprep.subr.mxu1 %v3319_v15  ;;  %v1013_v55 = vld [vmem:[%s5622_s5 + $0xb0] sm:$0xff] }
 0x127   :  { %850 = vst.msk [vmem:[#allocation2 + $0x68] sm:$0xff] %vm729_vm2, %v848_v56  ;;  %v851_v7 = vmax.f32 %v690_v57, %v692_v58  ;;  %v693_v8 = vmax.f32 %v360_v62, %v611_v63  ;;  %2995 = vmatprep.mubr.msk.f32.mxu0 %vm729_vm2, %v4183_v2  ;;  %3003 = vmatprep.mubr.msk.f32.mxu1 %vm729_vm2, %v4183_v2  ;;  %v364_v9 = vpop.f32.mrf.mxu0 }
 0x128   :  { %v615_v10 = vpop.f32.mrf.mxu1  ;;  %1150 = vmatmul.mubr.f32.gmra.mxu0 %v4135_v18  ;;  %1279 = vmatmul.mubr.f32.gmra.mxu1 %v4135_v18 }
 0x129   :  { %v865_v13 = vadd.f32 %v858_v59, %v851_v7  ;;  %v852_v14 = vmax.f32 %v691_v6, %v693_v8  ;;  %1327 = vmatpush1.msra.mxu0 %v970_v3  ;;  %1432 = vmatpush1.msra.mxu1 %v994_v4  ;;  %v366_v16 = vpop.f32.mrf.mxu0  ;;  %v694_v30 = vmax.f32 %v364_v9, %v615_v10  ;;  %v893_v3 = vld [vmem:[%s5623_s3] sm:$0x3]  ;;  %v988_v10 = vld [vmem:[%s5621_s4 + $0xa8] sm:$0xff] }
 0x12a   :  { %v617_v19 = vpop.f32.mrf.mxu1  ;;  %1328 = vmatprep.subr.mxu0 %v3319_v15  ;;  %1433 = vmatprep.subr.mxu1 %v3319_v15  ;;  %v898_v8 = vrot.slane %v893_v3, %v3987_v46 }
 0x12b   :  { %v4217_v23 = vmax.f32 %v865_v13, 0.0  ;;  %v866_v24 = vadd.f32 %v862_v1, %v852_v14  ;;  %1329 = vmatpush1.msra.mxu0 %v969_v11  ;;  %1434 = vmatpush1.msra.mxu1 %v993_v12  ;;  %v370_v25 = vpop.f32.mrf.mxu0  ;;  %v695_v40 = vmax.f32 %v366_v16, %v617_v19  ;;  %v1012_v11 = vld [vmem:[%s5622_s5 + $0xa8] sm:$0xff]  ;;  %v902_v19 = vrot.slane %v893_v3, %v3992_v50 }
 0x12c   :  { %v621_v26 = vpop.f32.mrf.mxu1  ;;  %1330 = vmatprep.subr.mxu0 %v3319_v15  ;;  %1435 = vmatprep.subr.mxu1 %v3319_v15 }
 0x12d   :  { %869 = vst [vmem:[#allocation2 + $0x70] sm:$0xff] %v4217_v23  ;;  %v868_v28 = vmax.f32 %v866_v24, 0.0  ;;  %v696_v32 = vmax.f32 %v370_v25, %v621_v26  ;;  %1331 = vmatpush1.msra.mxu0 %v968_v21  ;;  %1436 = vmatpush1.msra.mxu1 %v992_v22  ;;  %v372_v34 = vpop.f32.mrf.mxu0  ;;  %v1011_v21 = vld [vmem:[%s5622_s5 + $0xa0] sm:$0xff]  ;;  %v986_v25 = vld [vmem:[%s5621_s4 + $0x98] sm:$0xff] }
 0x12e   :  { %v623_v35 = vpop.f32.mrf.mxu1  ;;  %v4224_v37 = vld [vmem:[#allocation2 + $0x68] sm:$0xff]  ;;  %1332 = vmatprep.subr.mxu0 %v3319_v15  ;;  %1437 = vmatprep.subr.mxu1 %v3319_v15  ;;  %v1010_v26 = vld [vmem:[%s5622_s5 + $0x98] sm:$0xff] }
 0x12f   :  { %870 = vst.msk [vmem:[#allocation2 + $0x78] sm:$0xff] %vm729_vm2, %v868_v28  ;;  %v871_v41 = vmax.f32 %v694_v30, %v696_v32  ;;  %v697_v42 = vmax.f32 %v372_v34, %v623_v35  ;;  %2996 = vmatprep.mubr.msk.f32.mxu0 %vm729_vm2, %v4224_v37  ;;  %3004 = vmatprep.mubr.msk.f32.mxu1 %vm729_vm2, %v4224_v37  ;;  %v376_v45 = vpop.f32.mrf.mxu0  ;;  %v985_v32 = vld [vmem:[%s5621_s4 + $0x90] sm:$0xff] }
 0x130   :  { %1155 = vmatmul.mubr.f32.gmra.mxu0 %v4176_v52  ;;  %1284 = vmatmul.mubr.f32.gmra.mxu1 %v4176_v52  ;;  %v627_v48 = vpop.f32.mrf.mxu1 }
 0x131   :  { %v885_v51 = vadd.f32 %v878_v33, %v871_v41  ;;  %v872_v53 = vmax.f32 %v695_v40, %v697_v42  ;;  %1333 = vmatpush1.msra.mxu0 %v967_v38  ;;  %1438 = vmatpush1.msra.mxu1 %v991_v39  ;;  %v378_v56 = vpop.f32.mrf.mxu0  ;;  %v698_v62 = vmax.f32 %v376_v45, %v627_v48  ;;  %v1009_v33 = vld [vmem:[%s5622_s5 + $0x90] sm:$0xff]  ;;  %v1008_v38 = vld [vmem:[%s5622_s5 + $0x88] sm:$0xff]  ;;  %v983_v40 = vld [vmem:[%s5621_s4 + $0x80] sm:$0xff] }
 0x132   :  { %1350 = vmatprep.subr.mxu0 %v3319_v15  ;;  %1455 = vmatprep.subr.mxu1 %v3319_v15  ;;  %v629_v57 = vpop.f32.mrf.mxu1  ;;  %v952_v39 = vld [vmem:[#allocation2 + $0x8] sm:$0xff]  ;;  %v1007_v41 = vld [vmem:[%s5622_s5 + $0x80] sm:$0xff]  ;;  %v1543_v42 = vld [vmem:[%s5621_s4 + $0x1f8] sm:$0xff] }
 0x133   :  { %v4255_v58 = vmax.f32 %v885_v51, 0.0  ;;  %v886_v59 = vadd.f32 %v882_v36, %v872_v53  ;;  %1351 = vmatpush2.msra.mxu0 %v990_v43  ;;  %1456 = vmatpush2.msra.mxu1 %v1014_v44  ;;  %v382_v63 = vpop.f32.mrf.mxu0  ;;  %v699_v6 = vmax.f32 %v378_v56, %v629_v57  ;;  %v984_v36 = vld [vmem:[%s5621_s4 + $0x88] sm:$0xff]  ;;  %v1696_v43 = vld [vmem:[%s5622_s5 + $0x1f8] sm:$0xff]  ;;  %v1542_v44 = vld [vmem:[%s5621_s4 + $0x1f0] sm:$0xff] }
 0x134   :  { %1352 = vmatprep.subr.mxu0 %v3319_v15  ;;  %1457 = vmatprep.subr.mxu1 %v3319_v15  ;;  %v633_v1 = vpop.f32.mrf.mxu1  ;;  %v1695_v45 = vld [vmem:[%s5622_s5 + $0x1f0] sm:$0xff]  ;;  %v1693_v53 = vld [vmem:[%s5622_s5 + $0x1e0] sm:$0xff]  ;;  %v1539_v56 = vld [vmem:[%s5621_s4 + $0x1d8] sm:$0xff] }
 0x135   :  { %889 = vst [vmem:[#allocation2 + $0x80] sm:$0xff] %v4255_v58  ;;  %v888_v4 = vmax.f32 %v886_v59, 0.0  ;;  %1353 = vmatpush2.msra.mxu0 %v989_v54  ;;  %1458 = vmatpush2.msra.mxu1 %v1013_v55  ;;  %v700_v7 = vmax.f32 %v382_v63, %v633_v1  ;;  %v384_v12 = vpop.f32.mrf.mxu0  ;;  %v1692_v57 = vld [vmem:[%s5622_s5 + $0x1d8] sm:$0xff]  ;;  %v913_v63 = vld [vmem:[%s5623_s3] sm:$0x3] }
 0x136   :  { %v4264_v9 = vld [vmem:[#allocation2 + $0x78] sm:$0xff]  ;;  %1354 = vmatprep.subr.mxu0 %v3319_v15  ;;  %1459 = vmatprep.subr.mxu1 %v3319_v15  ;;  %v635_v13 = vpop.f32.mrf.mxu1  ;;  %v918_v3 = vrot.slane %v913_v63, %v3987_v46 }
 0x137   :  { %890 = vst.msk [vmem:[#allocation2 + $0x88] sm:$0xff] %vm729_vm2, %v888_v4  ;;  %2997 = vmatprep.mubr.msk.f32.mxu0 %vm729_vm2, %v4264_v9  ;;  %3005 = vmatprep.mubr.msk.f32.mxu1 %vm729_vm2, %v4264_v9  ;;  %v891_v14 = vmax.f32 %v698_v62, %v700_v7  ;;  %v701_v16 = vmax.f32 %v384_v12, %v635_v13  ;;  %v388_v48 = vpop.f32.mrf.mxu0  ;;  %v1538_v4 = vld [vmem:[%s5621_s4 + $0x1d0] sm:$0xff] }
 0x138   :  { %1160 = vmatmul.mubr.f32.gmra.mxu0 %v4217_v23  ;;  %1289 = vmatmul.mubr.f32.gmra.mxu1 %v4217_v23  ;;  %v639_v51 = vpop.f32.mrf.mxu1  ;;  %v922_v13 = vrot.slane %v913_v63, %v3992_v50  ;;  %v1549_v63 = vld [vmem:[%s5621_s4 + $0x228] sm:$0xff] }
 0x139   :  { %1355 = vmatpush2.msra.mxu0 %v988_v10  ;;  %1460 = vmatpush2.msra.mxu1 %v1012_v11  ;;  %v905_v22 = vadd.f32 %v898_v8, %v891_v14  ;;  %v892_v24 = vmax.f32 %v699_v6, %v701_v16  ;;  %v390_v54 = vpop.f32.mrf.mxu0  ;;  %v1691_v6 = vld [vmem:[%s5622_s5 + $0x1d0] sm:$0xff]  ;;  %v1537_v14 = vld [vmem:[%s5621_s4 + $0x1c8] sm:$0xff] }
 0x13a   :  { %1356 = vmatprep.subr.mxu0 %v3319_v15  ;;  %1461 = vmatprep.subr.mxu1 %v3319_v15  ;;  %v641_v55 = vpop.f32.mrf.mxu1  ;;  %v1690_v16 = vld [vmem:[%s5622_s5 + $0x1c8] sm:$0xff] }
 0x13b   :  { %1357 = vmatpush2.msra.mxu0 %v987_v20  ;;  %1462 = vmatpush2.msra.mxu1 %v1011_v21  ;;  %v4296_v28 = vmax.f32 %v905_v22, 0.0  ;;  %v906_v30 = vadd.f32 %v902_v19, %v892_v24  ;;  %v394_v59 = vpop.f32.mrf.mxu0  ;;  %v703_v7 = vmax.f32 %v390_v54, %v641_v55  ;;  %v1536_v21 = vld [vmem:[%s5621_s4 + $0x1c0] sm:$0xff]  ;;  %v1703_v54 = vld [vmem:[%s5622_s5 + $0x230] sm:$0xff] }
 0x13c   :  { %1358 = vmatprep.subr.mxu0 %v3319_v15  ;;  %1463 = vmatprep.subr.mxu1 %v3319_v15  ;;  %v645_v62 = vpop.f32.mrf.mxu1  ;;  %v1689_v22 = vld [vmem:[%s5622_s5 + $0x1c0] sm:$0xff] }
 0x13d   :  { %1359 = vmatpush2.msra.mxu0 %v986_v25  ;;  %1464 = vmatpush2.msra.mxu1 %v1010_v26  ;;  %909 = vst [vmem:[#allocation2 + $0x90] sm:$0xff] %v4296_v28  ;;  %v908_v34 = vmax.f32 %v906_v30, 0.0  ;;  %v704_v1 = vmax.f32 %v394_v59, %v645_v62  ;;  %v396_v10 = vpop.f32.mrf.mxu0  ;;  %v1535_v25 = vld [vmem:[%s5621_s4 + $0x1b8] sm:$0xff]  ;;  %v1534_v30 = vld [vmem:[%s5621_s4 + $0x1b0] sm:$0xff] }
 0x13e   :  { %1360 = vmatprep.subr.mxu0 %v3319_v15  ;;  %1465 = vmatprep.subr.mxu1 %v3319_v15  ;;  %v4309_v35 = vld [vmem:[#allocation2 + $0x88] sm:$0xff]  ;;  %v1688_v26 = vld [vmem:[%s5622_s5 + $0x1b8] sm:$0xff] }
 0x13f   :  { %1361 = vmatpush2.msra.mxu0 %v985_v32  ;;  %1466 = vmatpush2.msra.mxu1 %v1009_v33  ;;  %910 = vst.msk [vmem:[#allocation2 + $0x98] sm:$0xff] %vm729_vm2, %v908_v34  ;;  %v1687_v32 = vld [vmem:[%s5622_s5 + $0x1b0] sm:$0xff]  ;;  %v1686_v33 = vld [vmem:[%s5622_s5 + $0x1a8] sm:$0xff]  ;;  %v1532_v34 = vld [vmem:[%s5621_s4 + $0x1a0] sm:$0xff] }
 0x140   :  { %2998 = vmatprep.mubr.msk.f32.mxu0 %vm729_vm2, %v4309_v35  ;;  %3006 = vmatprep.mubr.msk.f32.mxu1 %vm729_vm2, %v4309_v35 }
 0x141   :  { %1362 = vmatprep.subr.mxu0 %v3319_v15  ;;  %1467 = vmatprep.subr.mxu1 %v3319_v15 }
 0x142   :  { %1165 = vmatmul.mubr.f32.gmra.mxu0 %v4255_v58  ;;  %1294 = vmatmul.mubr.f32.gmra.mxu1 %v4255_v58 }
 0x143   :  { %1363 = vmatpush2.msra.mxu0 %v984_v36  ;;  %1468 = vmatpush2.msra.mxu1 %v1008_v38  ;;  %v1685_v36 = vld [vmem:[%s5622_s5 + $0x1a0] sm:$0xff]  ;;  %v1684_v38 = vld [vmem:[%s5622_s5 + $0x198] sm:$0xff] }
 0x144   :  { %1364 = vmatprep.subr.mxu0 %v3319_v15  ;;  %3007 = vmatprep.mubr.msk.f32.mxu0 %vm729_vm2, %v952_v39 }
 0x145   :  { %1469 = vmatprep.subr.mxu1 %v3319_v15  ;;  %3015 = vmatprep.mubr.msk.f32.mxu1 %vm729_vm2, %v952_v39  ;;  %v1530_v39 = vld [vmem:[%s5621_s4 + $0x190] sm:$0xff] }
 0x146   :  { %1365 = vmatpush2.msra.mxu0 %v983_v40  ;;  %1470 = vmatpush2.msra.mxu1 %v1007_v41  ;;  %v1683_v40 = vld [vmem:[%s5622_s5 + $0x190] sm:$0xff]  ;;  %v1529_v41 = vld [vmem:[%s5621_s4 + $0x188] sm:$0xff] }
 0x147   :  { %1576 = vmatprep.subr.mxu0 %v3319_v15  ;;  %1705 = vmatprep.subr.mxu1 %v3319_v15 }
 0x148   :  { %1367 = vmatmul.mubr.f32.vlgmr.msra.gmra.mxu0 %v726_v5  ;;  %1472 = vmatmul.mubr.f32.vlgmr.msra.gmra.mxu1 %v726_v5  ;;  %v1694_v5 = vld [vmem:[%s5622_s5 + $0x1e8] sm:$0xff] }
 0x149   :  { %1577 = vmatpush1.msra.mxu0 %v1543_v42  ;;  %1706 = vmatpush1.msra.mxu1 %v1696_v43  ;;  %v1682_v42 = vld [vmem:[%s5622_s5 + $0x188] sm:$0xff]  ;;  %v400_v43 = vpop.f32.mrf.mxu0 }
 0x14a   :  { %3008 = vmatprep.mubr.msk.f32.mxu0 %vm729_vm2, %v4021_v61  ;;  %3016 = vmatprep.mubr.msk.f32.mxu1 %vm729_vm2, %v4021_v61  ;;  %v1540_v61 = vld [vmem:[%s5621_s4 + $0x1e0] sm:$0xff] }
 0x14b   :  { %1578 = vmatprep.subr.mxu0 %v3319_v15  ;;  %1707 = vmatprep.subr.mxu1 %v3319_v15 }
 0x14c   :  { %1579 = vmatpush1.msra.mxu0 %v1542_v44  ;;  %1708 = vmatpush1.msra.mxu1 %v1695_v45  ;;  %v1528_v45 = vld [vmem:[%s5621_s4 + $0x180] sm:$0xff] }
 0x14d   :  { %1580 = vmatprep.subr.mxu0 %v3319_v15  ;;  %1709 = vmatprep.subr.mxu1 %v3319_v15 }
 0x14e   :  { %1372 = vmatmul.mubr.f32.gmra.mxu0 %v4008_v27  ;;  %1477 = vmatmul.mubr.f32.gmra.mxu1 %v4008_v27  ;;  %v702_v27 = vmax.f32 %v388_v48, %v639_v51  ;;  %v1704_v48 = vld [vmem:[%s5622_s5 + $0x238] sm:$0xff]  ;;  %v402_v51 = vpop.f32.mrf.mxu0 }
 0x14f   :  { %1581 = vmatpush1.msra.mxu0 %v1541_v0  ;;  %1710 = vmatpush1.msra.mxu1 %v1694_v5  ;;  %v1681_v0 = vld [vmem:[%s5622_s5 + $0x180] sm:$0xff]  ;;  %v1551_v5 = vld [vmem:[%s5621_s4 + $0x238] sm:$0xff] }
 0x150   :  { %3009 = vmatprep.mubr.msk.f32.mxu0 %vm729_vm2, %v4060_v29  ;;  %3017 = vmatprep.mubr.msk.f32.mxu1 %vm729_vm2, %v4060_v29  ;;  %v911_v8 = vmax.f32 %v702_v27, %v704_v1  ;;  %v406_v55 = vpop.f32.mrf.mxu0  ;;  %v1702_v1 = vld [vmem:[%s5622_s5 + $0x228] sm:$0xff] }
 0x151   :  { %1582 = vmatprep.subr.mxu0 %v3319_v15  ;;  %1711 = vmatprep.subr.mxu1 %v3319_v15 }
 0x152   :  { %1583 = vmatpush1.msra.mxu0 %v1540_v61  ;;  %1712 = vmatpush1.msra.mxu1 %v1693_v53  ;;  %v925_v11 = vadd.f32 %v918_v3, %v911_v8  ;;  %v408_v3 = vpop.f32.mrf.mxu0  ;;  %v1548_v8 = vld [vmem:[%s5621_s4 + $0x220] sm:$0xff] }
 0x153   :  { %1584 = vmatprep.subr.mxu0 %v3319_v15  ;;  %1713 = vmatprep.subr.mxu1 %v3319_v15 }
 0x154   :  { %1377 = vmatmul.mubr.f32.gmra.mxu0 %v4016_v49  ;;  %1482 = vmatmul.mubr.f32.gmra.mxu1 %v4016_v49  ;;  %v647_v49 = vpop.f32.mrf.mxu1  ;;  %v4417_v19 = vmax.f32 %v925_v11, 0.0 }
 0x155   :  { %1585 = vmatpush1.msra.mxu0 %v1539_v56  ;;  %1714 = vmatpush1.msra.mxu1 %v1692_v57  ;;  %v705_v12 = vmax.f32 %v396_v10, %v647_v49  ;;  %v933_v56 = vld [vmem:[%s5623_s3] sm:$0x3] }
 0x156   :  { %3010 = vmatprep.mubr.msk.f32.mxu0 %vm729_vm2, %v4101_v60  ;;  %3018 = vmatprep.mubr.msk.f32.mxu1 %vm729_vm2, %v4101_v60  ;;  %929 = vst [vmem:[#allocation2 + $0xa0] sm:$0xff] %v4417_v19  ;;  %v651_v44 = vpop.f32.mrf.mxu1  ;;  %v938_v62 = vrot.slane %v933_v56, %v3987_v46  ;;  %v942_v46 = vrot.slane %v933_v56, %v3992_v50  ;;  %v1701_v10 = vld [vmem:[%s5622_s5 + $0x220] sm:$0xff]  ;;  %v1547_v50 = vld [vmem:[%s5621_s4 + $0x218] sm:$0xff] }
 0x157   :  { %1586 = vmatprep.subr.mxu0 %v3319_v15  ;;  %1715 = vmatprep.subr.mxu1 %v3319_v15  ;;  %v912_v20 = vmax.f32 %v703_v7, %v705_v12  ;;  %v706_v53 = vmax.f32 %v400_v43, %v651_v44  ;;  %v1700_v12 = vld [vmem:[%s5622_s5 + $0x218] sm:$0xff]  ;;  %v4664_v43 = vld [vmem:[#allocation2 + $0x50] sm:$0xff]  ;;  %v2004_v44 = vld [vmem:[%s5622_s5 + $0x288] sm:$0xff] }
 0x158   :  { %1587 = vmatpush1.msra.mxu0 %v1538_v4  ;;  %1716 = vmatpush1.msra.mxu1 %v1691_v6  ;;  %v653_v61 = vpop.f32.mrf.mxu1  ;;  %v1827_v56 = vld [vmem:[#allocation2 + $0x38] sm:$0xff] }
 0x159   :  { %1588 = vmatprep.subr.mxu0 %v3319_v15  ;;  %1717 = vmatprep.subr.mxu1 %v3319_v15  ;;  %v926_v24 = vadd.f32 %v922_v13, %v912_v20  ;;  %v707_v57 = vmax.f32 %v402_v51, %v653_v61  ;;  %v1699_v20 = vld [vmem:[%s5622_s5 + $0x210] sm:$0xff]  ;;  %v2000_v51 = vld [vmem:[%s5622_s5 + $0x268] sm:$0xff]  ;;  %v1999_v61 = vld [vmem:[%s5622_s5 + $0x260] sm:$0xff] }
 0x15a   :  { %1382 = vmatmul.mubr.f32.gmra.mxu0 %v4053_v17  ;;  %1487 = vmatmul.mubr.f32.gmra.mxu1 %v4053_v17  ;;  %v657_v27 = vpop.f32.mrf.mxu1 }
 0x15b   :  { %1589 = vmatpush1.msra.mxu0 %v1537_v14  ;;  %1718 = vmatpush1.msra.mxu1 %v1690_v16  ;;  %v928_v17 = vmax.f32 %v926_v24, 0.0  ;;  %v708_v59 = vmax.f32 %v406_v55, %v657_v27  ;;  %v1546_v16 = vld [vmem:[%s5621_s4 + $0x210] sm:$0xff]  ;;  %v1698_v24 = vld [vmem:[%s5622_s5 + $0x208] sm:$0xff] }
 0x15c   :  { %3011 = vmatprep.mubr.msk.f32.mxu0 %vm729_vm2, %v4142_v31  ;;  %3019 = vmatprep.mubr.msk.f32.mxu1 %vm729_vm2, %v4142_v31  ;;  %v659_v4 = vpop.f32.mrf.mxu1  ;;  %v1997_v55 = vld [vmem:[%s5622_s5 + $0x250] sm:$0xff]  ;;  %v1996_v27 = vld [vmem:[%s5622_s5 + $0x248] sm:$0xff] }
 0x15d   :  { %1590 = vmatprep.subr.mxu0 %v3319_v15  ;;  %1719 = vmatprep.subr.mxu1 %v3319_v15  ;;  %930 = vst.msk [vmem:[#allocation2 + $0xa8] sm:$0xff] %vm729_vm2, %v928_v17  ;;  %v931_v6 = vmax.f32 %v706_v53, %v708_v59  ;;  %v709_v7 = vmax.f32 %v408_v3, %v659_v4  ;;  %v1544_v17 = vld [vmem:[%s5621_s4 + $0x200] sm:$0xff]  ;;  %v1998_v53 = vld [vmem:[%s5622_s5 + $0x258] sm:$0xff]  ;;  %v1863_v3 = vld [vmem:[%s5621_s4 + $0x2e8] sm:$0xff] }
 0x15e   :  { %1591 = vmatpush1.msra.mxu0 %v1536_v21  ;;  %1720 = vmatpush1.msra.mxu1 %v1689_v22  ;;  %v1545_v22 = vld [vmem:[%s5621_s4 + $0x208] sm:$0xff]  ;;  %v1865_v59 = vld [vmem:[%s5621_s4 + $0x2f8] sm:$0xff] }
 0x15f   :  { %1592 = vmatprep.subr.mxu0 %v3319_v15  ;;  %1721 = vmatprep.subr.mxu1 %v3319_v15  ;;  %v4558_v49 = vadd.f32 %v938_v62, %v931_v6  ;;  %v932_v11 = vmax.f32 %v707_v57, %v709_v7  ;;  %v1842_v57 = vld [vmem:[%s5621_s4 + $0x240] sm:$0xff]  ;;  %v2018_v62 = vld [vmem:[%s5622_s5 + $0x2f8] sm:$0xff]  ;;  %v2016_v4 = vld [vmem:[%s5622_s5 + $0x2e8] sm:$0xff] }
 0x160   :  { %1387 = vmatmul.mubr.f32.gmra.mxu0 %v4094_v47  ;;  %1492 = vmatmul.mubr.f32.gmra.mxu1 %v4094_v47  ;;  %v1533_v47 = vld [vmem:[%s5621_s4 + $0x1a8] sm:$0xff]  ;;  %v1862_v6 = vld [vmem:[%s5621_s4 + $0x2e0] sm:$0xff] }
 0x161   :  { %1593 = vmatpush1.msra.mxu0 %v1535_v25  ;;  %1722 = vmatpush1.msra.mxu1 %v1688_v26  ;;  %v947_v13 = vmax.f32 %v4558_v49, 0.0  ;;  %v946_v14 = vadd.f32 %v942_v46, %v932_v11  ;;  %v1697_v25 = vld [vmem:[%s5622_s5 + $0x200] sm:$0xff]  ;;  %v1861_v46 = vld [vmem:[%s5621_s4 + $0x2d8] sm:$0xff]  ;;  %v2013_v11 = vld [vmem:[%s5622_s5 + $0x2d0] sm:$0xff] }
 0x162   :  { %3012 = vmatprep.mubr.msk.f32.mxu0 %vm729_vm2, %v4183_v2  ;;  %3020 = vmatprep.mubr.msk.f32.mxu1 %vm729_vm2, %v4183_v2  ;;  %v1512_v26 = vld [vmem:[#allocation2 + $0x20] sm:$0xff] }
 0x163   :  { %1594 = vmatprep.subr.mxu0 %v3319_v15  ;;  %1723 = vmatprep.subr.mxu1 %v3319_v15  ;;  %v948_v21 = vmax.f32 %v946_v14, 0.0  ;;  %v2015_v7 = vld [vmem:[%s5622_s5 + $0x2e0] sm:$0xff] }
 0x164   :  { %1595 = vmatpush1.msra.mxu0 %v1534_v30  ;;  %1724 = vmatpush1.msra.mxu1 %v1687_v32  ;;  %v1857_v30 = vld [vmem:[%s5621_s4 + $0x2b8] sm:$0xff]  ;;  %v1858_v14 = vld [vmem:[%s5621_s4 + $0x2c0] sm:$0xff] }
 0x165   :  { %1596 = vmatprep.subr.mxu0 %v3319_v15  ;;  %1725 = vmatprep.subr.mxu1 %v3319_v15  ;;  %950 = vst.msk [vmem:[#allocation2 + $0xb8] sm:$0xff] %vm729_vm2, %v948_v21  ;;  %v2010_v32 = vld [vmem:[%s5622_s5 + $0x2b8] sm:$0xff] }
 0x166   :  { %1392 = vmatmul.mubr.f32.gmra.mxu0 %v4135_v18  ;;  %1497 = vmatmul.mubr.f32.gmra.mxu1 %v4135_v18  ;;  %v1531_v18 = vld [vmem:[%s5621_s4 + $0x198] sm:$0xff] }
 0x167   :  { %1597 = vmatpush1.msra.mxu0 %v1533_v47  ;;  %1726 = vmatpush1.msra.mxu1 %v1686_v33  ;;  %v1856_v47 = vld [vmem:[%s5621_s4 + $0x2b0] sm:$0xff]  ;;  %v2324_v21 = vld [vmem:[%s5622_s5 + $0x378] sm:$0xff] }
 0x168   :  { %3013 = vmatprep.mubr.msk.f32.mxu0 %vm729_vm2, %v4224_v37  ;;  %3021 = vmatprep.mubr.msk.f32.mxu1 %vm729_vm2, %v4224_v37  ;;  %v2009_v33 = vld [vmem:[%s5622_s5 + $0x2b0] sm:$0xff] }
 0x169   :  { %1598 = vmatprep.subr.mxu0 %v3319_v15  ;;  %1727 = vmatprep.subr.mxu1 %v3319_v15 }
 0x16a   :  { %1599 = vmatpush1.msra.mxu0 %v1532_v34  ;;  %1728 = vmatpush1.msra.mxu1 %v1685_v36  ;;  %v4616_v34 = vld [vmem:[#allocation2 + $0x30] sm:$0xff]  ;;  %v2008_v36 = vld [vmem:[%s5622_s5 + $0x2a8] sm:$0xff] }
 0x16b   :  { %1600 = vmatprep.subr.mxu0 %v3319_v15  ;;  %1729 = vmatprep.subr.mxu1 %v3319_v15 }
 0x16c   :  { %1397 = vmatmul.mubr.f32.gmra.mxu0 %v4176_v52  ;;  %1502 = vmatmul.mubr.f32.gmra.mxu1 %v4176_v52 }
 0x16d   :  { %1601 = vmatpush1.msra.mxu0 %v1531_v18  ;;  %1730 = vmatpush1.msra.mxu1 %v1684_v38  ;;  %v1854_v18 = vld [vmem:[%s5621_s4 + $0x2a0] sm:$0xff] }
 0x16e   :  { %3014 = vmatprep.mubr.msk.f32.mxu0 %vm729_vm2, %v4264_v9  ;;  %3022 = vmatprep.mubr.msk.f32.mxu1 %vm729_vm2, %v4264_v9  ;;  %v2007_v38 = vld [vmem:[%s5622_s5 + $0x2a0] sm:$0xff] }
 0x16f   :  { %1602 = vmatprep.subr.mxu0 %v3319_v15  ;;  %1731 = vmatprep.subr.mxu1 %v3319_v15 }
 0x170   :  { %1603 = vmatpush1.msra.mxu0 %v1530_v39  ;;  %1732 = vmatpush1.msra.mxu1 %v1683_v40  ;;  %v4640_v39 = vld [vmem:[#allocation2 + $0x40] sm:$0xff]  ;;  %v2006_v40 = vld [vmem:[%s5622_s5 + $0x298] sm:$0xff] }
 0x171   :  { %1604 = vmatprep.subr.mxu0 %v3319_v15  ;;  %1733 = vmatprep.subr.mxu1 %v3319_v15 }
 0x172   :  { %1402 = vmatmul.mubr.f32.gmra.mxu0 %v4217_v23  ;;  %1507 = vmatmul.mubr.f32.gmra.mxu1 %v4217_v23 }
 0x173   :  { %1605 = vmatpush1.msra.mxu0 %v1529_v41  ;;  %1734 = vmatpush1.msra.mxu1 %v1682_v42  ;;  %v1852_v41 = vld [vmem:[%s5621_s4 + $0x290] sm:$0xff] }
 0x174   :  { %1606 = vmatprep.subr.mxu0 %v3319_v15  ;;  %3023 = vmatprep.mubr.msk.f32.mxu0 %vm729_vm2, %v4060_v29  ;;  %v2005_v42 = vld [vmem:[%s5622_s5 + $0x290] sm:$0xff] }
 0x175   :  { %1735 = vmatprep.subr.mxu1 %v3319_v15  ;;  %3031 = vmatprep.mubr.msk.f32.mxu1 %vm729_vm2, %v4060_v29  ;;  %v1550_v29 = vld [vmem:[%s5621_s4 + $0x230] sm:$0xff] }
 0x176   :  { %1607 = vmatpush1.msra.mxu0 %v1528_v45  ;;  %1736 = vmatpush1.msra.mxu1 %v1681_v0  ;;  %v1850_v45 = vld [vmem:[%s5621_s4 + $0x280] sm:$0xff] }
 0x177   :  { %1624 = vmatprep.subr.mxu0 %v3319_v15  ;;  %1753 = vmatprep.subr.mxu1 %v3319_v15  ;;  %v2003_v0 = vld [vmem:[%s5622_s5 + $0x280] sm:$0xff] }
 0x178   :  { %1625 = vmatpush2.msra.mxu0 %v1551_v5  ;;  %1754 = vmatpush2.msra.mxu1 %v1704_v48  ;;  %v2002_v5 = vld [vmem:[%s5622_s5 + $0x278] sm:$0xff]  ;;  %v2001_v48 = vld [vmem:[%s5622_s5 + $0x270] sm:$0xff] }
 0x179   :  { %1626 = vmatprep.subr.mxu0 %v3319_v15  ;;  %1755 = vmatprep.subr.mxu1 %v3319_v15 }
 0x17a   :  { %1627 = vmatpush2.msra.mxu0 %v1550_v29  ;;  %1756 = vmatpush2.msra.mxu1 %v1703_v54  ;;  %v4742_v29 = vld [vmem:[#allocation2 + $0x98] sm:$0xff]  ;;  %v1844_v54 = vld [vmem:[%s5621_s4 + $0x250] sm:$0xff] }
 0x17b   :  { %1628 = vmatprep.subr.mxu0 %v3319_v15  ;;  %1757 = vmatprep.subr.mxu1 %v3319_v15 }
 0x17c   :  { %1629 = vmatpush2.msra.mxu0 %v1549_v63  ;;  %1758 = vmatpush2.msra.mxu1 %v1702_v1  ;;  %v1864_v63 = vld [vmem:[%s5621_s4 + $0x2f0] sm:$0xff] }
 0x17d   :  { %1630 = vmatprep.subr.mxu0 %v3319_v15  ;;  %1759 = vmatprep.subr.mxu1 %v3319_v15  ;;  %v2017_v1 = vld [vmem:[%s5622_s5 + $0x2f0] sm:$0xff] }
 0x17e   :  { %1631 = vmatpush2.msra.mxu0 %v1548_v8  ;;  %1760 = vmatpush2.msra.mxu1 %v1701_v10  ;;  %v2014_v8 = vld [vmem:[%s5622_s5 + $0x2d8] sm:$0xff]  ;;  %v1860_v10 = vld [vmem:[%s5621_s4 + $0x2d0] sm:$0xff] }
 0x17f   :  { %1632 = vmatprep.subr.mxu0 %v3319_v15  ;;  %1761 = vmatprep.subr.mxu1 %v3319_v15 }
 0x180   :  { %1633 = vmatpush2.msra.mxu0 %v1547_v50  ;;  %1762 = vmatpush2.msra.mxu1 %v1700_v12  ;;  %v1859_v50 = vld [vmem:[%s5621_s4 + $0x2c8] sm:$0xff] }
 0x181   :  { %1634 = vmatprep.subr.mxu0 %v3319_v15  ;;  %1763 = vmatprep.subr.mxu1 %v3319_v15  ;;  %v2012_v12 = vld [vmem:[%s5622_s5 + $0x2c8] sm:$0xff] }
 0x182   :  { %1635 = vmatpush2.msra.mxu0 %v1546_v16  ;;  %1764 = vmatpush2.msra.mxu1 %v1699_v20  ;;  %v2011_v16 = vld [vmem:[%s5622_s5 + $0x2c0] sm:$0xff]  ;;  %v2171_v20 = vld [vmem:[%s5621_s4 + $0x378] sm:$0xff] }
 0x183   :  { %1636 = vmatprep.subr.mxu0 %v3319_v15  ;;  %1765 = vmatprep.subr.mxu1 %v3319_v15 }
 0x184   :  { %1637 = vmatpush2.msra.mxu0 %v1545_v22  ;;  %1766 = vmatpush2.msra.mxu1 %v1698_v24  ;;  %v4850_v22 = vld [vmem:[#allocation2 + $0x48] sm:$0xff] }
 0x185   :  { %1638 = vmatprep.subr.mxu0 %v3319_v15  ;;  %1767 = vmatprep.subr.mxu1 %v3319_v15 }
 0x186   :  { %1639 = vmatpush2.msra.mxu0 %v1544_v17  ;;  %1768 = vmatpush2.msra.mxu1 %v1697_v25  ;;  %v2170_v25 = vld [vmem:[%s5621_s4 + $0x370] sm:$0xff] }
 0x187   :  { %1641 = vmatmul.mubr.f32.vlgmr.msra.gmra.mxu0 %v1512_v26  ;;  %1770 = vmatmul.mubr.f32.vlgmr.msra.gmra.mxu1 %v1512_v26  ;;  %v2323_v26 = vld [vmem:[%s5622_s5 + $0x370] sm:$0xff] }
 0x188   :  { %1890 = vmatprep.subr.mxu0 %v3319_v15  ;;  %2019 = vmatprep.subr.mxu1 %v3319_v15 }
 0x189   :  { %3024 = vmatprep.mubr.msk.f32.mxu0 %vm729_vm2, %v4101_v60  ;;  %3032 = vmatprep.mubr.msk.f32.mxu1 %vm729_vm2, %v4101_v60  ;;  %v1855_v60 = vld [vmem:[%s5621_s4 + $0x2a8] sm:$0xff] }
 0x18a   :  { %1891 = vmatpush1.msra.mxu0 %v1857_v30  ;;  %2020 = vmatpush1.msra.mxu1 %v2010_v32 }
 0x18b   :  { %1892 = vmatprep.subr.mxu0 %v3319_v15  ;;  %2021 = vmatprep.subr.mxu1 %v3319_v15 }
 0x18c   :  { %1893 = vmatpush1.msra.mxu0 %v1856_v47  ;;  %2022 = vmatpush1.msra.mxu1 %v2009_v33  ;;  %v2169_v47 = vld [vmem:[%s5621_s4 + $0x368] sm:$0xff] }
 0x18d   :  { %1646 = vmatmul.mubr.f32.gmra.mxu0 %v4616_v34  ;;  %1775 = vmatmul.mubr.f32.gmra.mxu1 %v4616_v34  ;;  %v2322_v33 = vld [vmem:[%s5622_s5 + $0x368] sm:$0xff] }
 0x18e   :  { %1894 = vmatprep.subr.mxu0 %v3319_v15  ;;  %2023 = vmatprep.subr.mxu1 %v3319_v15 }
 0x18f   :  { %3025 = vmatprep.mubr.msk.f32.mxu0 %vm729_vm2, %v4142_v31  ;;  %3033 = vmatprep.mubr.msk.f32.mxu1 %vm729_vm2, %v4142_v31  ;;  %v1853_v31 = vld [vmem:[%s5621_s4 + $0x298] sm:$0xff] }
 0x190   :  { %1895 = vmatpush1.msra.mxu0 %v1855_v60  ;;  %2024 = vmatpush1.msra.mxu1 %v2008_v36  ;;  %v2168_v60 = vld [vmem:[%s5621_s4 + $0x360] sm:$0xff] }
 0x191   :  { %1896 = vmatprep.subr.mxu0 %v3319_v15  ;;  %2025 = vmatprep.subr.mxu1 %v3319_v15  ;;  %v2321_v36 = vld [vmem:[%s5622_s5 + $0x360] sm:$0xff] }
 0x192   :  { %1897 = vmatpush1.msra.mxu0 %v1854_v18  ;;  %2026 = vmatpush1.msra.mxu1 %v2007_v38 }
 0x193   :  { %1651 = vmatmul.mubr.f32.gmra.mxu0 %v4640_v39  ;;  %1780 = vmatmul.mubr.f32.gmra.mxu1 %v4640_v39 }
 0x194   :  { %1898 = vmatprep.subr.mxu0 %v3319_v15  ;;  %2027 = vmatprep.subr.mxu1 %v3319_v15 }
 0x195   :  { %3026 = vmatprep.mubr.msk.f32.mxu0 %vm729_vm2, %v4183_v2  ;;  %3034 = vmatprep.mubr.msk.f32.mxu1 %vm729_vm2, %v4183_v2  ;;  %v1851_v2 = vld [vmem:[%s5621_s4 + $0x288] sm:$0xff] }
 0x196   :  { %1899 = vmatpush1.msra.mxu0 %v1853_v31  ;;  %2028 = vmatpush1.msra.mxu1 %v2006_v40 }
 0x197   :  { %1900 = vmatprep.subr.mxu0 %v3319_v15  ;;  %2029 = vmatprep.subr.mxu1 %v3319_v15 }
 0x198   :  { %1901 = vmatpush1.msra.mxu0 %v1852_v41  ;;  %2030 = vmatpush1.msra.mxu1 %v2005_v42  ;;  %v2167_v41 = vld [vmem:[%s5621_s4 + $0x358] sm:$0xff] }
 0x199   :  { %1656 = vmatmul.mubr.f32.gmra.mxu0 %v4664_v43  ;;  %1785 = vmatmul.mubr.f32.gmra.mxu1 %v4664_v43  ;;  %v2320_v42 = vld [vmem:[%s5622_s5 + $0x358] sm:$0xff] }
 0x19a   :  { %1902 = vmatprep.subr.mxu0 %v3319_v15  ;;  %2031 = vmatprep.subr.mxu1 %v3319_v15 }
 0x19b   :  { %3027 = vmatprep.mubr.msk.f32.mxu0 %vm729_vm2, %v4224_v37  ;;  %3035 = vmatprep.mubr.msk.f32.mxu1 %vm729_vm2, %v4224_v37  ;;  %v1849_v37 = vld [vmem:[%s5621_s4 + $0x278] sm:$0xff] }
 0x19c   :  { %1903 = vmatpush1.msra.mxu0 %v1851_v2  ;;  %2032 = vmatpush1.msra.mxu1 %v2004_v44  ;;  %v4906_v2 = vld [vmem:[#allocation2 + $0x68] sm:$0xff]  ;;  %v2166_v44 = vld [vmem:[%s5621_s4 + $0x350] sm:$0xff] }
 0x19d   :  { %1904 = vmatprep.subr.mxu0 %v3319_v15  ;;  %2033 = vmatprep.subr.mxu1 %v3319_v15 }
 0x19e   :  { %1905 = vmatpush1.msra.mxu0 %v1850_v45  ;;  %2034 = vmatpush1.msra.mxu1 %v2003_v0  ;;  %v2319_v45 = vld [vmem:[%s5622_s5 + $0x350] sm:$0xff]  ;;  %v4920_v0 = vld [vmem:[#allocation2 + $0x60] sm:$0xff] }
 0x19f   :  { %1661 = vmatmul.mubr.f32.gmra.mxu0 %v4176_v52  ;;  %1790 = vmatmul.mubr.f32.gmra.mxu1 %v4176_v52  ;;  %v1848_v52 = vld [vmem:[%s5621_s4 + $0x270] sm:$0xff] }
 0x1a0   :  { %1906 = vmatprep.subr.mxu0 %v3319_v15  ;;  %2035 = vmatprep.subr.mxu1 %v3319_v15 }
 0x1a1   :  { %3028 = vmatprep.mubr.msk.f32.mxu0 %vm729_vm2, %v4264_v9  ;;  %3036 = vmatprep.mubr.msk.f32.mxu1 %vm729_vm2, %v4264_v9  ;;  %v1847_v9 = vld [vmem:[%s5621_s4 + $0x268] sm:$0xff] }
 0x1a2   :  { %1907 = vmatpush1.msra.mxu0 %v1849_v37  ;;  %2036 = vmatpush1.msra.mxu1 %v2002_v5 }
 0x1a3   :  { %1908 = vmatprep.subr.mxu0 %v3319_v15  ;;  %2037 = vmatprep.subr.mxu1 %v3319_v15 }
 0x1a4   :  { %1909 = vmatpush1.msra.mxu0 %v1848_v52  ;;  %2038 = vmatpush1.msra.mxu1 %v2001_v48  ;;  %v2165_v52 = vld [vmem:[%s5621_s4 + $0x348] sm:$0xff] }
 0x1a5   :  { %1666 = vmatmul.mubr.f32.gmra.mxu0 %v4217_v23  ;;  %1795 = vmatmul.mubr.f32.gmra.mxu1 %v4217_v23  ;;  %v1846_v23 = vld [vmem:[%s5621_s4 + $0x260] sm:$0xff]  ;;  %v2318_v48 = vld [vmem:[%s5622_s5 + $0x348] sm:$0xff] }
 0x1a6   :  { %1910 = vmatprep.subr.mxu0 %v3319_v15  ;;  %2039 = vmatprep.subr.mxu1 %v3319_v15 }
 0x1a7   :  { %3029 = vmatprep.mubr.msk.f32.mxu0 %vm729_vm2, %v4309_v35  ;;  %3037 = vmatprep.mubr.msk.f32.mxu1 %vm729_vm2, %v4309_v35  ;;  %v1845_v35 = vld [vmem:[%s5621_s4 + $0x258] sm:$0xff] }
 0x1a8   :  { %1911 = vmatpush1.msra.mxu0 %v1847_v9  ;;  %2040 = vmatpush1.msra.mxu1 %v2000_v51  ;;  %v4936_v9 = vld [vmem:[#allocation2 + $0x78] sm:$0xff] }
 0x1a9   :  { %1912 = vmatprep.subr.mxu0 %v3319_v15  ;;  %2041 = vmatprep.subr.mxu1 %v3319_v15 }
 0x1aa   :  { %1913 = vmatpush1.msra.mxu0 %v1846_v23  ;;  %2042 = vmatpush1.msra.mxu1 %v1999_v61  ;;  %v2164_v61 = vld [vmem:[%s5621_s4 + $0x340] sm:$0xff] }
 0x1ab   :  { %1671 = vmatmul.mubr.f32.gmra.mxu0 %v4255_v58  ;;  %1800 = vmatmul.mubr.f32.gmra.mxu1 %v4255_v58  ;;  %v1843_v58 = vld [vmem:[%s5621_s4 + $0x248] sm:$0xff] }
 0x1ac   :  { %1914 = vmatprep.subr.mxu0 %v3319_v15  ;;  %2043 = vmatprep.subr.mxu1 %v3319_v15 }
 0x1ad   :  { %1915 = vmatpush1.msra.mxu0 %v1845_v35  ;;  %2044 = vmatpush1.msra.mxu1 %v1998_v53  ;;  %v2317_v35 = vld [vmem:[%s5622_s5 + $0x340] sm:$0xff]  ;;  %v4950_v53 = vld [vmem:[#allocation2 + $0x70] sm:$0xff] }
 0x1ae   :  { %1916 = vmatprep.subr.mxu0 %v3319_v15  ;;  %2045 = vmatprep.subr.mxu1 %v3319_v15 }
 0x1af   :  { %3030 = vmatprep.mubr.msk.f32.mxu0 %vm729_vm2, %v4742_v29  ;;  %3038 = vmatprep.mubr.msk.f32.mxu1 %vm729_vm2, %v4742_v29 }
 0x1b0   :  { %1917 = vmatpush1.msra.mxu0 %v1844_v54  ;;  %2046 = vmatpush1.msra.mxu1 %v1997_v55  ;;  %v2163_v54 = vld [vmem:[%s5621_s4 + $0x338] sm:$0xff] }
 0x1b1   :  { %1676 = vmatmul.mubr.f32.gmra.mxu0 %v4296_v28  ;;  %1805 = vmatmul.mubr.f32.gmra.mxu1 %v4296_v28  ;;  %v1995_v28 = vld [vmem:[%s5622_s5 + $0x240] sm:$0xff]  ;;  %v2316_v55 = vld [vmem:[%s5622_s5 + $0x338] sm:$0xff] }
 0x1b2   :  { %1918 = vmatprep.subr.mxu0 %v3319_v15  ;;  %2047 = vmatprep.subr.mxu1 %v3319_v15 }
 0x1b3   :  { %1919 = vmatpush1.msra.mxu0 %v1843_v58  ;;  %3039 = vmatprep.mubr.msk.f32.mxu0 %vm729_vm2, %v1827_v56  ;;  %v4962_v58 = vld [vmem:[#allocation2 + $0x88] sm:$0xff] }
 0x1b4   :  { %2048 = vmatpush1.msra.mxu1 %v1996_v27  ;;  %3047 = vmatprep.mubr.msk.f32.mxu1 %vm729_vm2, %v1827_v56 }
 0x1b5   :  { %1920 = vmatprep.subr.mxu0 %v3319_v15  ;;  %2049 = vmatprep.subr.mxu1 %v3319_v15 }
 0x1b6   :  { %1921 = vmatpush1.msra.mxu0 %v1842_v57  ;;  %2050 = vmatpush1.msra.mxu1 %v1995_v28  ;;  %v2162_v57 = vld [vmem:[%s5621_s4 + $0x330] sm:$0xff] }
 0x1b7   :  { %1938 = vmatprep.subr.mxu0 %v3319_v15  ;;  %2067 = vmatprep.subr.mxu1 %v3319_v15  ;;  %v2315_v28 = vld [vmem:[%s5622_s5 + $0x330] sm:$0xff] }
 0x1b8   :  { %1939 = vmatpush2.msra.mxu0 %v1865_v59  ;;  %2068 = vmatpush2.msra.mxu1 %v2018_v62 }
 0x1b9   :  { %1940 = vmatprep.subr.mxu0 %v3319_v15  ;;  %2069 = vmatprep.subr.mxu1 %v3319_v15 }
 0x1ba   :  { %1941 = vmatpush2.msra.mxu0 %v1864_v63  ;;  %2070 = vmatpush2.msra.mxu1 %v2017_v1  ;;  %v4980_v63 = vld [vmem:[#allocation2 + $0x80] sm:$0xff]  ;;  %v2161_v1 = vld [vmem:[%s5621_s4 + $0x328] sm:$0xff] }
 0x1bb   :  { %1942 = vmatprep.subr.mxu0 %v3319_v15  ;;  %2071 = vmatprep.subr.mxu1 %v3319_v15 }
 0x1bc   :  { %1943 = vmatpush2.msra.mxu0 %v1863_v3  ;;  %2072 = vmatpush2.msra.mxu1 %v2016_v4  ;;  %v2314_v3 = vld [vmem:[%s5622_s5 + $0x328] sm:$0xff]  ;;  %v2160_v4 = vld [vmem:[%s5621_s4 + $0x320] sm:$0xff] }
 0x1bd   :  { %1944 = vmatprep.subr.mxu0 %v3319_v15  ;;  %2073 = vmatprep.subr.mxu1 %v3319_v15 }
 0x1be   :  { %1945 = vmatpush2.msra.mxu0 %v1862_v6  ;;  %2074 = vmatpush2.msra.mxu1 %v2015_v7  ;;  %v2313_v6 = vld [vmem:[%s5622_s5 + $0x320] sm:$0xff] }
 0x1bf   :  { %1946 = vmatprep.subr.mxu0 %v3319_v15  ;;  %2075 = vmatprep.subr.mxu1 %v3319_v15 }
 0x1c0   :  { %1947 = vmatpush2.msra.mxu0 %v1861_v46  ;;  %2076 = vmatpush2.msra.mxu1 %v2014_v8  ;;  %v2159_v8 = vld [vmem:[%s5621_s4 + $0x318] sm:$0xff] }
 0x1c1   :  { %1948 = vmatprep.subr.mxu0 %v3319_v15  ;;  %2077 = vmatprep.subr.mxu1 %v3319_v15 }
 0x1c2   :  { %1949 = vmatpush2.msra.mxu0 %v1860_v10  ;;  %2078 = vmatpush2.msra.mxu1 %v2013_v11  ;;  %v2312_v10 = vld [vmem:[%s5622_s5 + $0x318] sm:$0xff] }
 0x1c3   :  { %1950 = vmatprep.subr.mxu0 %v3319_v15  ;;  %2079 = vmatprep.subr.mxu1 %v3319_v15 }
 0x1c4   :  { %1951 = vmatpush2.msra.mxu0 %v1859_v50  ;;  %2080 = vmatpush2.msra.mxu1 %v2012_v12  ;;  %v5014_v12 = vld [vmem:[#allocation2 + $0x90] sm:$0xff] }
 0x1c5   :  { %1952 = vmatprep.subr.mxu0 %v3319_v15  ;;  %2081 = vmatprep.subr.mxu1 %v3319_v15 }
 0x1c6   :  { %1953 = vmatpush2.msra.mxu0 %v1858_v14  ;;  %2082 = vmatpush2.msra.mxu1 %v2011_v16  ;;  %v5020_v14 = vld [vmem:[#allocation2 + $0xa8] sm:$0xff]  ;;  %v2158_v16 = vld [vmem:[%s5621_s4 + $0x310] sm:$0xff] }
 0x1c7   :  { %1955 = vmatmul.mubr.f32.vlgmr.msra.gmra.mxu0 %v4616_v34  ;;  %2084 = vmatmul.mubr.f32.vlgmr.msra.gmra.mxu1 %v4616_v34  ;;  %v4878_v34 = vld [vmem:[#allocation2 + $0x58] sm:$0xff] }
 0x1c8   :  { %2204 = vmatprep.subr.mxu0 %v3319_v15  ;;  %2333 = vmatprep.subr.mxu1 %v3319_v15  ;;  %v4852_v24 = vpop.f32.mrf.mxu0  ;;  %v4854_v17 = vpop.f32.mrf.mxu1 }
 0x1c9   :  { %3040 = vmatprep.mubr.msk.f32.mxu0 %vm729_vm2, %v4850_v22  ;;  %3048 = vmatprep.mubr.msk.f32.mxu1 %vm729_vm2, %v4850_v22 }
 0x1ca   :  { %2205 = vmatpush1.msra.mxu0 %v2171_v20  ;;  %2334 = vmatpush1.msra.mxu1 %v2324_v21  ;;  %v1133_v30 = vpop.f32.mrf.mxu0  ;;  %v1262_v32 = vpop.f32.mrf.mxu1  ;;  %v2311_v20 = vld [vmem:[%s5622_s5 + $0x310] sm:$0xff]  ;;  %v2157_v21 = vld [vmem:[%s5621_s4 + $0x308] sm:$0xff] }
 0x1cb   :  { %2206 = vmatprep.subr.mxu0 %v3319_v15  ;;  %2335 = vmatprep.subr.mxu1 %v3319_v15  ;;  %v2310_v30 = vld [vmem:[%s5622_s5 + $0x308] sm:$0xff] }
 0x1cc   :  { %2207 = vmatpush1.msra.mxu0 %v2170_v25  ;;  %2336 = vmatpush1.msra.mxu1 %v2323_v26 }
 0x1cd   :  { %1960 = vmatmul.mubr.f32.gmra.mxu0 %v4640_v39  ;;  %2089 = vmatmul.mubr.f32.gmra.mxu1 %v4640_v39 }
 0x1ce   :  { %2208 = vmatprep.subr.mxu0 %v3319_v15  ;;  %2337 = vmatprep.subr.mxu1 %v3319_v15 }
 0x1cf   :  { %3041 = vmatprep.mubr.msk.f32.mxu0 %vm729_vm2, %v4878_v34  ;;  %3049 = vmatprep.mubr.msk.f32.mxu1 %vm729_vm2, %v4878_v34 }
 0x1d0   :  { %2209 = vmatpush1.msra.mxu0 %v2169_v47  ;;  %2338 = vmatpush1.msra.mxu1 %v2322_v33  ;;  %v4890_v18 = vpop.f32.mrf.mxu0  ;;  %v4892_v38 = vpop.f32.mrf.mxu1  ;;  %v2156_v33 = vld [vmem:[%s5621_s4 + $0x300] sm:$0xff] }
 0x1d1   :  { %2210 = vmatprep.subr.mxu0 %v3319_v15  ;;  %2339 = vmatprep.subr.mxu1 %v3319_v15 }
 0x1d2   :  { %2211 = vmatpush1.msra.mxu0 %v2168_v60  ;;  %2340 = vmatpush1.msra.mxu1 %v2321_v36  ;;  %v1138_v31 = vpop.f32.mrf.mxu0  ;;  %v1267_v40 = vpop.f32.mrf.mxu1  ;;  %v2179_v60 = vld [vmem:[%s5621_s4 + $0x3b8] sm:$0xff] }
 0x1d3   :  { %1965 = vmatmul.mubr.f32.gmra.mxu0 %v4664_v43  ;;  %2094 = vmatmul.mubr.f32.gmra.mxu1 %v4664_v43  ;;  %v2332_v36 = vld [vmem:[%s5622_s5 + $0x3b8] sm:$0xff]  ;;  %v2331_v31 = vld [vmem:[%s5622_s5 + $0x3b0] sm:$0xff] }
 0x1d4   :  { %2212 = vmatprep.subr.mxu0 %v3319_v15  ;;  %2341 = vmatprep.subr.mxu1 %v3319_v15 }
 0x1d5   :  { %3042 = vmatprep.mubr.msk.f32.mxu0 %vm729_vm2, %v4906_v2  ;;  %3050 = vmatprep.mubr.msk.f32.mxu1 %vm729_vm2, %v4906_v2 }
 0x1d6   :  { %2213 = vmatpush1.msra.mxu0 %v2167_v41  ;;  %2342 = vmatpush1.msra.mxu1 %v2320_v42  ;;  %v2177_v42 = vld [vmem:[%s5621_s4 + $0x3a8] sm:$0xff] }
 0x1d7   :  { %2214 = vmatprep.subr.mxu0 %v3319_v15  ;;  %2343 = vmatprep.subr.mxu1 %v3319_v15 }
 0x1d8   :  { %2215 = vmatpush1.msra.mxu0 %v2166_v44  ;;  %2344 = vmatpush1.msra.mxu1 %v2319_v45  ;;  %v4922_v37 = vpop.f32.mrf.mxu0  ;;  %v4924_v5 = vpop.f32.mrf.mxu1  ;;  %v2330_v44 = vld [vmem:[%s5622_s5 + $0x3a8] sm:$0xff] }
 0x1d9   :  { %1970 = vmatmul.mubr.f32.gmra.mxu0 %v4920_v0  ;;  %2099 = vmatmul.mubr.f32.gmra.mxu1 %v4920_v0 }
 0x1da   :  { %2216 = vmatprep.subr.mxu0 %v3319_v15  ;;  %2345 = vmatprep.subr.mxu1 %v3319_v15  ;;  %v1143_v51 = vpop.f32.mrf.mxu0  ;;  %v1272_v23 = vpop.f32.mrf.mxu1 }
 0x1db   :  { %3043 = vmatprep.mubr.msk.f32.mxu0 %vm729_vm2, %v4936_v9  ;;  %3051 = vmatprep.mubr.msk.f32.mxu1 %vm729_vm2, %v4936_v9  ;;  %v2329_v51 = vld [vmem:[%s5622_s5 + $0x3a0] sm:$0xff]  ;;  %v2175_v23 = vld [vmem:[%s5621_s4 + $0x398] sm:$0xff] }
 0x1dc   :  { %2217 = vmatpush1.msra.mxu0 %v2165_v52  ;;  %2346 = vmatpush1.msra.mxu1 %v2318_v48  ;;  %v2176_v48 = vld [vmem:[%s5621_s4 + $0x3a0] sm:$0xff] }
 0x1dd   :  { %2218 = vmatprep.subr.mxu0 %v3319_v15  ;;  %2347 = vmatprep.subr.mxu1 %v3319_v15 }
 0x1de   :  { %2219 = vmatpush1.msra.mxu0 %v2164_v61  ;;  %2348 = vmatpush1.msra.mxu1 %v2317_v35  ;;  %v2328_v61 = vld [vmem:[%s5622_s5 + $0x398] sm:$0xff]  ;;  %v2174_v35 = vld [vmem:[%s5621_s4 + $0x390] sm:$0xff] }
 0x1df   :  { %1975 = vmatmul.mubr.f32.gmra.mxu0 %v4950_v53  ;;  %2104 = vmatmul.mubr.f32.gmra.mxu1 %v4950_v53 }
 0x1e0   :  { %2220 = vmatprep.subr.mxu0 %v3319_v15  ;;  %2349 = vmatprep.subr.mxu1 %v3319_v15  ;;  %v4964_v27 = vpop.f32.mrf.mxu0  ;;  %v4966_v56 = vpop.f32.mrf.mxu1 }
 0x1e1   :  { %3044 = vmatprep.mubr.msk.f32.mxu0 %vm729_vm2, %v4962_v58  ;;  %3052 = vmatprep.mubr.msk.f32.mxu1 %vm729_vm2, %v4962_v58 }
 0x1e2   :  { %2221 = vmatpush1.msra.mxu0 %v2163_v54  ;;  %2350 = vmatpush1.msra.mxu1 %v2316_v55  ;;  %v1148_v59 = vpop.f32.mrf.mxu0  ;;  %v1277_v62 = vpop.f32.mrf.mxu1  ;;  %v2327_v54 = vld [vmem:[%s5622_s5 + $0x390] sm:$0xff]  ;;  %v2173_v55 = vld [vmem:[%s5621_s4 + $0x388] sm:$0xff] }
 0x1e3   :  { %2222 = vmatprep.subr.mxu0 %v3319_v15  ;;  %2351 = vmatprep.subr.mxu1 %v3319_v15  ;;  %v2172_v62 = vld [vmem:[%s5621_s4 + $0x380] sm:$0xff] }
 0x1e4   :  { %2223 = vmatpush1.msra.mxu0 %v2162_v57  ;;  %2352 = vmatpush1.msra.mxu1 %v2315_v28  ;;  %v2326_v57 = vld [vmem:[%s5622_s5 + $0x388] sm:$0xff] }
 0x1e5   :  { %1980 = vmatmul.mubr.f32.gmra.mxu0 %v4980_v63  ;;  %2109 = vmatmul.mubr.f32.gmra.mxu1 %v4980_v63 }
 0x1e6   :  { %2224 = vmatprep.subr.mxu0 %v3319_v15  ;;  %2353 = vmatprep.subr.mxu1 %v3319_v15 }
 0x1e7   :  { %3045 = vmatprep.mubr.msk.f32.mxu0 %vm729_vm2, %v4742_v29  ;;  %3053 = vmatprep.mubr.msk.f32.mxu1 %vm729_vm2, %v4742_v29 }
 0x1e8   :  { %2225 = vmatpush1.msra.mxu0 %v2161_v1  ;;  %2354 = vmatpush1.msra.mxu1 %v2314_v3  ;;  %v5002_v7 = vpop.f32.mrf.mxu0  ;;  %v5004_v46 = vpop.f32.mrf.mxu1  ;;  %v2325_v1 = vld [vmem:[%s5622_s5 + $0x380] sm:$0xff] }
 0x1e9   :  { %2226 = vmatprep.subr.mxu0 %v3319_v15  ;;  %2355 = vmatprep.subr.mxu1 %v3319_v15 }
 0x1ea   :  { %2227 = vmatpush1.msra.mxu0 %v2160_v4  ;;  %2356 = vmatpush1.msra.mxu1 %v2313_v6  ;;  %v1153_v11 = vpop.f32.mrf.mxu0  ;;  %v1282_v50 = vpop.f32.mrf.mxu1 }
 0x1eb   :  { %1985 = vmatmul.mubr.f32.gmra.mxu0 %v5014_v12  ;;  %2114 = vmatmul.mubr.f32.gmra.mxu1 %v5014_v12 }
 0x1ec   :  { %2228 = vmatprep.subr.mxu0 %v3319_v15  ;;  %2357 = vmatprep.subr.mxu1 %v3319_v15 }
 0x1ed   :  { %2229 = vmatpush1.msra.mxu0 %v2159_v8  ;;  %2358 = vmatpush1.msra.mxu1 %v2312_v10 }
 0x1ee   :  { %2230 = vmatprep.subr.mxu0 %v3319_v15  ;;  %2359 = vmatprep.subr.mxu1 %v3319_v15 }
 0x1ef   :  { %3046 = vmatprep.mubr.msk.f32.mxu0 %vm729_vm2, %v5020_v14  ;;  %3054 = vmatprep.mubr.msk.f32.mxu1 %vm729_vm2, %v5020_v14 }
 0x1f0   :  { %2231 = vmatpush1.msra.mxu0 %v2158_v16  ;;  %2360 = vmatpush1.msra.mxu1 %v2311_v20  ;;  %v5037_v25 = vpop.f32.mrf.mxu0  ;;  %v5039_v26 = vpop.f32.mrf.mxu1 }
 0x1f1   :  { %1990 = vmatmul.mubr.f32.gmra.mxu0 %v4417_v19  ;;  %2119 = vmatmul.mubr.f32.gmra.mxu1 %v4417_v19  ;;  %v2309_v19 = vld [vmem:[%s5622_s5 + $0x300] sm:$0xff] }
 0x1f2   :  { %2232 = vmatprep.subr.mxu0 %v3319_v15  ;;  %2361 = vmatprep.subr.mxu1 %v3319_v15  ;;  %v1158_v32 = vpop.f32.mrf.mxu0  ;;  %v1287_v47 = vpop.f32.mrf.mxu1 }
 0x1f3   :  { %2233 = vmatpush1.msra.mxu0 %v2157_v21  ;;  %3055 = vmatprep.mubr.msk.f32.mxu0 %vm729_vm2, %v4850_v22  ;;  %v2155_v32 = vld [vmem:[#allocation2 + $0xb8] sm:$0xff] }
 0x1f4   :  { %2362 = vmatpush1.msra.mxu1 %v2310_v30  ;;  %3063 = vmatprep.mubr.msk.f32.mxu1 %vm729_vm2, %v4850_v22  ;;  %v2178_v22 = vld [vmem:[%s5621_s4 + $0x3b0] sm:$0xff]  ;;  %v3318_v30 = vld [vmem:[#allocation2 + $0xa0] sm:$0xff] }
 0x1f5   :  { %2234 = vmatprep.subr.mxu0 %v3319_v15  ;;  %2363 = vmatprep.subr.mxu1 %v3319_v15 }
 0x1f6   :  { %2235 = vmatpush1.msra.mxu0 %v2156_v33  ;;  %2364 = vmatpush1.msra.mxu1 %v2309_v19 }
 0x1f7   :  { %2252 = vmatprep.subr.mxu0 %v3319_v15  ;;  %2381 = vmatprep.subr.mxu1 %v3319_v15 }
 0x1f8   :  { %2253 = vmatpush2.msra.mxu0 %v2179_v60  ;;  %2382 = vmatpush2.msra.mxu1 %v2332_v36  ;;  %v5074_v40 = vpop.f32.mrf.mxu0  ;;  %v5076_v41 = vpop.f32.mrf.mxu1 }
 0x1f9   :  { %2254 = vmatprep.subr.mxu0 %v3319_v15  ;;  %2383 = vmatprep.subr.mxu1 %v3319_v15 }
 0x1fa   :  { %2255 = vmatpush2.msra.mxu0 %v2178_v22  ;;  %2384 = vmatpush2.msra.mxu1 %v2331_v31  ;;  %v1163_v45 = vpop.f32.mrf.mxu0  ;;  %v1292_v52 = vpop.f32.mrf.mxu1 }
 0x1fb   :  { %2256 = vmatprep.subr.mxu0 %v3319_v15  ;;  %2385 = vmatprep.subr.mxu1 %v3319_v15 }
 0x1fc   :  { %2257 = vmatpush2.msra.mxu0 %v2177_v42  ;;  %2386 = vmatpush2.msra.mxu1 %v2330_v44 }
 0x1fd   :  { %2258 = vmatprep.subr.mxu0 %v3319_v15  ;;  %2387 = vmatprep.subr.mxu1 %v3319_v15 }
 0x1fe   :  { %2259 = vmatpush2.msra.mxu0 %v2176_v48  ;;  %2388 = vmatpush2.msra.mxu1 %v2329_v51  ;;  %v2487_v51 = vld [vmem:[%s5624_s7 + $0x78] sm:$0xff] }
 0x1ff   :  { %2260 = vmatprep.subr.mxu0 %v3319_v15  ;;  %2389 = vmatprep.subr.mxu1 %v3319_v15 }
 0x200   :  { %2261 = vmatpush2.msra.mxu0 %v2175_v23  ;;  %2390 = vmatpush2.msra.mxu1 %v2328_v61  ;;  %v2506_v61 = vld [vmem:[%s5624_s7 + $0xf8] sm:$0xff] }
 0x201   :  { %2262 = vmatprep.subr.mxu0 %v3319_v15  ;;  %2391 = vmatprep.subr.mxu1 %v3319_v15 }
 0x202   :  { %2263 = vmatpush2.msra.mxu0 %v2174_v35  ;;  %2392 = vmatpush2.msra.mxu1 %v2327_v54  ;;  %v5118_v28 = vpop.f32.mrf.mxu0  ;;  %v5120_v59 = vpop.f32.mrf.mxu1  ;;  %v2485_v35 = vld [vmem:[%s5624_s7 + $0x68] sm:$0xff]  ;;  %v2505_v54 = vld [vmem:[%s5624_s7 + $0xf0] sm:$0xff] }
 0x203   :  { %2264 = vmatprep.subr.mxu0 %v3319_v15  ;;  %2393 = vmatprep.subr.mxu1 %v3319_v15 }
 0x204   :  { %2265 = vmatpush2.msra.mxu0 %v2173_v55  ;;  %2394 = vmatpush2.msra.mxu1 %v2326_v57  ;;  %v1168_v3 = vpop.f32.mrf.mxu0  ;;  %v1297_v4 = vpop.f32.mrf.mxu1  ;;  %v2504_v55 = vld [vmem:[%s5624_s7 + $0xe8] sm:$0xff]  ;;  %v2484_v57 = vld [vmem:[%s5624_s7 + $0x60] sm:$0xff] }
 0x205   :  { %2266 = vmatprep.subr.mxu0 %v3319_v15  ;;  %2395 = vmatprep.subr.mxu1 %v3319_v15  ;;  %v2481_v3 = vld [vmem:[%s5624_s7 + $0x48] sm:$0xff]  ;;  %v2480_v4 = vld [vmem:[%s5624_s7 + $0x40] sm:$0xff] }
 0x206   :  { %2267 = vmatpush2.msra.mxu0 %v2172_v62  ;;  %2396 = vmatpush2.msra.mxu1 %v2325_v1  ;;  %v2502_v62 = vld [vmem:[%s5624_s7 + $0xd8] sm:$0xff]  ;;  %v2482_v1 = vld [vmem:[%s5624_s7 + $0x50] sm:$0xff] }
 0x207   :  { %2269 = vmatmul.mubr.f32.vlgmr.msra.gmra.mxu0 %v4640_v39  ;;  %2398 = vmatmul.mubr.f32.vlgmr.msra.gmra.mxu1 %v4640_v39 }
 0x208   :  { %3056 = vmatprep.mubr.msk.f32.mxu0 %vm729_vm2, %v4878_v34  ;;  %3064 = vmatprep.mubr.msk.f32.mxu1 %vm729_vm2, %v4878_v34  ;;  %v1368_v6 = vpop.f32.mrf.mxu0  ;;  %v1473_v8 = vpop.f32.mrf.mxu1 }
 0x209   :  { %v5139_v10 = vadd.f32 %v1368_v6, %v4852_v24  ;;  %v5142_v11 = vadd.f32 %v1473_v8, %v4854_v17  ;;  %3187 = vmatprep.subr.mxu1 %v3319_v15  ;;  %3152 = vmatprep.subr.mxu0 %v3319_v15  ;;  %v2479_v6 = vld [vmem:[%s5624_s7 + $0x38] sm:$0xff] }
 0x20a   :  { %v1370_v50 = vpop.f32.mrf.mxu0  ;;  %v1475_v39 = vpop.f32.mrf.mxu1  ;;  %3188 = vmatpush3.msra.mxu1 %v2487_v51  ;;  %3153 = vmatpush3.msra.mxu0 %v2506_v61  ;;  %v2491_v61 = vld [vmem:[%s5624_s7 + $0x80] sm:$0xff] }
 0x20b   :  { %2274 = vmatmul.mubr.f32.gmra.mxu0 %v4664_v43  ;;  %2403 = vmatmul.mubr.f32.gmra.mxu1 %v4664_v43  ;;  %v2501_v39 = vld [vmem:[%s5624_s7 + $0xd0] sm:$0xff] }
 0x20c   :  { %3057 = vmatprep.mubr.msk.f32.mxu0 %vm729_vm2, %v4906_v2  ;;  %3065 = vmatprep.mubr.msk.f32.mxu1 %vm729_vm2, %v4906_v2 }
 0x20d   :  { %3189 = vmatprep.subr.mxu1 %v3319_v15  ;;  %3154 = vmatprep.subr.mxu0 %v3319_v15 }
 0x20e   :  { %v1373_v24 = vpop.f32.mrf.mxu0  ;;  %v1478_v34 = vpop.f32.mrf.mxu1  ;;  %3155 = vmatpush3.msra.mxu0 %v2505_v54 }
 0x20f   :  { %2279 = vmatmul.mubr.f32.gmra.mxu0 %v4920_v0  ;;  %2408 = vmatmul.mubr.f32.gmra.mxu1 %v4920_v0  ;;  %v5155_v17 = vadd.f32 %v1373_v24, %v4890_v18  ;;  %v5158_v16 = vadd.f32 %v1478_v34, %v4892_v38  ;;  %v2478_v24 = vld [vmem:[%s5624_s7 + $0x30] sm:$0xff] }
 0x210   :  { %3058 = vmatprep.mubr.msk.f32.mxu0 %vm729_vm2, %v4936_v9  ;;  %3066 = vmatprep.mubr.msk.f32.mxu1 %vm729_vm2, %v4936_v9  ;;  %v1375_v43 = vpop.f32.mrf.mxu0  ;;  %v1480_v2 = vpop.f32.mrf.mxu1 }
 0x211   :  { %3156 = vmatprep.subr.mxu0 %v3319_v15 }
 0x212   :  { %3157 = vmatpush3.msra.mxu0 %v2504_v55 }
 0x213   :  { %2284 = vmatmul.mubr.f32.gmra.mxu0 %v4950_v53  ;;  %2413 = vmatmul.mubr.f32.gmra.mxu1 %v4950_v53 }
 0x214   :  { %3059 = vmatprep.mubr.msk.f32.mxu0 %vm729_vm2, %v4962_v58  ;;  %3067 = vmatprep.mubr.msk.f32.mxu1 %vm729_vm2, %v4962_v58  ;;  %v1378_v18 = vpop.f32.mrf.mxu0  ;;  %v1483_v38 = vpop.f32.mrf.mxu1 }
 0x215   :  { %v5171_v0 = vadd.f32 %v1378_v18, %v4922_v37  ;;  %v5174_v20 = vadd.f32 %v1483_v38, %v4924_v5  ;;  %3158 = vmatprep.subr.mxu0 %v3319_v15  ;;  %v2500_v38 = vld [vmem:[%s5624_s7 + $0xc8] sm:$0xff] }
 0x216   :  { %v1380_v9 = vpop.f32.mrf.mxu0  ;;  %v1485_v21 = vpop.f32.mrf.mxu1 }
 0x217   :  { %2289 = vmatmul.mubr.f32.gmra.mxu0 %v4980_v63  ;;  %2418 = vmatmul.mubr.f32.gmra.mxu1 %v4980_v63  ;;  %v2476_v9 = vld [vmem:[%s5624_s7 + $0x20] sm:$0xff] }
 0x218   :  { %3060 = vmatprep.mubr.msk.f32.mxu0 %vm729_vm2, %v4742_v29  ;;  %3068 = vmatprep.mubr.msk.f32.mxu1 %vm729_vm2, %v4742_v29 }
 0x21a   :  { %v1383_v53 = vpop.f32.mrf.mxu0  ;;  %v1488_v58 = vpop.f32.mrf.mxu1 }
 0x21b   :  { %2294 = vmatmul.mubr.f32.gmra.mxu0 %v5014_v12  ;;  %2423 = vmatmul.mubr.f32.gmra.mxu1 %v5014_v12  ;;  %v5185_v37 = vadd.f32 %v1383_v53, %v4964_v27  ;;  %v5188_v5 = vadd.f32 %v1488_v58, %v4966_v56  ;;  %v2498_v58 = vld [vmem:[%s5624_s7 + $0xb8] sm:$0xff] }
 0x21c   :  { %3061 = vmatprep.mubr.msk.f32.mxu0 %vm729_vm2, %v5020_v14  ;;  %3069 = vmatprep.mubr.msk.f32.mxu1 %vm729_vm2, %v5020_v14  ;;  %v1385_v63 = vpop.f32.mrf.mxu0  ;;  %v1490_v29 = vpop.f32.mrf.mxu1 }
 0x21d   :  { %v2475_v63 = vld [vmem:[%s5624_s7 + $0x18] sm:$0xff] }
 0x21f   :  { %2299 = vmatmul.mubr.f32.gmra.mxu0 %v3318_v30  ;;  %2428 = vmatmul.mubr.f32.gmra.mxu1 %v3318_v30 }
 0x220   :  { %3062 = vmatprep.mubr.msk.f32.mxu0 %vm729_vm2, %v2155_v32  ;;  %3070 = vmatprep.mubr.msk.f32.mxu1 %vm729_vm2, %v2155_v32  ;;  %v1388_v27 = vpop.f32.mrf.mxu0  ;;  %v1493_v12 = vpop.f32.mrf.mxu1 }
 0x221   :  { %v5197_v56 = vadd.f32 %v1388_v27, %v5002_v7  ;;  %v5200_v47 = vadd.f32 %v1493_v12, %v5004_v46  ;;  %v2497_v12 = vld [vmem:[%s5624_s7 + $0xb0] sm:$0xff] }
 0x222   :  { %v1390_v33 = vpop.f32.mrf.mxu0  ;;  %v1495_v14 = vpop.f32.mrf.mxu1 }
 0x223   :  { %2304 = vmatmul.mubr.f32.gmra.mxu0 %v947_v13  ;;  %2433 = vmatmul.mubr.f32.gmra.mxu1 %v947_v13  ;;  %v2473_v33 = vld [vmem:[%s5624_s7 + $0x8] sm:$0xff] }
 0x224   :  { %3219 = vmatprep.mubr.msk.f32.mxu1 %vm3320_vm3, %v3319_v15  ;;  %3184 = vmatprep.mubr.msk.f32.mxu0 %vm3320_vm3, %v3319_v15 }
 0x226   :  { %v1393_v19 = vpop.f32.mrf.mxu0  ;;  %v1498_v60 = vpop.f32.mrf.mxu1 }
 0x227   :  { %v5207_v36 = vadd.f32 %v1393_v19, %v5037_v25  ;;  %v5210_v22 = vadd.f32 %v1498_v60, %v5039_v26  ;;  %v2495_v60 = vld [vmem:[%s5624_s7 + $0xa0] sm:$0xff] }
 0x228   :  { %v1395_v7 = vpop.f32.mrf.mxu0  ;;  %v1500_v31 = vpop.f32.mrf.mxu1 }
 0x229   :  { %v2472_v7 = vld [vmem:[%s5624_s7] sm:$0xff] }
 0x22c   :  { %v1398_v46 = vpop.f32.mrf.mxu0  ;;  %v1503_v42 = vpop.f32.mrf.mxu1 }
 0x22d   :  { %v5213_v44 = vadd.f32 %v1398_v46, %v5074_v40  ;;  %v5216_v45 = vadd.f32 %v1503_v42, %v5076_v41  ;;  %v2486_v40 = vld [vmem:[%s5624_s7 + $0x70] sm:$0xff] }
 0x22e   :  { %v1400_v49 = vpop.f32.mrf.mxu0  ;;  %v1505_v13 = vpop.f32.mrf.mxu1  ;;  %3190 = vmatpush3.msra.mxu1 %v2486_v40  ;;  %v2492_v40 = vld [vmem:[%s5624_s7 + $0x88] sm:$0xff] }
 0x22f   :  { %3191 = vmatprep.subr.mxu1 %v3319_v15  ;;  %v2494_v13 = vld [vmem:[%s5624_s7 + $0x98] sm:$0xff] }
 0x230   :  { %3192 = vmatpush3.msra.mxu1 %v2485_v35 }
 0x231   :  { %3193 = vmatprep.subr.mxu1 %v3319_v15 }
 0x232   :  { %v1403_v52 = vpop.f32.mrf.mxu0  ;;  %v1508_v48 = vpop.f32.mrf.mxu1  ;;  %3194 = vmatpush3.msra.mxu1 %v2484_v57 }
 0x233   :  { %v5219_v25 = vadd.f32 %v1403_v52, %v5118_v28  ;;  %v5222_v26 = vadd.f32 %v1508_v48, %v5120_v59  ;;  %v2503_v28 = vld [vmem:[%s5624_s7 + $0xe0] sm:$0xff]  ;;  %v2483_v59 = vld [vmem:[%s5624_s7 + $0x58] sm:$0xff]  ;;  %3195 = vmatprep.subr.mxu1 %v3319_v15 }
 0x234   :  { %v1405_v41 = vpop.f32.mrf.mxu0  ;;  %v1510_v23 = vpop.f32.mrf.mxu1  ;;  %3159 = vmatpush3.msra.mxu0 %v2503_v28  ;;  %3196 = vmatpush3.msra.mxu1 %v2483_v59 }
 0x235   :  { %3160 = vmatprep.subr.mxu0 %v3319_v15  ;;  %3197 = vmatprep.subr.mxu1 %v3319_v15 }
 0x236   :  { %3161 = vmatpush3.msra.mxu0 %v2502_v62  ;;  %3198 = vmatpush3.msra.mxu1 %v2482_v1 }
 0x237   :  { %3162 = vmatprep.subr.mxu0 %v3319_v15  ;;  %3199 = vmatprep.subr.mxu1 %v3319_v15 }
 0x238   :  { %3200 = vmatpush3.msra.mxu1 %v2481_v3  ;;  %3163 = vmatpush3.msra.mxu0 %v2501_v39 }
 0x239   :  { %3201 = vmatprep.subr.mxu1 %v3319_v15  ;;  %3164 = vmatprep.subr.mxu0 %v3319_v15 }
 0x23a   :  { %3202 = vmatpush3.msra.mxu1 %v2480_v4  ;;  %3165 = vmatpush3.msra.mxu0 %v2500_v38 }
 0x23b   :  { %3203 = vmatprep.subr.mxu1 %v3319_v15  ;;  %3166 = vmatprep.subr.mxu0 %v3319_v15 }
 0x23c   :  { %3204 = vmatpush3.msra.mxu1 %v2479_v6 }
 0x23d   :  { %3205 = vmatprep.subr.mxu1 %v3319_v15 }
 0x23e   :  { %3206 = vmatpush3.msra.mxu1 %v2478_v24 }
 0x23f   :  { %3207 = vmatprep.subr.mxu1 %v3319_v15 }
 0x247   :  { %v1642_v8 = vpop.f32.mrf.mxu0  ;;  %v1771_v50 = vpop.f32.mrf.mxu1 }
 0x248   :  { %v5287_v34 = vadd.f32 %v1642_v8, %v5139_v10  ;;  %v5290_v43 = vadd.f32 %v1771_v50, %v5142_v11  ;;  %v2477_v10 = vld [vmem:[%s5624_s7 + $0x28] sm:$0xff]  ;;  %v2499_v11 = vld [vmem:[%s5624_s7 + $0xc0] sm:$0xff] }
 0x249   :  { %v1644_v2 = vpop.f32.mrf.mxu0  ;;  %v1773_v18 = vpop.f32.mrf.mxu1  ;;  %3208 = vmatpush3.msra.mxu1 %v2477_v10  ;;  %3167 = vmatpush3.msra.mxu0 %v2499_v11 }
 0x24a   :  { %3209 = vmatprep.subr.mxu1 %v3319_v15  ;;  %3168 = vmatprep.subr.mxu0 %v3319_v15 }
 0x24b   :  { %3210 = vmatpush3.msra.mxu1 %v2476_v9  ;;  %3169 = vmatpush3.msra.mxu0 %v2498_v58 }
 0x24c   :  { %3211 = vmatprep.subr.mxu1 %v3319_v15  ;;  %3170 = vmatprep.subr.mxu0 %v3319_v15 }
 0x24d   :  { %v1647_v21 = vpop.f32.mrf.mxu0  ;;  %v1776_v53 = vpop.f32.mrf.mxu1  ;;  %3212 = vmatpush3.msra.mxu1 %v2475_v63  ;;  %3171 = vmatpush3.msra.mxu0 %v2497_v12 }
 0x24e   :  { %v5317_v29 = vadd.f32 %v1647_v21, %v5155_v17  ;;  %v5320_v30 = vadd.f32 %v1776_v53, %v5158_v16  ;;  %3213 = vmatprep.subr.mxu1 %v3319_v15  ;;  %v2474_v17 = vld [vmem:[%s5624_s7 + $0x10] sm:$0xff]  ;;  %3172 = vmatprep.subr.mxu0 %v3319_v15  ;;  %v2496_v16 = vld [vmem:[%s5624_s7 + $0xa8] sm:$0xff] }
 0x24f   :  { %v1649_v32 = vpop.f32.mrf.mxu0  ;;  %v1778_v27 = vpop.f32.mrf.mxu1  ;;  %3214 = vmatpush3.msra.mxu1 %v2474_v17  ;;  %3173 = vmatpush3.msra.mxu0 %v2496_v16 }
 0x250   :  { %3215 = vmatprep.subr.mxu1 %v3319_v15  ;;  %3174 = vmatprep.subr.mxu0 %v3319_v15 }
 0x251   :  { %3216 = vmatpush3.msra.mxu1 %v2473_v33  ;;  %3175 = vmatpush3.msra.mxu0 %v2495_v60 }
 0x252   :  { %3217 = vmatprep.subr.mxu1 %v3319_v15  ;;  %3176 = vmatprep.subr.mxu0 %v3319_v15 }
 0x253   :  { %v1652_v14 = vpop.f32.mrf.mxu0  ;;  %v1781_v19 = vpop.f32.mrf.mxu1  ;;  %3218 = vmatpush3.msra.mxu1 %v2472_v7  ;;  %3177 = vmatpush3.msra.mxu0 %v2494_v13 }
 0x254   :  { %v5347_v31 = vadd.f32 %v1652_v14, %v5171_v0  ;;  %v5350_v46 = vadd.f32 %v1781_v19, %v5174_v20  ;;  %3257 = vmatprep.subr.mxu1 %v3319_v15  ;;  %3178 = vmatprep.subr.mxu0 %v3319_v15  ;;  %v2493_v0 = vld [vmem:[%s5624_s7 + $0x90] sm:$0xff] }
 0x255   :  { %v1654_v42 = vpop.f32.mrf.mxu0  ;;  %v1783_v49 = vpop.f32.mrf.mxu1  ;;  %3179 = vmatpush3.msra.mxu0 %v2493_v0 }
 0x256   :  { %3180 = vmatprep.subr.mxu0 %v3319_v15 }
 0x257   :  { %3181 = vmatpush3.msra.mxu0 %v2492_v40 }
 0x258   :  { %3182 = vmatprep.subr.mxu0 %v3319_v15 }
 0x259   :  { %v1657_v20 = vpop.f32.mrf.mxu0  ;;  %v1786_v52 = vpop.f32.mrf.mxu1  ;;  %3183 = vmatpush3.msra.mxu0 %v2491_v61 }
 0x25a   :  { %v5366_v48 = vadd.f32 %v1657_v20, %v5185_v37  ;;  %v5369_v51 = vadd.f32 %v1786_v52, %v5188_v5  ;;  %3222 = vmatprep.subr.mxu0 %v3319_v15 }
 0x25b   :  { %v1659_v41 = vpop.f32.mrf.mxu0  ;;  %v1788_v23 = vpop.f32.mrf.mxu1 }
 0x25f   :  { %v1662_v37 = vpop.f32.mrf.mxu0  ;;  %v1791_v5 = vpop.f32.mrf.mxu1 }
 0x260   :  { %v1814_v35 = vadd.f32 %v1662_v37, %v5197_v56  ;;  %v1822_v54 = vadd.f32 %v1791_v5, %v5200_v47 }
 0x261   :  { %v1664_v55 = vpop.f32.mrf.mxu0  ;;  %v1793_v57 = vpop.f32.mrf.mxu1 }
 0x265   :  { %v1667_v28 = vpop.f32.mrf.mxu0  ;;  %v1796_v59 = vpop.f32.mrf.mxu1 }
 0x266   :  { %v1815_v62 = vadd.f32 %v1667_v28, %v5207_v36  ;;  %v1823_v1 = vadd.f32 %v1796_v59, %v5210_v22 }
 0x267   :  { %v1669_v3 = vpop.f32.mrf.mxu0  ;;  %v1798_v4 = vpop.f32.mrf.mxu1 }
 0x26b   :  { %v1672_v6 = vpop.f32.mrf.mxu0  ;;  %v1801_v8 = vpop.f32.mrf.mxu1 }
 0x26c   :  { %v5385_v50 = vadd.f32 %v1672_v6, %v5213_v44  ;;  %v5388_v39 = vadd.f32 %v1801_v8, %v5216_v45 }
 0x26d   :  { %v1674_v56 = vpop.f32.mrf.mxu0  ;;  %v1803_v47 = vpop.f32.mrf.mxu1 }
 0x271   :  { %v1677_v24 = vpop.f32.mrf.mxu0  ;;  %v1806_v2 = vpop.f32.mrf.mxu1 }
 0x272   :  { %v5391_v18 = vadd.f32 %v1677_v24, %v5219_v25  ;;  %v5394_v36 = vadd.f32 %v1806_v2, %v5222_v26 }
 0x273   :  { %v1679_v22 = vpop.f32.mrf.mxu0  ;;  %v1808_v38 = vpop.f32.mrf.mxu1 }
 0x287   :  { %v1956_v10 = vpop.f32.mrf.mxu0  ;;  %v2085_v11 = vpop.f32.mrf.mxu1 }
 0x288   :  { %v2124_v44 = vadd.f32 %v1956_v10, %v5287_v34  ;;  %v2132_v9 = vadd.f32 %v2085_v11, %v5290_v43 }
 0x289   :  { %v1958_v45 = vpop.f32.mrf.mxu0  ;;  %v2087_v21 = vpop.f32.mrf.mxu1 }
 0x28d   :  { %v1961_v53 = vpop.f32.mrf.mxu0  ;;  %v2090_v58 = vpop.f32.mrf.mxu1 }
 0x28e   :  { %v2125_v4 = vadd.f32 %v1961_v53, %v5317_v29  ;;  %v2133_v6 = vadd.f32 %v2090_v58, %v5320_v30 }
 0x28f   :  { %v1963_v63 = vpop.f32.mrf.mxu0  ;;  %v2092_v32 = vpop.f32.mrf.mxu1 }
 0x293   :  { %v1966_v27 = vpop.f32.mrf.mxu0  ;;  %v2095_v25 = vpop.f32.mrf.mxu1 }
 0x294   :  { %v2126_v10 = vadd.f32 %v1966_v27, %v5347_v31  ;;  %v2134_v11 = vadd.f32 %v2095_v25, %v5350_v46 }
 0x295   :  { %v1968_v12 = vpop.f32.mrf.mxu0  ;;  %v2097_v17 = vpop.f32.mrf.mxu1 }
 0x299   :  { %v1971_v26 = vpop.f32.mrf.mxu0  ;;  %v2100_v16 = vpop.f32.mrf.mxu1 }
 0x29a   :  { %v2127_v32 = vadd.f32 %v1971_v26, %v5366_v48  ;;  %v2135_v12 = vadd.f32 %v2100_v16, %v5369_v51  ;;  %v2754_v48 = vld [vmem:[%s5624_s7 + $0x1f0] sm:$0xff] }
 0x29b   :  { %v1973_v33 = vpop.f32.mrf.mxu0  ;;  %v2102_v14 = vpop.f32.mrf.mxu1 }
 0x29f   :  { %v1976_v19 = vpop.f32.mrf.mxu0  ;;  %v2105_v60 = vpop.f32.mrf.mxu1 }
 0x2a0   :  { %v5398_v7 = vadd.f32 %v1976_v19, %v1814_v35  ;;  %v5400_v34 = vadd.f32 %v2105_v60, %v1822_v54  ;;  %v2755_v19 = vld [vmem:[%s5624_s7 + $0x1f8] sm:$0xff] }
 0x2a1   :  { %v1978_v43 = vpop.f32.mrf.mxu0  ;;  %v2107_v42 = vpop.f32.mrf.mxu1 }
 0x2a5   :  { %v1981_v49 = vpop.f32.mrf.mxu0  ;;  %v2110_v13 = vpop.f32.mrf.mxu1 }
 0x2a6   :  { %v5402_v0 = vadd.f32 %v1981_v49, %v1815_v62  ;;  %v5404_v20 = vadd.f32 %v2110_v13, %v1823_v1 }
 0x2a7   :  { %v1983_v52 = vpop.f32.mrf.mxu0  ;;  %v2112_v40 = vpop.f32.mrf.mxu1 }
 0x2a8   :  { %v2753_v52 = vld [vmem:[%s5624_s7 + $0x1e8] sm:$0xff] }
 0x2ab   :  { %v5406_v41 = vpop.f32.mrf.mxu0  ;;  %v5408_v23 = vpop.f32.mrf.mxu1 }
 0x2ad   :  { %v1988_v61 = vpop.f32.mrf.mxu0  ;;  %v2117_v37 = vpop.f32.mrf.mxu1 }
 0x2b1   :  { %v5410_v5 = vpop.f32.mrf.mxu0  ;;  %v5412_v35 = vpop.f32.mrf.mxu1 }
 0x2b3   :  { %v1993_v54 = vpop.f32.mrf.mxu0  ;;  %v2122_v55 = vpop.f32.mrf.mxu1 }
 0x2c7   :  { %v2270_v57 = vpop.f32.mrf.mxu0  ;;  %v2399_v28 = vpop.f32.mrf.mxu1 }
 0x2c8   :  { %v2438_v59 = vadd.f32 %v2270_v57, %v2124_v44  ;;  %v2446_v62 = vadd.f32 %v2399_v28, %v2132_v9  ;;  %v5421_v44 = vld [vmem:[%s5625_s6] ss:$0 sm:$0xff] }
 0x2c9   :  { %v2272_v1 = vpop.f32.mrf.mxu0  ;;  %v2401_v3 = vpop.f32.mrf.mxu1 }
 0x2ca   :  { %v2454_v8 = vmax.f32 %v2438_v59, %v2446_v62  ;;  %v2665_v62 = vld [vmem:[%s5624_s7 + $0x178] sm:$0xff] }
 0x2cb   :  { %v2275_v56 = vpop.f32.mrf.mxu0  ;;  %v2404_v47 = vpop.f32.mrf.mxu1  ;;  %v2751_v1 = vld [vmem:[%s5624_s7 + $0x1d8] sm:$0xff] }
 0x2cc   :  { %v2439_v24 = vadd.f32 %v2275_v56, %v2125_v4  ;;  %v2447_v2 = vadd.f32 %v2404_v47, %v2133_v6  ;;  %v2130_v6 = vadd.f32 %v5406_v41, %v5385_v50  ;;  %v2750_v56 = vld [vmem:[%s5624_s7 + $0x1d0] sm:$0xff] }
 0x2cd   :  { %v2277_v22 = vpop.f32.mrf.mxu0  ;;  %v2406_v38 = vpop.f32.mrf.mxu1 }
 0x2ce   :  { %v2455_v45 = vmax.f32 %v2439_v24, %v2447_v2  ;;  %v2749_v2 = vld [vmem:[%s5624_s7 + $0x1c8] sm:$0xff] }
 0x2cf   :  { %v2280_v29 = vpop.f32.mrf.mxu0  ;;  %v2409_v9 = vpop.f32.mrf.mxu1 }
 0x2d0   :  { %v2462_v30 = vmax.f32 %v2454_v8, %v2455_v45  ;;  %v2440_v21 = vadd.f32 %v2280_v29, %v2126_v10  ;;  %v2448_v53 = vadd.f32 %v2409_v9, %v2134_v11  ;;  %v2664_v8 = vld [vmem:[%s5624_s7 + $0x170] sm:$0xff]  ;;  %v2131_v10 = vadd.f32 %v5410_v5, %v5391_v18  ;;  %v2662_v29 = vld [vmem:[%s5624_s7 + $0x160] sm:$0xff] }
 0x2d1   :  { %v2282_v58 = vpop.f32.mrf.mxu0  ;;  %v2411_v63 = vpop.f32.mrf.mxu1  ;;  %v2139_v11 = vadd.f32 %v5412_v35, %v5394_v36  ;;  %v2748_v9 = vld [vmem:[%s5624_s7 + $0x1c0] sm:$0xff]  ;;  %v2661_v36 = vld [vmem:[%s5624_s7 + $0x158] sm:$0xff] }
 0x2d2   :  { %v2470_v31 = vadd.f32 %v5421_v44, %v2462_v30  ;;  %v2456_v46 = vmax.f32 %v2440_v21, %v2448_v53  ;;  %v2747_v35 = vld [vmem:[%s5624_s7 + $0x1b8] sm:$0xff] }
 0x2d3   :  { %v2285_v27 = vpop.f32.mrf.mxu0  ;;  %v2414_v25 = vpop.f32.mrf.mxu1 }
 0x2d4   :  { %v2471_v17 = vmax.f32 %v2470_v31, 0.0  ;;  %v2441_v33 = vadd.f32 %v2285_v27, %v2127_v32  ;;  %v2449_v14 = vadd.f32 %v2414_v25, %v2135_v12  ;;  %v2660_v32 = vld [vmem:[%s5624_s7 + $0x150] sm:$0xff]  ;;  %v2745_v27 = vld [vmem:[%s5624_s7 + $0x1a8] sm:$0xff]  ;;  %v2658_v25 = vld [vmem:[%s5624_s7 + $0x140] sm:$0xff] }
 0x2d5   :  { %v2287_v60 = vpop.f32.mrf.mxu0  ;;  %v2416_v43 = vpop.f32.mrf.mxu1  ;;  %v2746_v12 = vld [vmem:[%s5624_s7 + $0x1b0] sm:$0xff] }
 0x2d6   :  { %v2457_v42 = vmax.f32 %v2441_v33, %v2449_v14  ;;  %3220 = vmatmul.mubr.f32.vlgmr.msra.gmra.mxu1 %v2471_v17  ;;  %v2744_v17 = vld [vmem:[%s5624_s7 + $0x1a0] sm:$0xff]  ;;  %v2657_v33 = vld [vmem:[%s5624_s7 + $0x138] sm:$0xff]  ;;  %v2742_v60 = vld [vmem:[%s5624_s7 + $0x190] sm:$0xff] }
 0x2d7   :  { %3258 = vmatpush3.msra.mxu1 %v2755_v19  ;;  %v2290_v51 = vpop.f32.mrf.mxu0  ;;  %v2419_v26 = vpop.f32.mrf.mxu1  ;;  %3289 = vmatprep.mubr.msk.f32.mxu1 %vm3320_vm3, %v3319_v15  ;;  %v2743_v14 = vld [vmem:[%s5624_s7 + $0x198] sm:$0xff]  ;;  %v2656_v19 = vld [vmem:[%s5624_s7 + $0x130] sm:$0xff] }
 0x2d8   :  { %v2488_v16 = vmax.f32 %v2456_v46, %v2457_v42  ;;  %v2442_v49 = vadd.f32 %v2290_v51, %v5398_v7  ;;  %v2450_v13 = vadd.f32 %v2419_v26, %v5400_v34  ;;  %3259 = vmatprep.subr.mxu1 %v3319_v15  ;;  %v2752_v7 = vld [vmem:[%s5624_s7 + $0x1e0] sm:$0xff]  ;;  %v2659_v46 = vld [vmem:[%s5624_s7 + $0x148] sm:$0xff] }
 0x2d9   :  { %3260 = vmatpush3.msra.mxu1 %v2754_v48  ;;  %v2292_v40 = vpop.f32.mrf.mxu0  ;;  %v2421_v61 = vpop.f32.mrf.mxu1  ;;  %v2655_v42 = vld [vmem:[%s5624_s7 + $0x128] sm:$0xff]  ;;  %v2654_v51 = vld [vmem:[%s5624_s7 + $0x120] sm:$0xff] }
 0x2da   :  { %v2489_v37 = vadd.f32 %v5421_v44, %v2488_v16  ;;  %v2458_v54 = vmax.f32 %v2442_v49, %v2450_v13  ;;  %3261 = vmatprep.subr.mxu1 %v3319_v15  ;;  %v2741_v48 = vld [vmem:[%s5624_s7 + $0x188] sm:$0xff]  ;;  %v2740_v26 = vld [vmem:[%s5624_s7 + $0x180] sm:$0xff]  ;;  %v2653_v49 = vld [vmem:[%s5624_s7 + $0x118] sm:$0xff] }
 0x2db   :  { %3262 = vmatpush3.msra.mxu1 %v2753_v52  ;;  %v2295_v34 = vpop.f32.mrf.mxu0  ;;  %v2424_v55 = vpop.f32.mrf.mxu1  ;;  %v2652_v13 = vld [vmem:[%s5624_s7 + $0x110] sm:$0xff]  ;;  %v2651_v40 = vld [vmem:[%s5624_s7 + $0x108] sm:$0xff]  ;;  %v2650_v61 = vld [vmem:[%s5624_s7 + $0x100] sm:$0xff] }
 0x2dc   :  { %v2490_v57 = vmax.f32 %v2489_v37, 0.0  ;;  %v2443_v28 = vadd.f32 %v2295_v34, %v5402_v0  ;;  %v2451_v59 = vadd.f32 %v2424_v55, %v5404_v20  ;;  %3263 = vmatprep.subr.mxu1 %v3319_v15  ;;  %v2138_v0 = vadd.f32 %v5408_v23, %v5388_v39  ;;  %v2663_v23 = vld [vmem:[%s5624_s7 + $0x168] sm:$0xff]  ;;  %v2840_v34 = vld [vmem:[%s5626_s9 + $0x20] sm:$0xff]  ;;  %v2839_v55 = vld [vmem:[%s5626_s9 + $0x18] sm:$0xff] }
 0x2dd   :  { %3264 = vmatpush3.msra.mxu1 %v2752_v7  ;;  %v2297_v3 = vpop.f32.mrf.mxu0  ;;  %v2426_v4 = vpop.f32.mrf.mxu1  ;;  %v2841_v7 = vld [vmem:[%s5626_s9 + $0x28] sm:$0xff] }
 0x2de   :  { %v2459_v20 = vmax.f32 %v2443_v28, %v2451_v59  ;;  %3265 = vmatprep.subr.mxu1 %v3319_v15  ;;  %3185 = vmatmul.mubr.f32.vlgmr.msra.gmra.mxu0 %v2490_v57  ;;  %v2838_v57 = vld [vmem:[%s5626_s9 + $0x10] sm:$0xff]  ;;  %v2837_v28 = vld [vmem:[%s5626_s9 + $0x8] sm:$0xff]  ;;  %v2836_v59 = vld [vmem:[%s5626_s9] sm:$0xff] }
 0x2df   :  { %3223 = vmatpush3.msra.mxu0 %v2665_v62  ;;  %3266 = vmatpush3.msra.mxu1 %v2751_v1  ;;  %v2300_v47 = vpop.f32.mrf.mxu0  ;;  %v2429_v24 = vpop.f32.mrf.mxu1 }
 0x2e0   :  { %v5465_v50 = vmax.f32 %v2458_v54, %v2459_v20  ;;  %v2444_v41 = vadd.f32 %v2300_v47, %v2130_v6  ;;  %v2452_v39 = vadd.f32 %v2429_v24, %v2138_v0  ;;  %3224 = vmatprep.subr.mxu0 %v3319_v15  ;;  %3267 = vmatprep.subr.mxu1 %v3319_v15  ;;  %v2842_v54 = vld [vmem:[%s5626_s9 + $0x30] sm:$0xff]  ;;  %v3072_v47 = vld [vmem:[%s5627_s8] ss:$0 sm:$0xff] }
 0x2e1   :  { %3225 = vmatpush3.msra.mxu0 %v2664_v8  ;;  %3268 = vmatpush3.msra.mxu1 %v2750_v56  ;;  %v2302_v22 = vpop.f32.mrf.mxu0  ;;  %v2431_v38 = vpop.f32.mrf.mxu1 }
 0x2e2   :  { %v2460_v45 = vmax.f32 %v2444_v41, %v2452_v39  ;;  %3226 = vmatprep.subr.mxu0 %v3319_v15  ;;  %3269 = vmatprep.subr.mxu1 %v3319_v15  ;;  %v2648_v52 = vadd.f32 %v5421_v44, %v5465_v50  ;;  %v3073_v39 = vld [vmem:[%s5628_s10] ss:$0 sm:$0xff] }
 0x2e3   :  { %3227 = vmatpush3.msra.mxu0 %v2663_v23  ;;  %3270 = vmatpush3.msra.mxu1 %v2749_v2  ;;  %v2305_v30 = vpop.f32.mrf.mxu0  ;;  %v2434_v18 = vpop.f32.mrf.mxu1 }
 0x2e4   :  { %v2445_v5 = vadd.f32 %v2305_v30, %v2131_v10  ;;  %v2453_v21 = vadd.f32 %v2434_v18, %v2139_v11  ;;  %3228 = vmatprep.subr.mxu0 %v3319_v15  ;;  %3271 = vmatprep.subr.mxu1 %v3319_v15  ;;  %v2649_v37 = vmax.f32 %v2648_v52, 0.0 }
 0x2e5   :  { %3229 = vmatpush3.msra.mxu0 %v2662_v29  ;;  %3272 = vmatpush3.msra.mxu1 %v2748_v9  ;;  %v2307_v53 = vpop.f32.mrf.mxu0  ;;  %v2436_v58 = vpop.f32.mrf.mxu1 }
 0x2e6   :  { %v2461_v63 = vmax.f32 %v2445_v5, %v2453_v21  ;;  %3230 = vmatprep.subr.mxu0 %v3319_v15  ;;  %3273 = vmatprep.subr.mxu1 %v3319_v15 }
 0x2e7   :  { %3231 = vmatpush3.msra.mxu0 %v2661_v36  ;;  %3274 = vmatpush3.msra.mxu1 %v2747_v35 }
 0x2e8   :  { %v2737_v31 = vmax.f32 %v2460_v45, %v2461_v63  ;;  %3232 = vmatprep.subr.mxu0 %v3319_v15  ;;  %3275 = vmatprep.subr.mxu1 %v3319_v15 }
 0x2e9   :  { %3233 = vmatpush3.msra.mxu0 %v2660_v32  ;;  %3276 = vmatpush3.msra.mxu1 %v2746_v12 }
 0x2ea   :  { %3234 = vmatprep.subr.mxu0 %v3319_v15  ;;  %3277 = vmatprep.subr.mxu1 %v3319_v15  ;;  %v2738_v43 = vadd.f32 %v5421_v44, %v2737_v31  ;;  %v2843_v44 = vld [vmem:[%s5626_s9 + $0x38] sm:$0xff] }
 0x2eb   :  { %3235 = vmatpush3.msra.mxu0 %v2659_v46  ;;  %3278 = vmatpush3.msra.mxu1 %v2745_v27 }
 0x2ec   :  { %3236 = vmatprep.subr.mxu0 %v3319_v15  ;;  %3279 = vmatprep.subr.mxu1 %v3319_v15  ;;  %v2739_v16 = vmax.f32 %v2738_v43, 0.0 }
 0x2ed   :  { %3237 = vmatpush3.msra.mxu0 %v2658_v25  ;;  %3280 = vmatpush3.msra.mxu1 %v2744_v17 }
 0x2ee   :  { %3238 = vmatprep.subr.mxu0 %v3319_v15  ;;  %3281 = vmatprep.subr.mxu1 %v3319_v15 }
 0x2ef   :  { %3239 = vmatpush3.msra.mxu0 %v2657_v33  ;;  %3282 = vmatpush3.msra.mxu1 %v2743_v14 }
 0x2f0   :  { %3240 = vmatprep.subr.mxu0 %v3319_v15  ;;  %3283 = vmatprep.subr.mxu1 %v3319_v15 }
 0x2f1   :  { %3241 = vmatpush3.msra.mxu0 %v2656_v19  ;;  %3284 = vmatpush3.msra.mxu1 %v2742_v60 }
 0x2f2   :  { %3242 = vmatprep.subr.mxu0 %v3319_v15  ;;  %3285 = vmatprep.subr.mxu1 %v3319_v15 }
 0x2f3   :  { %3243 = vmatpush3.msra.mxu0 %v2655_v42  ;;  %3286 = vmatpush3.msra.mxu1 %v2741_v48 }
 0x2f4   :  { %3244 = vmatprep.subr.mxu0 %v3319_v15  ;;  %3287 = vmatprep.subr.mxu1 %v3319_v15 }
 0x2f5   :  { %3245 = vmatpush3.msra.mxu0 %v2654_v51  ;;  %3288 = vmatpush3.msra.mxu1 %v2740_v26 }
 0x2f6   :  { %3246 = vmatprep.subr.mxu0 %v3319_v15  ;;  %3290 = vmatmul.mubr.f32.vlgmr.msra.gmra.mxu1 %v2739_v16 }
 0x2f7   :  { %3247 = vmatpush3.msra.mxu0 %v2653_v49  ;;  %3254 = vmatprep.mubr.msk.f32.mxu0 %vm3320_vm3, %v3319_v15 }
 0x2f8   :  { %3248 = vmatprep.subr.mxu0 %v3319_v15 }
 0x2f9   :  { %3249 = vmatpush3.msra.mxu0 %v2652_v13 }
 0x2fa   :  { %3250 = vmatprep.subr.mxu0 %v3319_v15 }
 0x2fb   :  { %3251 = vmatpush3.msra.mxu0 %v2651_v40 }
 0x2fc   :  { %3252 = vmatprep.subr.mxu0 %v3319_v15 }
 0x2fd   :  { %3253 = vmatpush3.msra.mxu0 %v2650_v61 }
 0x2fe   :  { %3255 = vmatmul.mubr.f32.vlgmr.msra.gmra.mxu0 %v2649_v37  ;;  %3292 = vmatprep.subr.mxu0 %v3319_v15 }
 0x2ff   :  { %3308 = vmatprep.mubr.msk.f32.mxu0 %vm3320_vm3, %v3319_v15  ;;  %3293 = vmatpush3.msra.mxu0 %v2843_v44 }
 0x300   :  { %3294 = vmatprep.subr.mxu0 %v3319_v15 }
 0x301   :  { %3295 = vmatpush3.msra.mxu0 %v2842_v54 }
 0x302   :  { %3296 = vmatprep.subr.mxu0 %v3319_v15 }
 0x303   :  { %3297 = vmatpush3.msra.mxu0 %v2841_v7 }
 0x304   :  { %3298 = vmatprep.subr.mxu0 %v3319_v15 }
 0x305   :  { %3299 = vmatpush3.msra.mxu0 %v2840_v34 }
 0x306   :  { %3300 = vmatprep.subr.mxu0 %v3319_v15 }
 0x307   :  { %3301 = vmatpush3.msra.mxu0 %v2839_v55 }
 0x308   :  { %3302 = vmatprep.subr.mxu0 %v3319_v15 }
 0x309   :  { %3303 = vmatpush3.msra.mxu0 %v2838_v57 }
 0x30a   :  { %3304 = vmatprep.subr.mxu0 %v3319_v15 }
 0x30b   :  { %3305 = vmatpush3.msra.mxu0 %v2837_v28 }
 0x30c   :  { %3306 = vmatprep.subr.mxu0 %v3319_v15 }
 0x30d   :  { %3307 = vmatpush3.msra.mxu0 %v2836_v59 }
 0x396   :  { %v2643_v62 = vpop.f32.mrf.mxu1 }
 0x398   :  { %v3221_v1 = vpop.f32.mrf.mxu1 }
 0x39e   :  { %v2573_v3 = vpop.f32.mrf.mxu0 }
 0x39f   :  { %v2644_v20 = vadd.f32 %v2643_v62, %v2573_v3 }
 0x3a0   :  { %v3186_v4 = vpop.f32.mrf.mxu0 }
 0x3b6   :  { %v2822_v6 = vpop.f32.mrf.mxu1 }
 0x3b8   :  { %v3291_v0 = vpop.f32.mrf.mxu1 }
 0x3be   :  { %v2732_v8 = vpop.f32.mrf.mxu0 }
 0x3bf   :  { %v2736_v56 = vadd.f32 %v2732_v8, %v2644_v20 }
 0x3c0   :  { %v3256_v24 = vpop.f32.mrf.mxu0 }
 0x3c1   :  { %v2826_v15 = vadd.f32 %v2822_v6, %v2736_v56 }
 0x3c3   :  { %v2834_v50 = vadd.f32 %v3072_v47, %v2826_v15 }
 0x3c5   :  { %v2835_v41 = vmax.f32 %v2834_v50, 0.0 }
 0x3c7   :  { %3309 = vmatmul.mubr.msk.f32.vlgmr.msra.gmra.mxu0 %vm729_vm2, %v2835_v41 }
 0x487   :  { %v2920_v23 = vpop.f32.mrf.mxu0 }
 0x488   :  { %v2921_v2 = vadd.f32 %v3073_v39, %v2920_v23 }
 0x489   :  { %v3310_v22 = vpop.f32.mrf.mxu0 }
 0x48a   :  { %2924 = vmax.xlane.f32.xlu0 %v2921_v2 }
 0x513   :  { %v2925_v38 = vpop.xlane.xlu0 %2924 }
 0x514   :  { %v2926_v10 = vsub.f32 %v2921_v2, %v2925_v38 }
 0x516   :  { %v2927_v11 = vmul.f32 1.442695, %v2926_v10 }
 0x518   :  { %3313 = vpow2.f32 %v2927_v11 }
 0x525   :  { %v3314_v45 = vpop.eup %3313 }
 0x526   :  { %2929 = vadd.xlane.f32.xlu0 %v3314_v45 }
 0x5af   :  { %v2930_v29 = vpop.xlane.xlu0 %2929 }
 0x5b0   :  { %3315 = vlog2.f32 %v2930_v29 }
 0x5bd   :  { %v3316_v9 = vpop.eup %3315 }
 0x5be   :  { %v2932_v30 = vmul.f32 0.6931472, %v3316_v9 }
 0x5c0   :  { %v2933_v18 = vsub.f32 %v2926_v10, %v2932_v30 }
 0x5c2   :  { %2934 = vst [vmem:[%s5629_s11] sm:$0xff] %v2933_v18 }

</bundles_post_ra>
